<compile_context>
chip_gen: v7x
topology: tpu7x:2x2x1
jax: 0.10.0
libtpu: 0.0.40
codegen_flags: <defaults>
</compile_context>

<pallas_src>
import jax
import jax.numpy as jnp
from jax.experimental import pallas as pl
from jax.experimental.pallas import tpu as pltpu


# ---------------------------------------------------------------------------
# Pallas kernels
# ---------------------------------------------------------------------------
def _conv_pool_relu_kernel(q00_ref, q01_ref, q10_ref, q11_ref, w_ref, b_ref, o_ref):
    # q*: [M, K] pool-quadrant im2col patches, w: [K, OC], b: [1, OC] -> o: [M, OC]
    w = w_ref[...]
    z = jnp.dot(q00_ref[...], w, preferred_element_type=jnp.float32)
    z = jnp.maximum(z, jnp.dot(q01_ref[...], w, preferred_element_type=jnp.float32))
    z = jnp.maximum(z, jnp.dot(q10_ref[...], w, preferred_element_type=jnp.float32))
    z = jnp.maximum(z, jnp.dot(q11_ref[...], w, preferred_element_type=jnp.float32))
    # max over the 2x2 pool window, then bias + ReLU (== pool(relu(conv + bias)))
    o_ref[...] = jnp.maximum(z + b_ref[...], 0.0).astype(o_ref.dtype)


def _mlp_kernel(x_ref, w1_ref, b1_ref, w2_ref, b2_ref, w3_ref, b3_ref, o_ref):
    # fc1 -> relu -> fc2 -> relu -> fc3, all resident in VMEM/vregs.
    h = jnp.dot(x_ref[...], w1_ref[...], preferred_element_type=jnp.float32) + b1_ref[...]
    h = jnp.maximum(h, 0.0)
    h = jnp.dot(h, w2_ref[...], preferred_element_type=jnp.float32) + b2_ref[...]
    h = jnp.maximum(h, 0.0)
    o_ref[...] = (jnp.dot(h, w3_ref[...], preferred_element_type=jnp.float32)
                  + b3_ref[...]).astype(o_ref.dtype)


# ---------------------------------------------------------------------------
# Pallas wrappers (tiny shapes -> single full-array block, grid=(1,))
# ---------------------------------------------------------------------------
def _conv_relu_pool(x_nhwc, w_mat, bias):
    """Fused valid Conv2d(5x5, stride 1) + bias + ReLU + MaxPool2d(2, 2).

    x_nhwc: [B, H, W, C]; w_mat: [KH*KW*C, OC] with K ordered (kh, kw, c);
    bias: [1, OC].  Returns pooled activation [B, OH//2, OW//2, OC].
    """
    B, H, W, C = x_nhwc.shape
    KH = KW = 5
    OH, OW = H - KH + 1, W - KW + 1
    PH, PW = OH // 2, OW // 2
    K = KH * KW * C
    OC = w_mat.shape[1]

    # im2col with K ordered (kh, kw, c) to match w_mat (built once at init time).
    cols = [x_nhwc[:, kh:kh + OH, kw:kw + OW, :] for kh in range(KH) for kw in range(KW)]
    patches = jnp.concatenate(cols, axis=-1)                       # [B, OH, OW, K]
    # Split into the four 2x2-pool quadrants; rows ordered (b, i_out, j_out).
    quads = [patches[:, di::2, dj::2, :].reshape(B * PH * PW, K)
             for di in (0, 1) for dj in (0, 1)]                    # 4 x [M, K]
    M = B * PH * PW

    out = pl.pallas_call(
        _conv_pool_relu_kernel,
        out_shape=jax.ShapeDtypeStruct((M, OC), jnp.float32),
        grid=(1,),
        in_specs=[pl.BlockSpec((M, K), lambda i: (0, 0))] * 4
                 + [pl.BlockSpec((K, OC), lambda i: (0, 0)),
                    pl.BlockSpec((1, OC), lambda i: (0, 0))],
        out_specs=pl.BlockSpec((M, OC), lambda i: (0, 0)),
        compiler_params=pltpu.CompilerParams(dimension_semantics=("arbitrary",)),
    )(*quads, w_mat, bias)
    return out.reshape(B, PH, PW, OC)


def _mlp(x, w1, b1, w2, b2, w3, b3):
    """Fused fc1(+ReLU) -> fc2(+ReLU) -> fc3 in one kernel. Weights are [in, out]."""
    B = x.shape[0]
    D0, D1 = w1.shape
    D2 = w2.shape[1]
    D3 = w3.shape[1]
    return pl.pallas_call(
        _mlp_kernel,
        out_shape=jax.ShapeDtypeStruct((B, D3), jnp.float32),
        grid=(1,),
        in_specs=[pl.BlockSpec((B, D0), lambda i: (0, 0)),
                  pl.BlockSpec((D0, D1), lambda i: (0, 0)),
                  pl.BlockSpec((1, D1), lambda i: (0, 0)),
                  pl.BlockSpec((D1, D2), lambda i: (0, 0)),
                  pl.BlockSpec((1, D2), lambda i: (0, 0)),
                  pl.BlockSpec((D2, D3), lambda i: (0, 0)),
                  pl.BlockSpec((1, D3), lambda i: (0, 0))],
        out_specs=pl.BlockSpec((B, D3), lambda i: (0, 0)),
        compiler_params=pltpu.CompilerParams(dimension_semantics=("arbitrary",)),
    )(x, w1, b1, w2, b2, w3, b3)


# ---------------------------------------------------------------------------
# Parameter init (PyTorch-default-style uniform) + one-time kernel-friendly layout
# ---------------------------------------------------------------------------
def init_params(key):
    ks = jax.random.split(key, 10)

    def u(k, shape, fan_in):
        b = 1.0 / jnp.sqrt(fan_in)
        return jax.random.uniform(k, shape, jnp.float32, -b, b)

    # PyTorch layouts first...
    conv1_w = u(ks[0], (6, 3, 5, 5), 3 * 5 * 5)     # OIHW
    conv1_b = u(ks[1], (6,), 3 * 5 * 5)
    conv2_w = u(ks[2], (16, 6, 5, 5), 6 * 5 * 5)    # OIHW
    conv2_b = u(ks[3], (16,), 6 * 5 * 5)
    fc1_w = u(ks[4], (120, 400), 400)               # [out, in]
    fc1_b = u(ks[5], (120,), 400)
    fc2_w = u(ks[6], (84, 120), 120)
    fc2_b = u(ks[7], (84,), 120)
    fc3_w = u(ks[8], (10, 84), 84)
    fc3_b = u(ks[9], (10,), 84)

    # ...then pre-layout everything ONCE so forward() does zero weight reshapes/transposes.
    # conv OIHW -> [ (kh, kw, c), oc ] to match the im2col K ordering.
    conv1_w_mat = jnp.transpose(conv1_w, (2, 3, 1, 0)).reshape(5 * 5 * 3, 6)
    conv2_w_mat = jnp.transpose(conv2_w, (2, 3, 1, 0)).reshape(5 * 5 * 6, 16)
    # fc1: permute input columns from PyTorch's NCHW flatten (c*25 + i*5 + j) to the
    # NHWC flatten (i*80 + j*16 + c) that the conv2 kernel output produces.
    fc1_w_mat = jnp.transpose(fc1_w.reshape(120, 16, 5, 5), (2, 3, 1, 0)).reshape(400, 120)

    return {
        "conv1_w_mat": conv1_w_mat, "conv1_b": conv1_b.reshape(1, 6),
        "conv2_w_mat": conv2_w_mat, "conv2_b": conv2_b.reshape(1, 16),
        "fc1_w_mat": fc1_w_mat,     "fc1_b": fc1_b.reshape(1, 120),
        "fc2_w_mat": fc2_w.T,       "fc2_b": fc2_b.reshape(1, 84),
        "fc3_w_mat": fc3_w.T,       "fc3_b": fc3_b.reshape(1, 10),
    }


# ---------------------------------------------------------------------------
# Forward pass (mirrors TheModelClass.forward)
# ---------------------------------------------------------------------------
@jax.jit
def forward(params, x_nchw):
    B = x_nchw.shape[0]
    x = jnp.transpose(x_nchw, (0, 2, 3, 1))                                  # NCHW -> NHWC
    # pool(relu(conv1(x)))  — one fused Pallas kernel
    x = _conv_relu_pool(x, params["conv1_w_mat"], params["conv1_b"])          # [B,14,14,6]
    # pool(relu(conv2(x)))  — one fused Pallas kernel
    x = _conv_relu_pool(x, params["conv2_w_mat"], params["conv2_b"])          # [B,5,5,16]
    # x.view(-1, 400): NHWC flatten; fc1 columns were permuted at init to match
    # PyTorch's NCHW view(-1, 16*5*5) semantics exactly (no runtime transpose).
    x = x.reshape(B, 400)
    # fc1 -> relu -> fc2 -> relu -> fc3 — one fused Pallas kernel
    return _mlp(x, params["fc1_w_mat"], params["fc1_b"],
                params["fc2_w_mat"], params["fc2_b"],
                params["fc3_w_mat"], params["fc3_b"])                         # [B,10]


if __name__ == "__main__":
    key = jax.random.PRNGKey(0)
    pkey, xkey = jax.random.split(key)
    params = init_params(pkey)
    # Input consistent with the module: the 16*5*5 flatten implies 3x32x32 images.
    x = jax.random.normal(xkey, (2, 3, 32, 32), dtype=jnp.float32)  # NCHW
    out = forward(params, x)
    out = jax.block_until_ready(out)
    assert out.shape == (2, 10), out.shape
    print("KERNEL_OK")
</pallas_src>

<mosaic_0001>
module attributes {stable_mosaic.version = 11 : i64} {
  func.func @_conv_pool_relu_kernel(%arg0: i32, %arg1: memref<392x75xf32, #tpu.memory_space<vmem>>, %arg2: memref<392x75xf32, #tpu.memory_space<vmem>>, %arg3: memref<392x75xf32, #tpu.memory_space<vmem>>, %arg4: memref<392x75xf32, #tpu.memory_space<vmem>>, %arg5: memref<75x6xf32, #tpu.memory_space<vmem>>, %arg6: memref<1x6xf32, #tpu.memory_space<vmem>>, %arg7: memref<392x6xf32, #tpu.memory_space<vmem>>) attributes {dimension_semantics = [#tpu.dimension_semantics<arbitrary>], iteration_bounds = array<i64: 1>, scalar_prefetch = 0 : i64, scratch_operands = 0 : i64, tpu.core_type = #tpu.core_type<tc>, window_params = [{pipeline_mode = #tpu.pipeline_mode<synchronous>, transform_indices = @transform_0, window_bounds = array<i64: 392, 75>}, {pipeline_mode = #tpu.pipeline_mode<synchronous>, transform_indices = @transform_1, window_bounds = array<i64: 392, 75>}, {pipeline_mode = #tpu.pipeline_mode<synchronous>, transform_indices = @transform_2, window_bounds = array<i64: 392, 75>}, {pipeline_mode = #tpu.pipeline_mode<synchronous>, transform_indices = @transform_3, window_bounds = array<i64: 392, 75>}, {pipeline_mode = #tpu.pipeline_mode<synchronous>, transform_indices = @transform_4, window_bounds = array<i64: 75, 6>}, {pipeline_mode = #tpu.pipeline_mode<synchronous>, transform_indices = @transform_5, window_bounds = array<i64: 1, 6>}, {pipeline_mode = #tpu.pipeline_mode<synchronous>, transform_indices = @transform_6, window_bounds = array<i64: 392, 6>}]} {
    %c0 = arith.constant 0 : index
    %c0_0 = arith.constant 0 : index
    %0 = vector.load %arg5[%c0, %c0_0] : memref<75x6xf32, #tpu.memory_space<vmem>>, vector<75x6xf32>
    %c0_1 = arith.constant 0 : index
    %c0_2 = arith.constant 0 : index
    %1 = vector.load %arg1[%c0_1, %c0_2] : memref<392x75xf32, #tpu.memory_space<vmem>>, vector<392x75xf32>
    %cst = arith.constant dense<0.000000e+00> : vector<392x6xf32>
    %2 = tpu.matmul %1, %0, %cst {dimension_numbers = #tpu.dot_dimension_numbers<[1], [0], [0], [1], [0, 0, 1, 1], [], []>} : vector<392x75xf32>, vector<75x6xf32>, vector<392x6xf32> -> vector<392x6xf32>
    %c0_3 = arith.constant 0 : index
    %c0_4 = arith.constant 0 : index
    %3 = vector.load %arg2[%c0_3, %c0_4] : memref<392x75xf32, #tpu.memory_space<vmem>>, vector<392x75xf32>
    %cst_5 = arith.constant dense<0.000000e+00> : vector<392x6xf32>
    %4 = tpu.matmul %3, %0, %cst_5 {dimension_numbers = #tpu.dot_dimension_numbers<[1], [0], [0], [1], [0, 0, 1, 1], [], []>} : vector<392x75xf32>, vector<75x6xf32>, vector<392x6xf32> -> vector<392x6xf32>
    %5 = arith.maximumf %2, %4 : vector<392x6xf32>
    %c0_6 = arith.constant 0 : index
    %c0_7 = arith.constant 0 : index
    %6 = vector.load %arg3[%c0_6, %c0_7] : memref<392x75xf32, #tpu.memory_space<vmem>>, vector<392x75xf32>
    %cst_8 = arith.constant dense<0.000000e+00> : vector<392x6xf32>
    %7 = tpu.matmul %6, %0, %cst_8 {dimension_numbers = #tpu.dot_dimension_numbers<[1], [0], [0], [1], [0, 0, 1, 1], [], []>} : vector<392x75xf32>, vector<75x6xf32>, vector<392x6xf32> -> vector<392x6xf32>
    %8 = arith.maximumf %5, %7 : vector<392x6xf32>
    %c0_9 = arith.constant 0 : index
    %c0_10 = arith.constant 0 : index
    %9 = vector.load %arg4[%c0_9, %c0_10] : memref<392x75xf32, #tpu.memory_space<vmem>>, vector<392x75xf32>
    %cst_11 = arith.constant dense<0.000000e+00> : vector<392x6xf32>
    %10 = tpu.matmul %9, %0, %cst_11 {dimension_numbers = #tpu.dot_dimension_numbers<[1], [0], [0], [1], [0, 0, 1, 1], [], []>} : vector<392x75xf32>, vector<75x6xf32>, vector<392x6xf32> -> vector<392x6xf32>
    %11 = arith.maximumf %8, %10 : vector<392x6xf32>
    %c0_12 = arith.constant 0 : index
    %c0_13 = arith.constant 0 : index
    %12 = vector.load %arg6[%c0_12, %c0_13] : memref<1x6xf32, #tpu.memory_space<vmem>>, vector<1x6xf32>
    %13 = vector.broadcast %12 : vector<1x6xf32> to vector<392x6xf32>
    %14 = arith.addf %11, %13 : vector<392x6xf32>
    %cst_14 = arith.constant 0.000000e+00 : f32
    %15 = vector.broadcast %cst_14 : f32 to vector<392x6xf32>
    %16 = arith.maximumf %14, %15 : vector<392x6xf32>
    %c0_15 = arith.constant 0 : index
    %c0_16 = arith.constant 0 : index
    %17 = vector.load %arg7[%c0_15, %c0_16] : memref<392x6xf32, #tpu.memory_space<vmem>>, vector<392x6xf32>
    tpu.vector_store %arg7[%c0_15, %c0_16], %16 {strides = array<i32>} : memref<392x6xf32, #tpu.memory_space<vmem>>, vector<392x6xf32>,
    return
  }
  func.func @transform_0(%arg0: i32) -> (i32, i32) {
    %c0_i32 = arith.constant 0 : i32
    %c0_i32_0 = arith.constant 0 : i32
    %c0_i32_1 = arith.constant 0 : i32
    return %c0_i32, %c0_i32_0 : i32, i32
  }
  func.func @transform_1(%arg0: i32) -> (i32, i32) {
    %c0_i32 = arith.constant 0 : i32
    %c0_i32_0 = arith.constant 0 : i32
    %c0_i32_1 = arith.constant 0 : i32
    return %c0_i32, %c0_i32_0 : i32, i32
  }
  func.func @transform_2(%arg0: i32) -> (i32, i32) {
    %c0_i32 = arith.constant 0 : i32
    %c0_i32_0 = arith.constant 0 : i32
    %c0_i32_1 = arith.constant 0 : i32
    return %c0_i32, %c0_i32_0 : i32, i32
  }
  func.func @transform_3(%arg0: i32) -> (i32, i32) {
    %c0_i32 = arith.constant 0 : i32
    %c0_i32_0 = arith.constant 0 : i32
    %c0_i32_1 = arith.constant 0 : i32
    return %c0_i32, %c0_i32_0 : i32, i32
  }
  func.func @transform_4(%arg0: i32) -> (i32, i32) {
    %c0_i32 = arith.constant 0 : i32
    %c0_i32_0 = arith.constant 0 : i32
    %c0_i32_1 = arith.constant 0 : i32
    return %c0_i32, %c0_i32_0 : i32, i32
  }
  func.func @transform_5(%arg0: i32) -> (i32, i32) {
    %c0_i32 = arith.constant 0 : i32
    %c0_i32_0 = arith.constant 0 : i32
    %c0_i32_1 = arith.constant 0 : i32
    return %c0_i32, %c0_i32_0 : i32, i32
  }
  func.func @transform_6(%arg0: i32) -> (i32, i32) {
    %c0_i32 = arith.constant 0 : i32
    %c0_i32_0 = arith.constant 0 : i32
    %c0_i32_1 = arith.constant 0 : i32
    return %c0_i32, %c0_i32_0 : i32, i32
  }
}

module attributes {stable_mosaic.version = 11 : i64} {
  func.func @_conv_pool_relu_kernel(%arg0: i32, %arg1: memref<50x150xf32, #tpu.memory_space<vmem>>, %arg2: memref<50x150xf32, #tpu.memory_space<vmem>>, %arg3: memref<50x150xf32, #tpu.memory_space<vmem>>, %arg4: memref<50x150xf32, #tpu.memory_space<vmem>>, %arg5: memref<150x16xf32, #tpu.memory_space<vmem>>, %arg6: memref<1x16xf32, #tpu.memory_space<vmem>>, %arg7: memref<50x16xf32, #tpu.memory_space<vmem>>) attributes {dimension_semantics = [#tpu.dimension_semantics<arbitrary>], iteration_bounds = array<i64: 1>, scalar_prefetch = 0 : i64, scratch_operands = 0 : i64, tpu.core_type = #tpu.core_type<tc>, window_params = [{pipeline_mode = #tpu.pipeline_mode<synchronous>, transform_indices = @transform_0, window_bounds = array<i64: 50, 150>}, {pipeline_mode = #tpu.pipeline_mode<synchronous>, transform_indices = @transform_1, window_bounds = array<i64: 50, 150>}, {pipeline_mode = #tpu.pipeline_mode<synchronous>, transform_indices = @transform_2, window_bounds = array<i64: 50, 150>}, {pipeline_mode = #tpu.pipeline_mode<synchronous>, transform_indices = @transform_3, window_bounds = array<i64: 50, 150>}, {pipeline_mode = #tpu.pipeline_mode<synchronous>, transform_indices = @transform_4, window_bounds = array<i64: 150, 16>}, {pipeline_mode = #tpu.pipeline_mode<synchronous>, transform_indices = @transform_5, window_bounds = array<i64: 1, 16>}, {pipeline_mode = #tpu.pipeline_mode<synchronous>, transform_indices = @transform_6, window_bounds = array<i64: 50, 16>}]} {
    %c0 = arith.constant 0 : index
    %c0_0 = arith.constant 0 : index
    %0 = vector.load %arg5[%c0, %c0_0] : memref<150x16xf32, #tpu.memory_space<vmem>>, vector<150x16xf32>
    %c0_1 = arith.constant 0 : index
    %c0_2 = arith.constant 0 : index
    %1 = vector.load %arg1[%c0_1, %c0_2] : memref<50x150xf32, #tpu.memory_space<vmem>>, vector<50x150xf32>
    %cst = arith.constant dense<0.000000e+00> : vector<50x16xf32>
    %2 = tpu.matmul %1, %0, %cst {dimension_numbers = #tpu.dot_dimension_numbers<[1], [0], [0], [1], [0, 0, 1, 1], [], []>} : vector<50x150xf32>, vector<150x16xf32>, vector<50x16xf32> -> vector<50x16xf32>
    %c0_3 = arith.constant 0 : index
    %c0_4 = arith.constant 0 : index
    %3 = vector.load %arg2[%c0_3, %c0_4] : memref<50x150xf32, #tpu.memory_space<vmem>>, vector<50x150xf32>
    %cst_5 = arith.constant dense<0.000000e+00> : vector<50x16xf32>
    %4 = tpu.matmul %3, %0, %cst_5 {dimension_numbers = #tpu.dot_dimension_numbers<[1], [0], [0], [1], [0, 0, 1, 1], [], []>} : vector<50x150xf32>, vector<150x16xf32>, vector<50x16xf32> -> vector<50x16xf32>
    %5 = arith.maximumf %2, %4 : vector<50x16xf32>
    %c0_6 = arith.constant 0 : index
    %c0_7 = arith.constant 0 : index
    %6 = vector.load %arg3[%c0_6, %c0_7] : memref<50x150xf32, #tpu.memory_space<vmem>>, vector<50x150xf32>
    %cst_8 = arith.constant dense<0.000000e+00> : vector<50x16xf32>
    %7 = tpu.matmul %6, %0, %cst_8 {dimension_numbers = #tpu.dot_dimension_numbers<[1], [0], [0], [1], [0, 0, 1, 1], [], []>} : vector<50x150xf32>, vector<150x16xf32>, vector<50x16xf32> -> vector<50x16xf32>
    %8 = arith.maximumf %5, %7 : vector<50x16xf32>
    %c0_9 = arith.constant 0 : index
    %c0_10 = arith.constant 0 : index
    %9 = vector.load %arg4[%c0_9, %c0_10] : memref<50x150xf32, #tpu.memory_space<vmem>>, vector<50x150xf32>
    %cst_11 = arith.constant dense<0.000000e+00> : vector<50x16xf32>
    %10 = tpu.matmul %9, %0, %cst_11 {dimension_numbers = #tpu.dot_dimension_numbers<[1], [0], [0], [1], [0, 0, 1, 1], [], []>} : vector<50x150xf32>, vector<150x16xf32>, vector<50x16xf32> -> vector<50x16xf32>
    %11 = arith.maximumf %8, %10 : vector<50x16xf32>
    %c0_12 = arith.constant 0 : index
    %c0_13 = arith.constant 0 : index
    %12 = vector.load %arg6[%c0_12, %c0_13] : memref<1x16xf32, #tpu.memory_space<vmem>>, vector<1x16xf32>
    %13 = vector.broadcast %12 : vector<1x16xf32> to vector<50x16xf32>
    %14 = arith.addf %11, %13 : vector<50x16xf32>
    %cst_14 = arith.constant 0.000000e+00 : f32
    %15 = vector.broadcast %cst_14 : f32 to vector<50x16xf32>
    %16 = arith.maximumf %14, %15 : vector<50x16xf32>
    %c0_15 = arith.constant 0 : index
    %c0_16 = arith.constant 0 : index
    %17 = vector.load %arg7[%c0_15, %c0_16] : memref<50x16xf32, #tpu.memory_space<vmem>>, vector<50x16xf32>
    tpu.vector_store %arg7[%c0_15, %c0_16], %16 {strides = array<i32>} : memref<50x16xf32, #tpu.memory_space<vmem>>, vector<50x16xf32>,
    return
  }
  func.func @transform_0(%arg0: i32) -> (i32, i32) {
    %c0_i32 = arith.constant 0 : i32
    %c0_i32_0 = arith.constant 0 : i32
    %c0_i32_1 = arith.constant 0 : i32
    return %c0_i32, %c0_i32_0 : i32, i32
  }
  func.func @transform_1(%arg0: i32) -> (i32, i32) {
    %c0_i32 = arith.constant 0 : i32
    %c0_i32_0 = arith.constant 0 : i32
    %c0_i32_1 = arith.constant 0 : i32
    return %c0_i32, %c0_i32_0 : i32, i32
  }
  func.func @transform_2(%arg0: i32) -> (i32, i32) {
    %c0_i32 = arith.constant 0 : i32
    %c0_i32_0 = arith.constant 0 : i32
    %c0_i32_1 = arith.constant 0 : i32
    return %c0_i32, %c0_i32_0 : i32, i32
  }
  func.func @transform_3(%arg0: i32) -> (i32, i32) {
    %c0_i32 = arith.constant 0 : i32
    %c0_i32_0 = arith.constant 0 : i32
    %c0_i32_1 = arith.constant 0 : i32
    return %c0_i32, %c0_i32_0 : i32, i32
  }
  func.func @transform_4(%arg0: i32) -> (i32, i32) {
    %c0_i32 = arith.constant 0 : i32
    %c0_i32_0 = arith.constant 0 : i32
    %c0_i32_1 = arith.constant 0 : i32
    return %c0_i32, %c0_i32_0 : i32, i32
  }
  func.func @transform_5(%arg0: i32) -> (i32, i32) {
    %c0_i32 = arith.constant 0 : i32
    %c0_i32_0 = arith.constant 0 : i32
    %c0_i32_1 = arith.constant 0 : i32
    return %c0_i32, %c0_i32_0 : i32, i32
  }
  func.func @transform_6(%arg0: i32) -> (i32, i32) {
    %c0_i32 = arith.constant 0 : i32
    %c0_i32_0 = arith.constant 0 : i32
    %c0_i32_1 = arith.constant 0 : i32
    return %c0_i32, %c0_i32_0 : i32, i32
  }
}

module attributes {stable_mosaic.version = 11 : i64} {
  func.func @_mlp_kernel(%arg0: i32, %arg1: memref<2x400xf32, #tpu.memory_space<vmem>>, %arg2: memref<400x120xf32, #tpu.memory_space<vmem>>, %arg3: memref<1x120xf32, #tpu.memory_space<vmem>>, %arg4: memref<120x84xf32, #tpu.memory_space<vmem>>, %arg5: memref<1x84xf32, #tpu.memory_space<vmem>>, %arg6: memref<84x10xf32, #tpu.memory_space<vmem>>, %arg7: memref<1x10xf32, #tpu.memory_space<vmem>>, %arg8: memref<2x10xf32, #tpu.memory_space<vmem>>) attributes {dimension_semantics = [#tpu.dimension_semantics<arbitrary>], iteration_bounds = array<i64: 1>, scalar_prefetch = 0 : i64, scratch_operands = 0 : i64, tpu.core_type = #tpu.core_type<tc>, window_params = [{pipeline_mode = #tpu.pipeline_mode<synchronous>, transform_indices = @transform_0, window_bounds = array<i64: 2, 400>}, {pipeline_mode = #tpu.pipeline_mode<synchronous>, transform_indices = @transform_1, window_bounds = array<i64: 400, 120>}, {pipeline_mode = #tpu.pipeline_mode<synchronous>, transform_indices = @transform_2, window_bounds = array<i64: 1, 120>}, {pipeline_mode = #tpu.pipeline_mode<synchronous>, transform_indices = @transform_3, window_bounds = array<i64: 120, 84>}, {pipeline_mode = #tpu.pipeline_mode<synchronous>, transform_indices = @transform_4, window_bounds = array<i64: 1, 84>}, {pipeline_mode = #tpu.pipeline_mode<synchronous>, transform_indices = @transform_5, window_bounds = array<i64: 84, 10>}, {pipeline_mode = #tpu.pipeline_mode<synchronous>, transform_indices = @transform_6, window_bounds = array<i64: 1, 10>}, {pipeline_mode = #tpu.pipeline_mode<synchronous>, transform_indices = @transform_7, window_bounds = array<i64: 2, 10>}]} {
    %c0 = arith.constant 0 : index
    %c0_0 = arith.constant 0 : index
    %0 = vector.load %arg1[%c0, %c0_0] : memref<2x400xf32, #tpu.memory_space<vmem>>, vector<2x400xf32>
    %c0_1 = arith.constant 0 : index
    %c0_2 = arith.constant 0 : index
    %1 = vector.load %arg2[%c0_1, %c0_2] : memref<400x120xf32, #tpu.memory_space<vmem>>, vector<400x120xf32>
    %cst = arith.constant dense<0.000000e+00> : vector<2x120xf32>
    %2 = tpu.matmul %0, %1, %cst {dimension_numbers = #tpu.dot_dimension_numbers<[1], [0], [0], [1], [0, 0, 1, 1], [], []>} : vector<2x400xf32>, vector<400x120xf32>, vector<2x120xf32> -> vector<2x120xf32>
    %c0_3 = arith.constant 0 : index
    %c0_4 = arith.constant 0 : index
    %3 = vector.load %arg3[%c0_3, %c0_4] : memref<1x120xf32, #tpu.memory_space<vmem>>, vector<1x120xf32>
    %4 = vector.broadcast %3 : vector<1x120xf32> to vector<2x120xf32>
    %5 = arith.addf %2, %4 : vector<2x120xf32>
    %cst_5 = arith.constant 0.000000e+00 : f32
    %6 = vector.broadcast %cst_5 : f32 to vector<2x120xf32>
    %7 = arith.maximumf %5, %6 : vector<2x120xf32>
    %c0_6 = arith.constant 0 : index
    %c0_7 = arith.constant 0 : index
    %8 = vector.load %arg4[%c0_6, %c0_7] : memref<120x84xf32, #tpu.memory_space<vmem>>, vector<120x84xf32>
    %cst_8 = arith.constant dense<0.000000e+00> : vector<2x84xf32>
    %9 = tpu.matmul %7, %8, %cst_8 {dimension_numbers = #tpu.dot_dimension_numbers<[1], [0], [0], [1], [0, 0, 1, 1], [], []>} : vector<2x120xf32>, vector<120x84xf32>, vector<2x84xf32> -> vector<2x84xf32>
    %c0_9 = arith.constant 0 : index
    %c0_10 = arith.constant 0 : index
    %10 = vector.load %arg5[%c0_9, %c0_10] : memref<1x84xf32, #tpu.memory_space<vmem>>, vector<1x84xf32>
    %11 = vector.broadcast %10 : vector<1x84xf32> to vector<2x84xf32>
    %12 = arith.addf %9, %11 : vector<2x84xf32>
    %cst_11 = arith.constant 0.000000e+00 : f32
    %13 = vector.broadcast %cst_11 : f32 to vector<2x84xf32>
    %14 = arith.maximumf %12, %13 : vector<2x84xf32>
    %c0_12 = arith.constant 0 : index
    %c0_13 = arith.constant 0 : index
    %15 = vector.load %arg6[%c0_12, %c0_13] : memref<84x10xf32, #tpu.memory_space<vmem>>, vector<84x10xf32>
    %cst_14 = arith.constant dense<0.000000e+00> : vector<2x10xf32>
    %16 = tpu.matmul %14, %15, %cst_14 {dimension_numbers = #tpu.dot_dimension_numbers<[1], [0], [0], [1], [0, 0, 1, 1], [], []>} : vector<2x84xf32>, vector<84x10xf32>, vector<2x10xf32> -> vector<2x10xf32>
    %c0_15 = arith.constant 0 : index
    %c0_16 = arith.constant 0 : index
    %17 = vector.load %arg7[%c0_15, %c0_16] : memref<1x10xf32, #tpu.memory_space<vmem>>, vector<1x10xf32>
    %18 = vector.broadcast %17 : vector<1x10xf32> to vector<2x10xf32>
    %19 = arith.addf %16, %18 : vector<2x10xf32>
    %c0_17 = arith.constant 0 : index
    %c0_18 = arith.constant 0 : index
    %20 = vector.load %arg8[%c0_17, %c0_18] : memref<2x10xf32, #tpu.memory_space<vmem>>, vector<2x10xf32>
    tpu.vector_store %arg8[%c0_17, %c0_18], %19 {strides = array<i32>} : memref<2x10xf32, #tpu.memory_space<vmem>>, vector<2x10xf32>,
    return
  }
  func.func @transform_0(%arg0: i32) -> (i32, i32) {
    %c0_i32 = arith.constant 0 : i32
    %c0_i32_0 = arith.constant 0 : i32
    %c0_i32_1 = arith.constant 0 : i32
    return %c0_i32, %c0_i32_0 : i32, i32
  }
  func.func @transform_1(%arg0: i32) -> (i32, i32) {
    %c0_i32 = arith.constant 0 : i32
    %c0_i32_0 = arith.constant 0 : i32
    %c0_i32_1 = arith.constant 0 : i32
    return %c0_i32, %c0_i32_0 : i32, i32
  }
  func.func @transform_2(%arg0: i32) -> (i32, i32) {
    %c0_i32 = arith.constant 0 : i32
    %c0_i32_0 = arith.constant 0 : i32
    %c0_i32_1 = arith.constant 0 : i32
    return %c0_i32, %c0_i32_0 : i32, i32
  }
  func.func @transform_3(%arg0: i32) -> (i32, i32) {
    %c0_i32 = arith.constant 0 : i32
    %c0_i32_0 = arith.constant 0 : i32
    %c0_i32_1 = arith.constant 0 : i32
    return %c0_i32, %c0_i32_0 : i32, i32
  }
  func.func @transform_4(%arg0: i32) -> (i32, i32) {
    %c0_i32 = arith.constant 0 : i32
    %c0_i32_0 = arith.constant 0 : i32
    %c0_i32_1 = arith.constant 0 : i32
    return %c0_i32, %c0_i32_0 : i32, i32
  }
  func.func @transform_5(%arg0: i32) -> (i32, i32) {
    %c0_i32 = arith.constant 0 : i32
    %c0_i32_0 = arith.constant 0 : i32
    %c0_i32_1 = arith.constant 0 : i32
    return %c0_i32, %c0_i32_0 : i32, i32
  }
  func.func @transform_6(%arg0: i32) -> (i32, i32) {
    %c0_i32 = arith.constant 0 : i32
    %c0_i32_0 = arith.constant 0 : i32
    %c0_i32_1 = arith.constant 0 : i32
    return %c0_i32, %c0_i32_0 : i32, i32
  }
  func.func @transform_7(%arg0: i32) -> (i32, i32) {
    %c0_i32 = arith.constant 0 : i32
    %c0_i32_0 = arith.constant 0 : i32
    %c0_i32_1 = arith.constant 0 : i32
    return %c0_i32, %c0_i32_0 : i32, i32
  }
}

</mosaic_0001>

<bundles_post_ra>
// kernel: forward.3
= control target key start
LH: loop header
LB: loop body
LE: loop exit
PB: predicated region body
PF: predicated region fallthrough
CT: control target
= control target key end

     0   :  { %v3541_v0 = vmov 0.0|0.0   ;;  %vm3542_vm0 = vmmov 0   ;;  %v3543_v6 = vmov 0.0   ;;  %vm230_vm1 = vcmask 1042432   ;;  %s5509_s4 = inlined_call_operand.vmem [shape: f32[75,6], index: 4, kind: input, shape index: {}]   ;;  %s5510_s0 = inlined_call_operand.vmem [shape: f32[392,75], index: 0, kind: input, shape index: {}]   ;;  %s5511_s1 = inlined_call_operand.vmem [shape: f32[392,75], index: 1, kind: input, shape index: {}]   ;;  %s5512_s2 = inlined_call_operand.vmem [shape: f32[392,75], index: 2, kind: input, shape index: {}]   ;;  %s5513_s3 = inlined_call_operand.vmem [shape: f32[392,75], index: 3, kind: input, shape index: {}]   ;;  %s5514_s5 = inlined_call_operand.vmem [shape: f32[1,6], index: 5, kind: input, shape index: {}]   ;;  %s5515_s6 = inlined_call_operand.vmem [shape: f32[392,6], index: 6, kind: output, shape index: {}]  }
   0x1   :  { %3473 = vmatprep.subr.bf16.mxu0 %v3541_v0  ;;  %v23_v1 = vld [vmem:[%s5509_s4] sm:$0xff]  ;;  %v24_v2 = vld [vmem:[%s5509_s4 + $0x8] sm:$0xff]  ;;  %3489 = vmatprep.subr.bf16.mxu1 %v3541_v0  ;;  %v25_v3 = vld [vmem:[%s5509_s4 + $0x10] sm:$0xff]  ;;  %vm3544_vm2 = vmmov 1   ;;  %vm82_vm4 = vcmask 613376   ;;  %vm2314_vm5 = vcmask 48128  }
   0x2   :  { %v3474_v4 = vpack.c.bf16 %v24_v2, %v23_v1  ;;  %v26_v5 = vld [vmem:[%s5509_s4 + $0x18] sm:$0xff]  ;;  %2825 = vmatprep.mubr.msk.f32.mxu0 %vm3542_vm0, %v3543_v6  ;;  %2992 = vmatprep.mubr.msk.f32.mxu1 %vm3542_vm0, %v3543_v6  ;;  %v27_v8 = vld [vmem:[%s5509_s4 + $0x20] sm:$0xff]  ;;  %v28_v9 = vld [vmem:[%s5509_s4 + $0x28] sm:$0xff] }
   0x3   :  { %v3477_v7 = vpack.c.bf16 %v26_v5, %v25_v3  ;;  %v3480_v10 = vpack.c.bf16 %v28_v9, %v27_v8  ;;  %v29_v11 = vld [vmem:[%s5509_s4 + $0x30] sm:$0xff]  ;;  %v30_v12 = vld [vmem:[%s5509_s4 + $0x38] sm:$0xff]  ;;  %v31_v14 = vld [vmem:[%s5509_s4 + $0x40] sm:$0xff] }
   0x4   :  { %3475 = vmatpush3.bf16.msra.mxu0 %v3474_v4  ;;  %3491 = vmatpush3.bf16.msra.mxu1 %v3474_v4  ;;  %v3483_v13 = vpack.c.bf16 %v30_v12, %v29_v11  ;;  %v32_v15 = vld [vmem:[%s5509_s4 + $0x48] sm:$0x7]  ;;  %vm3623_vm3 = vmpackc.low %vm230_vm1, %vm3544_vm2  ;;  %v33_v18 = vld [vmem:[%s5510_s0] sm:$0xff] }
   0x5   :  { %3476 = vmatprep.subr.bf16.mxu0 %v3541_v0  ;;  %3492 = vmatprep.subr.bf16.mxu1 %v3541_v0  ;;  %v3486_v16 = vpack.c.bf16 %v32_v15, %v31_v14  ;;  %v544_v19 = vld [vmem:[%s5511_s1] sm:$0xff]  ;;  %v34_v20 = vld [vmem:[%s5510_s0 + $0x8] sm:$0xff]  ;;  %v35_v22 = vld [vmem:[%s5510_s0 + $0x10] sm:$0xff] }
   0x6   :  { %v545_v21 = vld [vmem:[%s5511_s1 + $0x8] sm:$0xff]  ;;  %v546_v23 = vld [vmem:[%s5511_s1 + $0x10] sm:$0xff]  ;;  %v36_v24 = vld [vmem:[%s5510_s0 + $0x18] sm:$0xff] }
   0x7   :  { %v547_v25 = vld [vmem:[%s5511_s1 + $0x18] sm:$0xff]  ;;  %v37_v26 = vld [vmem:[%s5510_s0 + $0x20] sm:$0xff]  ;;  %v38_v28 = vld [vmem:[%s5510_s0 + $0x28] sm:$0xff] }
   0x8   :  { %3478 = vmatpush3.bf16.msra.mxu0 %v3477_v7  ;;  %3494 = vmatpush3.bf16.msra.mxu1 %v3477_v7  ;;  %v548_v27 = vld [vmem:[%s5511_s1 + $0x20] sm:$0xff]  ;;  %v549_v29 = vld [vmem:[%s5511_s1 + $0x28] sm:$0xff]  ;;  %v39_v30 = vld [vmem:[%s5510_s0 + $0x30] sm:$0xff] }
   0x9   :  { %3479 = vmatprep.subr.bf16.mxu0 %v3541_v0  ;;  %3495 = vmatprep.subr.bf16.mxu1 %v3541_v0  ;;  %v550_v31 = vld [vmem:[%s5511_s1 + $0x30] sm:$0xff]  ;;  %v40_v32 = vld [vmem:[%s5510_s0 + $0x38] sm:$0xff]  ;;  %v41_v34 = vld [vmem:[%s5510_s0 + $0x40] sm:$0xff] }
   0xa   :  { %v551_v33 = vld [vmem:[%s5511_s1 + $0x38] sm:$0xff]  ;;  %v552_v35 = vld [vmem:[%s5511_s1 + $0x40] sm:$0xff]  ;;  %v42_v36 = vld [vmem:[%s5510_s0 + $0x48] sm:$0xff] }
   0xb   :  { %v553_v37 = vld [vmem:[%s5511_s1 + $0x48] sm:$0xff]  ;;  %v43_v38 = vld [vmem:[%s5510_s0 + $0x50] sm:$0xff]  ;;  %v44_v40 = vld [vmem:[%s5510_s0 + $0x58] sm:$0xff] }
   0xc   :  { %3481 = vmatpush3.bf16.msra.mxu0 %v3480_v10  ;;  %3497 = vmatpush3.bf16.msra.mxu1 %v3480_v10  ;;  %v554_v39 = vld [vmem:[%s5511_s1 + $0x50] sm:$0xff]  ;;  %v555_v41 = vld [vmem:[%s5511_s1 + $0x58] sm:$0xff]  ;;  %v45_v42 = vld [vmem:[%s5510_s0 + $0x60] sm:$0xff] }
   0xd   :  { %3482 = vmatprep.subr.bf16.mxu0 %v3541_v0  ;;  %3498 = vmatprep.subr.bf16.mxu1 %v3541_v0  ;;  %v556_v43 = vld [vmem:[%s5511_s1 + $0x60] sm:$0xff]  ;;  %v46_v44 = vld [vmem:[%s5510_s0 + $0x68] sm:$0xff]  ;;  %v47_v46 = vld [vmem:[%s5510_s0 + $0x70] sm:$0xff] }
   0xe   :  { %v557_v45 = vld [vmem:[%s5511_s1 + $0x68] sm:$0xff]  ;;  %v558_v47 = vld [vmem:[%s5511_s1 + $0x70] sm:$0xff]  ;;  %v48_v48 = vld [vmem:[%s5510_s0 + $0x78] sm:$0xff] }
   0xf   :  { %v559_v49 = vld [vmem:[%s5511_s1 + $0x78] sm:$0xff]  ;;  %v49_v50 = vld [vmem:[%s5510_s0 + $0x80] sm:$0xff]  ;;  %v50_v52 = vld [vmem:[%s5510_s0 + $0x88] sm:$0xff] }
  0x10   :  { %3484 = vmatpush3.bf16.msra.mxu0 %v3483_v13  ;;  %3500 = vmatpush3.bf16.msra.mxu1 %v3483_v13  ;;  %v560_v51 = vld [vmem:[%s5511_s1 + $0x80] sm:$0xff]  ;;  %v561_v53 = vld [vmem:[%s5511_s1 + $0x88] sm:$0xff]  ;;  %v51_v54 = vld [vmem:[%s5510_s0 + $0x90] sm:$0xff] }
  0x11   :  { %3485 = vmatprep.subr.bf16.mxu0 %v3541_v0  ;;  %3501 = vmatprep.subr.bf16.mxu1 %v3541_v0  ;;  %v562_v55 = vld [vmem:[%s5511_s1 + $0x90] sm:$0xff]  ;;  %v52_v56 = vld [vmem:[%s5510_s0 + $0x98] sm:$0xff]  ;;  %v53_v58 = vld [vmem:[%s5510_s0 + $0xa0] sm:$0xff] }
  0x12   :  { %v563_v57 = vld [vmem:[%s5511_s1 + $0x98] sm:$0xff]  ;;  %v564_v59 = vld [vmem:[%s5511_s1 + $0xa0] sm:$0xff]  ;;  %v54_v60 = vld [vmem:[%s5510_s0 + $0xa8] sm:$0xff] }
  0x13   :  { %v565_v61 = vld [vmem:[%s5511_s1 + $0xa8] sm:$0xff]  ;;  %v55_v62 = vld [vmem:[%s5510_s0 + $0xb0] sm:$0xff]  ;;  %v567_v1 = vld [vmem:[%s5511_s1 + $0xb8] sm:$0xff] }
  0x14   :  { %3488 = vmatpush3.bf16.msk.msra.mxu0 %vm3623_vm3, %v3486_v16  ;;  %3504 = vmatpush3.bf16.msk.msra.mxu1 %vm3623_vm3, %v3486_v16  ;;  %v566_v63 = vld [vmem:[%s5511_s1 + $0xb0] sm:$0xff]  ;;  %v57_v2 = vld [vmem:[%s5510_s0 + $0xc0] sm:$0xff]  ;;  %v569_v5 = vld [vmem:[%s5511_s1 + $0xc8] sm:$0xff] }
  0x15   :  { %3505 = vmatprep.subr.bf16.mxu0 %v3541_v0  ;;  %3521 = vmatprep.subr.bf16.mxu1 %v3541_v0  ;;  %v568_v3 = vld [vmem:[%s5511_s1 + $0xc0] sm:$0xff]  ;;  %v570_v8 = vld [vmem:[%s5511_s1 + $0xd0] sm:$0xff]  ;;  %v60_v9 = vld [vmem:[%s5510_s0 + $0xd8] sm:$0xff] }
  0x16   :  { %v61_v11 = vld [vmem:[%s5510_s0 + $0xe0] sm:$0xff]  ;;  %v573_v14 = vld [vmem:[%s5511_s1 + $0xe8] sm:$0xff]  ;;  %v63_v15 = vld [vmem:[%s5510_s0 + $0xf0] sm:$0xff] }
  0x17   :  { %2826 = vmatmul.mubr.msk.f32.vlgmr.msra.gmra.mrb[0].mxu0 %vm82_vm4, %v33_v18  ;;  %2993 = vmatmul.mubr.msk.f32.vlgmr.msra.gmra.mrb[0].mxu1 %vm82_vm4, %v544_v19  ;;  %v572_v12 = vld [vmem:[%s5511_s1 + $0xe0] sm:$0xff]  ;;  %v64_v17 = vld [vmem:[%s5510_s0 + $0xf8] sm:$0xff] }
  0x18   :  { %3507 = vmatpush3.bf16.msra.mxu0 %v3474_v4  ;;  %2828 = vmatprep.mubr.msk.f32.mxu0 %vm3542_vm0, %v3543_v6  ;;  %v575_v18 = vld [vmem:[%s5511_s1 + $0xf8] sm:$0xff]  ;;  %v65_v19 = vld [vmem:[%s5510_s0 + $0x100] sm:$0xff] }
  0x19   :  { %3523 = vmatpush3.bf16.msra.mxu1 %v3474_v4  ;;  %2995 = vmatprep.mubr.msk.f32.mxu1 %vm3542_vm0, %v3543_v6  ;;  %v58_v4 = vld [vmem:[%s5510_s0 + $0xc8] sm:$0xff] }
  0x1a   :  { %3508 = vmatprep.subr.bf16.mxu0 %v3541_v0  ;;  %3524 = vmatprep.subr.bf16.mxu1 %v3541_v0 }
  0x1b   :  { %2829 = vmatmul.mubr.msk.f32.gmra.mrb[2].mxu0 %vm82_vm4, %v34_v20  ;;  %2996 = vmatmul.mubr.msk.f32.gmra.mrb[2].mxu1 %vm82_vm4, %v545_v21  ;;  %v576_v20 = vld [vmem:[%s5511_s1 + $0x100] sm:$0xff]  ;;  %v66_v21 = vld [vmem:[%s5510_s0 + $0x108] sm:$0xff] }
  0x1c   :  { %2831 = vmatprep.mubr.msk.f32.mxu0 %vm3542_vm0, %v3543_v6  ;;  %2998 = vmatprep.mubr.msk.f32.mxu1 %vm3542_vm0, %v3543_v6 }
  0x1d   :  { %3510 = vmatpush3.bf16.msra.mxu0 %v3477_v7  ;;  %3526 = vmatpush3.bf16.msra.mxu1 %v3477_v7  ;;  %v59_v7 = vld [vmem:[%s5510_s0 + $0xd0] sm:$0xff] }
  0x1e   :  { %3511 = vmatprep.subr.bf16.mxu0 %v3541_v0  ;;  %3527 = vmatprep.subr.bf16.mxu1 %v3541_v0 }
  0x1f   :  { %2832 = vmatmul.mubr.msk.f32.gmra.mrb[4].mxu0 %vm82_vm4, %v35_v22  ;;  %2999 = vmatmul.mubr.msk.f32.gmra.mrb[4].mxu1 %vm82_vm4, %v546_v23  ;;  %v577_v22 = vld [vmem:[%s5511_s1 + $0x108] sm:$0xff]  ;;  %v67_v23 = vld [vmem:[%s5510_s0 + $0x110] sm:$0xff] }
  0x20   :  { %2834 = vmatprep.mubr.msk.f32.mxu0 %vm3542_vm0, %v3543_v6  ;;  %3001 = vmatprep.mubr.msk.f32.mxu1 %vm3542_vm0, %v3543_v6 }
  0x21   :  { %3513 = vmatpush3.bf16.msra.mxu0 %v3480_v10  ;;  %3529 = vmatpush3.bf16.msra.mxu1 %v3480_v10  ;;  %v571_v10 = vld [vmem:[%s5511_s1 + $0xd8] sm:$0xff] }
  0x22   :  { %3514 = vmatprep.subr.bf16.mxu0 %v3541_v0  ;;  %3530 = vmatprep.subr.bf16.mxu1 %v3541_v0 }
  0x23   :  { %2835 = vmatmul.mubr.msk.f32.gmra.mrb[6].mxu0 %vm82_vm4, %v36_v24  ;;  %3002 = vmatmul.mubr.msk.f32.gmra.mrb[6].mxu1 %vm82_vm4, %v547_v25  ;;  %v578_v24 = vld [vmem:[%s5511_s1 + $0x110] sm:$0xff]  ;;  %v68_v25 = vld [vmem:[%s5510_s0 + $0x118] sm:$0xff] }
  0x24   :  { %2837 = vmatprep.mubr.msk.f32.mxu0 %vm3542_vm0, %v3543_v6  ;;  %3004 = vmatprep.mubr.msk.f32.mxu1 %vm3542_vm0, %v3543_v6 }
  0x25   :  { %3516 = vmatpush3.bf16.msra.mxu0 %v3483_v13  ;;  %3532 = vmatpush3.bf16.msra.mxu1 %v3483_v13  ;;  %v62_v13 = vld [vmem:[%s5510_s0 + $0xe8] sm:$0xff] }
  0x26   :  { %3517 = vmatprep.subr.bf16.mxu0 %v3541_v0  ;;  %3533 = vmatprep.subr.bf16.mxu1 %v3541_v0  ;;  %v56_v0 = vld [vmem:[%s5510_s0 + $0xb8] sm:$0xff] }
  0x27   :  { %2838 = vmatmul.mubr.msk.f32.gmra.mrb[8].mxu0 %vm82_vm4, %v37_v26  ;;  %3005 = vmatmul.mubr.msk.f32.gmra.mrb[8].mxu1 %vm82_vm4, %v548_v27  ;;  %v579_v26 = vld [vmem:[%s5511_s1 + $0x118] sm:$0xff]  ;;  %v69_v27 = vld [vmem:[%s5510_s0 + $0x120] sm:$0xff] }
  0x28   :  { %2840 = vmatprep.mubr.msk.f32.mxu0 %vm3542_vm0, %v3543_v6  ;;  %3007 = vmatprep.mubr.msk.f32.mxu1 %vm3542_vm0, %v3543_v6 }
  0x29   :  { %3520 = vmatpush3.bf16.msk.msra.mxu0 %vm3623_vm3, %v3486_v16  ;;  %3536 = vmatpush3.bf16.msk.msra.mxu1 %vm3623_vm3, %v3486_v16  ;;  %v574_v16 = vld [vmem:[%s5511_s1 + $0xf0] sm:$0xff] }
  0x2b   :  { %2841 = vmatmul.mubr.msk.f32.gmra.mrb[10].mxu0 %vm82_vm4, %v38_v28  ;;  %3008 = vmatmul.mubr.msk.f32.gmra.mrb[10].mxu1 %vm82_vm4, %v549_v29  ;;  %v580_v28 = vld [vmem:[%s5511_s1 + $0x120] sm:$0xff]  ;;  %v70_v29 = vld [vmem:[%s5510_s0 + $0x128] sm:$0xff] }
  0x2c   :  { %2843 = vmatprep.mubr.msk.f32.mxu0 %vm3542_vm0, %v3543_v6  ;;  %3010 = vmatprep.mubr.msk.f32.mxu1 %vm3542_vm0, %v3543_v6 }
  0x2f   :  { %2844 = vmatmul.mubr.msk.f32.gmra.mrb[12].mxu0 %vm82_vm4, %v39_v30  ;;  %3011 = vmatmul.mubr.msk.f32.gmra.mrb[12].mxu1 %vm82_vm4, %v550_v31  ;;  %v581_v30 = vld [vmem:[%s5511_s1 + $0x128] sm:$0xff]  ;;  %v71_v31 = vld [vmem:[%s5510_s0 + $0x130] sm:$0xff] }
  0x30   :  { %2846 = vmatprep.mubr.msk.f32.mxu0 %vm3542_vm0, %v3543_v6  ;;  %3013 = vmatprep.mubr.msk.f32.mxu1 %vm3542_vm0, %v3543_v6 }
  0x33   :  { %2847 = vmatmul.mubr.msk.f32.gmra.mrb[14].mxu0 %vm82_vm4, %v40_v32  ;;  %3014 = vmatmul.mubr.msk.f32.gmra.mrb[14].mxu1 %vm82_vm4, %v551_v33  ;;  %v582_v32 = vld [vmem:[%s5511_s1 + $0x130] sm:$0xff]  ;;  %v72_v33 = vld [vmem:[%s5510_s0 + $0x138] sm:$0xff] }
  0x34   :  { %2849 = vmatprep.mubr.msk.f32.mxu0 %vm3542_vm0, %v3543_v6  ;;  %3016 = vmatprep.mubr.msk.f32.mxu1 %vm3542_vm0, %v3543_v6 }
  0x37   :  { %2850 = vmatmul.mubr.msk.f32.gmra.mrb[16].mxu0 %vm82_vm4, %v41_v34  ;;  %3017 = vmatmul.mubr.msk.f32.gmra.mrb[16].mxu1 %vm82_vm4, %v552_v35  ;;  %v583_v34 = vld [vmem:[%s5511_s1 + $0x138] sm:$0xff]  ;;  %v73_v35 = vld [vmem:[%s5510_s0 + $0x140] sm:$0xff] }
  0x38   :  { %2852 = vmatprep.mubr.msk.f32.mxu0 %vm3542_vm0, %v3543_v6  ;;  %3019 = vmatprep.mubr.msk.f32.mxu1 %vm3542_vm0, %v3543_v6 }
  0x3b   :  { %2853 = vmatmul.mubr.msk.f32.gmra.mrb[18].mxu0 %vm82_vm4, %v42_v36  ;;  %3020 = vmatmul.mubr.msk.f32.gmra.mrb[18].mxu1 %vm82_vm4, %v553_v37  ;;  %v584_v36 = vld [vmem:[%s5511_s1 + $0x140] sm:$0xff]  ;;  %v74_v37 = vld [vmem:[%s5510_s0 + $0x148] sm:$0xff] }
  0x3c   :  { %2855 = vmatprep.mubr.msk.f32.mxu0 %vm3542_vm0, %v3543_v6  ;;  %3022 = vmatprep.mubr.msk.f32.mxu1 %vm3542_vm0, %v3543_v6 }
  0x3f   :  { %2856 = vmatmul.mubr.msk.f32.gmra.mrb[20].mxu0 %vm82_vm4, %v43_v38  ;;  %3023 = vmatmul.mubr.msk.f32.gmra.mrb[20].mxu1 %vm82_vm4, %v554_v39  ;;  %v585_v38 = vld [vmem:[%s5511_s1 + $0x148] sm:$0xff]  ;;  %v75_v39 = vld [vmem:[%s5510_s0 + $0x150] sm:$0xff] }
  0x40   :  { %2858 = vmatprep.mubr.msk.f32.mxu0 %vm3542_vm0, %v3543_v6  ;;  %3025 = vmatprep.mubr.msk.f32.mxu1 %vm3542_vm0, %v3543_v6 }
  0x43   :  { %2859 = vmatmul.mubr.msk.f32.gmra.mrb[22].mxu0 %vm82_vm4, %v44_v40  ;;  %3026 = vmatmul.mubr.msk.f32.gmra.mrb[22].mxu1 %vm82_vm4, %v555_v41  ;;  %v586_v40 = vld [vmem:[%s5511_s1 + $0x150] sm:$0xff]  ;;  %v76_v41 = vld [vmem:[%s5510_s0 + $0x158] sm:$0xff] }
  0x44   :  { %2861 = vmatprep.mubr.msk.f32.mxu0 %vm3542_vm0, %v3543_v6  ;;  %3028 = vmatprep.mubr.msk.f32.mxu1 %vm3542_vm0, %v3543_v6 }
  0x47   :  { %2862 = vmatmul.mubr.msk.f32.gmra.mrb[24].mxu0 %vm82_vm4, %v45_v42  ;;  %3029 = vmatmul.mubr.msk.f32.gmra.mrb[24].mxu1 %vm82_vm4, %v556_v43  ;;  %v587_v42 = vld [vmem:[%s5511_s1 + $0x158] sm:$0xff]  ;;  %v77_v43 = vld [vmem:[%s5510_s0 + $0x160] sm:$0xff] }
  0x48   :  { %2864 = vmatprep.mubr.msk.f32.mxu0 %vm3542_vm0, %v3543_v6  ;;  %3031 = vmatprep.mubr.msk.f32.mxu1 %vm3542_vm0, %v3543_v6 }
  0x4b   :  { %2865 = vmatmul.mubr.msk.f32.gmra.mrb[26].mxu0 %vm82_vm4, %v46_v44  ;;  %3032 = vmatmul.mubr.msk.f32.gmra.mrb[26].mxu1 %vm82_vm4, %v557_v45  ;;  %v588_v44 = vld [vmem:[%s5511_s1 + $0x160] sm:$0xff]  ;;  %v78_v45 = vld [vmem:[%s5510_s0 + $0x168] sm:$0xff] }
  0x4c   :  { %2867 = vmatprep.mubr.msk.f32.mxu0 %vm3542_vm0, %v3543_v6  ;;  %3034 = vmatprep.mubr.msk.f32.mxu1 %vm3542_vm0, %v3543_v6 }
  0x4f   :  { %2868 = vmatmul.mubr.msk.f32.gmra.mrb[28].mxu0 %vm82_vm4, %v47_v46  ;;  %3035 = vmatmul.mubr.msk.f32.gmra.mrb[28].mxu1 %vm82_vm4, %v558_v47  ;;  %v589_v46 = vld [vmem:[%s5511_s1 + $0x168] sm:$0xff]  ;;  %v79_v47 = vld [vmem:[%s5510_s0 + $0x170] sm:$0xff] }
  0x50   :  { %2870 = vmatprep.mubr.msk.f32.mxu0 %vm3542_vm0, %v3543_v6  ;;  %3037 = vmatprep.mubr.msk.f32.mxu1 %vm3542_vm0, %v3543_v6 }
  0x53   :  { %2871 = vmatmul.mubr.msk.f32.gmra.mrb[30].mxu0 %vm82_vm4, %v48_v48  ;;  %3038 = vmatmul.mubr.msk.f32.gmra.mrb[30].mxu1 %vm82_vm4, %v559_v49  ;;  %v590_v48 = vld [vmem:[%s5511_s1 + $0x170] sm:$0xff]  ;;  %v80_v49 = vld [vmem:[%s5510_s0 + $0x178] sm:$0xff] }
  0x54   :  { %2873 = vmatprep.mubr.msk.f32.mxu0 %vm3542_vm0, %v3543_v6  ;;  %3040 = vmatprep.mubr.msk.f32.mxu1 %vm3542_vm0, %v3543_v6 }
  0x57   :  { %2874 = vmatmul.mubr.msk.f32.gmra.mrb[32].mxu0 %vm82_vm4, %v49_v50  ;;  %3041 = vmatmul.mubr.msk.f32.gmra.mrb[32].mxu1 %vm82_vm4, %v560_v51  ;;  %v591_v50 = vld [vmem:[%s5511_s1 + $0x178] sm:$0xff]  ;;  %v81_v51 = vld [vmem:[%s5510_s0 + $0x180] sm:$0xff] }
  0x58   :  { %2876 = vmatprep.mubr.msk.f32.mxu0 %vm3542_vm0, %v3543_v6  ;;  %3043 = vmatprep.mubr.msk.f32.mxu1 %vm3542_vm0, %v3543_v6 }
  0x5b   :  { %2877 = vmatmul.mubr.msk.f32.gmra.mrb[34].mxu0 %vm82_vm4, %v50_v52  ;;  %3044 = vmatmul.mubr.msk.f32.gmra.mrb[34].mxu1 %vm82_vm4, %v561_v53  ;;  %v592_v52 = vld [vmem:[%s5511_s1 + $0x180] sm:$0xff] }
  0x5c   :  { %2879 = vmatprep.mubr.msk.f32.mxu0 %vm3542_vm0, %v3543_v6  ;;  %3046 = vmatprep.mubr.msk.f32.mxu1 %vm3542_vm0, %v3543_v6  ;;  %v1099_v53 = vld [vmem:[%s5512_s2] sm:$0xff] }
  0x5f   :  { %2880 = vmatmul.mubr.msk.f32.gmra.mrb[36].mxu0 %vm82_vm4, %v51_v54  ;;  %3047 = vmatmul.mubr.msk.f32.gmra.mrb[36].mxu1 %vm82_vm4, %v562_v55  ;;  %v1654_v54 = vld [vmem:[%s5513_s3] sm:$0xff]  ;;  %v1100_v55 = vld [vmem:[%s5512_s2 + $0x8] sm:$0xff] }
  0x60   :  { %2882 = vmatprep.mubr.msk.f32.mxu0 %vm3542_vm0, %v3543_v6  ;;  %3049 = vmatprep.mubr.msk.f32.mxu1 %vm3542_vm0, %v3543_v6 }
  0x63   :  { %2883 = vmatmul.mubr.msk.f32.gmra.mrb[38].mxu0 %vm82_vm4, %v52_v56  ;;  %3050 = vmatmul.mubr.msk.f32.gmra.mrb[38].mxu1 %vm82_vm4, %v563_v57  ;;  %v1655_v56 = vld [vmem:[%s5513_s3 + $0x8] sm:$0xff]  ;;  %v1101_v57 = vld [vmem:[%s5512_s2 + $0x10] sm:$0xff] }
  0x64   :  { %2885 = vmatprep.mubr.msk.f32.mxu0 %vm3542_vm0, %v3543_v6  ;;  %3052 = vmatprep.mubr.msk.f32.mxu1 %vm3542_vm0, %v3543_v6 }
  0x67   :  { %2886 = vmatmul.mubr.msk.f32.gmra.mrb[40].mxu0 %vm82_vm4, %v53_v58  ;;  %3053 = vmatmul.mubr.msk.f32.gmra.mrb[40].mxu1 %vm82_vm4, %v564_v59  ;;  %v1656_v58 = vld [vmem:[%s5513_s3 + $0x10] sm:$0xff]  ;;  %v1102_v59 = vld [vmem:[%s5512_s2 + $0x18] sm:$0xff] }
  0x68   :  { %2888 = vmatprep.mubr.msk.f32.mxu0 %vm3542_vm0, %v3543_v6  ;;  %3055 = vmatprep.mubr.msk.f32.mxu1 %vm3542_vm0, %v3543_v6 }
  0x6b   :  { %2889 = vmatmul.mubr.msk.f32.gmra.mrb[42].mxu0 %vm82_vm4, %v54_v60  ;;  %3056 = vmatmul.mubr.msk.f32.gmra.mrb[42].mxu1 %vm82_vm4, %v565_v61  ;;  %v1657_v60 = vld [vmem:[%s5513_s3 + $0x18] sm:$0xff]  ;;  %v1103_v61 = vld [vmem:[%s5512_s2 + $0x20] sm:$0xff] }
  0x6c   :  { %2891 = vmatprep.mubr.msk.f32.mxu0 %vm3542_vm0, %v3543_v6  ;;  %3058 = vmatprep.mubr.msk.f32.mxu1 %vm3542_vm0, %v3543_v6 }
  0x6f   :  { %2892 = vmatmul.mubr.msk.f32.gmra.mrb[44].mxu0 %vm82_vm4, %v55_v62  ;;  %3059 = vmatmul.mubr.msk.f32.gmra.mrb[44].mxu1 %vm82_vm4, %v566_v63  ;;  %v1658_v62 = vld [vmem:[%s5513_s3 + $0x20] sm:$0xff] }
  0x70   :  { %2894 = vmatprep.mubr.msk.f32.mxu0 %vm3542_vm0, %v3543_v6  ;;  %3061 = vmatprep.mubr.msk.f32.mxu1 %vm3542_vm0, %v3543_v6 }
  0x73   :  { %2895 = vmatmul.mubr.msk.f32.gmra.mrb[46].mxu0 %vm82_vm4, %v56_v0  ;;  %3062 = vmatmul.mubr.msk.f32.gmra.mrb[46].mxu1 %vm82_vm4, %v567_v1 }
  0x74   :  { %2897 = vmatprep.mubr.msk.f32.mxu0 %vm3542_vm0, %v3543_v6  ;;  %3064 = vmatprep.mubr.msk.f32.mxu1 %vm3542_vm0, %v3543_v6 }
  0x77   :  { %2898 = vmatmul.mubr.msk.f32.gmra.mrb[48].mxu0 %vm82_vm4, %v57_v2  ;;  %3065 = vmatmul.mubr.msk.f32.gmra.mrb[48].mxu1 %vm82_vm4, %v568_v3 }
  0x78   :  { %2900 = vmatprep.mubr.msk.f32.mxu0 %vm3542_vm0, %v3543_v6  ;;  %3067 = vmatprep.mubr.msk.f32.mxu1 %vm3542_vm0, %v3543_v6 }
  0x7b   :  { %2901 = vmatmul.mubr.msk.f32.gmra.mrb[50].mxu0 %vm82_vm4, %v58_v4  ;;  %3068 = vmatmul.mubr.msk.f32.gmra.mrb[50].mxu1 %vm82_vm4, %v569_v5  ;;  %v1104_v4 = vld [vmem:[%s5512_s2 + $0x28] sm:$0xff] }
  0x7c   :  { %2903 = vmatprep.mubr.msk.f32.mxu0 %vm3542_vm0, %v3543_v6  ;;  %3070 = vmatprep.mubr.msk.f32.mxu1 %vm3542_vm0, %v3543_v6  ;;  %v1659_v5 = vld [vmem:[%s5513_s3 + $0x28] sm:$0xff] }
  0x7f   :  { %2904 = vmatmul.mubr.msk.f32.gmra.mrb[52].mxu0 %vm82_vm4, %v59_v7  ;;  %3071 = vmatmul.mubr.msk.f32.gmra.mrb[52].mxu1 %vm82_vm4, %v570_v8 }
  0x80   :  { %2906 = vmatprep.mubr.msk.f32.mxu0 %vm3542_vm0, %v3543_v6  ;;  %3073 = vmatprep.mubr.msk.f32.mxu1 %vm3542_vm0, %v3543_v6 }
  0x83   :  { %2907 = vmatmul.mubr.msk.f32.gmra.mrb[54].mxu0 %vm82_vm4, %v60_v9  ;;  %3074 = vmatmul.mubr.msk.f32.gmra.mrb[54].mxu1 %vm82_vm4, %v571_v10  ;;  %v1131_v10 = vld [vmem:[%s5512_s2 + $0x100] sm:$0xff] }
  0x84   :  { %2909 = vmatprep.mubr.msk.f32.mxu0 %vm3542_vm0, %v3543_v6  ;;  %3076 = vmatprep.mubr.msk.f32.mxu1 %vm3542_vm0, %v3543_v6 }
  0x87   :  { %2910 = vmatmul.mubr.msk.f32.gmra.mrb[56].mxu0 %vm82_vm4, %v61_v11  ;;  %3077 = vmatmul.mubr.msk.f32.gmra.mrb[56].mxu1 %vm82_vm4, %v572_v12  ;;  %v1105_v12 = vld [vmem:[%s5512_s2 + $0x30] sm:$0xff] }
  0x88   :  { %2912 = vmatprep.mubr.msk.f32.mxu0 %vm3542_vm0, %v3543_v6  ;;  %3079 = vmatprep.mubr.msk.f32.mxu1 %vm3542_vm0, %v3543_v6 }
  0x8b   :  { %2913 = vmatmul.mubr.msk.f32.gmra.mrb[58].mxu0 %vm82_vm4, %v62_v13  ;;  %3080 = vmatmul.mubr.msk.f32.gmra.mrb[58].mxu1 %vm82_vm4, %v573_v14  ;;  %v1660_v13 = vld [vmem:[%s5513_s3 + $0x30] sm:$0xff] }
  0x8c   :  { %2915 = vmatprep.mubr.msk.f32.mxu0 %vm3542_vm0, %v3543_v6  ;;  %3082 = vmatprep.mubr.msk.f32.mxu1 %vm3542_vm0, %v3543_v6 }
  0x8f   :  { %2916 = vmatmul.mubr.msk.f32.gmra.mrb[60].mxu0 %vm82_vm4, %v63_v15  ;;  %3083 = vmatmul.mubr.msk.f32.gmra.mrb[60].mxu1 %vm82_vm4, %v574_v16 }
  0x90   :  { %2918 = vmatprep.mubr.msk.f32.mxu0 %vm3542_vm0, %v3543_v6  ;;  %3085 = vmatprep.mubr.msk.f32.mxu1 %vm3542_vm0, %v3543_v6 }
  0x93   :  { %2919 = vmatmul.mubr.msk.f32.gmra.mrb[62].mxu0 %vm82_vm4, %v64_v17  ;;  %3086 = vmatmul.mubr.msk.f32.gmra.mrb[62].mxu1 %vm82_vm4, %v575_v18 }
  0x94   :  { %2921 = vmatprep.mubr.msk.f32.mxu0 %vm3542_vm0, %v3543_v6  ;;  %3088 = vmatprep.mubr.msk.f32.mxu1 %vm3542_vm0, %v3543_v6 }
  0x97   :  { %2922 = vmatmul.mubr.msk.f32.gmra.mrb[64].mxu0 %vm82_vm4, %v65_v19  ;;  %3089 = vmatmul.mubr.msk.f32.gmra.mrb[64].mxu1 %vm82_vm4, %v576_v20  ;;  %v1106_v19 = vld [vmem:[%s5512_s2 + $0x38] sm:$0xff] }
  0x98   :  { %2924 = vmatprep.mubr.msk.f32.mxu0 %vm3542_vm0, %v3543_v6  ;;  %3091 = vmatprep.mubr.msk.f32.mxu1 %vm3542_vm0, %v3543_v6  ;;  %v1661_v20 = vld [vmem:[%s5513_s3 + $0x38] sm:$0xff] }
  0x9b   :  { %2925 = vmatmul.mubr.msk.f32.gmra.mrb[66].mxu0 %vm82_vm4, %v66_v21  ;;  %3092 = vmatmul.mubr.msk.f32.gmra.mrb[66].mxu1 %vm82_vm4, %v577_v22 }
  0x9c   :  { %2927 = vmatprep.mubr.msk.f32.mxu0 %vm3542_vm0, %v3543_v6  ;;  %3094 = vmatprep.mubr.msk.f32.mxu1 %vm3542_vm0, %v3543_v6 }
  0x9f   :  { %2928 = vmatmul.mubr.msk.f32.gmra.mrb[68].mxu0 %vm82_vm4, %v67_v23  ;;  %3095 = vmatmul.mubr.msk.f32.gmra.mrb[68].mxu1 %vm82_vm4, %v578_v24  ;;  %v1130_v24 = vld [vmem:[%s5512_s2 + $0xf8] sm:$0xff] }
  0xa0   :  { %2930 = vmatprep.mubr.msk.f32.mxu0 %vm3542_vm0, %v3543_v6  ;;  %3097 = vmatprep.mubr.msk.f32.mxu1 %vm3542_vm0, %v3543_v6 }
  0xa3   :  { %2931 = vmatmul.mubr.msk.f32.gmra.mrb[70].mxu0 %vm82_vm4, %v68_v25  ;;  %3098 = vmatmul.mubr.msk.f32.gmra.mrb[70].mxu1 %vm82_vm4, %v579_v26  ;;  %v1107_v26 = vld [vmem:[%s5512_s2 + $0x40] sm:$0xff] }
  0xa4   :  { %2933 = vmatprep.mubr.msk.f32.mxu0 %vm3542_vm0, %v3543_v6  ;;  %3100 = vmatprep.mubr.msk.f32.mxu1 %vm3542_vm0, %v3543_v6 }
  0xa7   :  { %2934 = vmatmul.mubr.msk.f32.gmra.mrb[72].mxu0 %vm82_vm4, %v69_v27  ;;  %3101 = vmatmul.mubr.msk.f32.gmra.mrb[72].mxu1 %vm82_vm4, %v580_v28  ;;  %v1662_v27 = vld [vmem:[%s5513_s3 + $0x40] sm:$0xff] }
  0xa8   :  { %2936 = vmatprep.mubr.msk.f32.mxu0 %vm3542_vm0, %v3543_v6  ;;  %3103 = vmatprep.mubr.msk.f32.mxu1 %vm3542_vm0, %v3543_v6 }
  0xab   :  { %2937 = vmatmul.mubr.msk.f32.gmra.mrb[74].mxu0 %vm82_vm4, %v70_v29  ;;  %3104 = vmatmul.mubr.msk.f32.gmra.mrb[74].mxu1 %vm82_vm4, %v581_v30 }
  0xac   :  { %2939 = vmatprep.mubr.msk.f32.mxu0 %vm3542_vm0, %v3543_v6  ;;  %3106 = vmatprep.mubr.msk.f32.mxu1 %vm3542_vm0, %v3543_v6 }
  0xaf   :  { %2940 = vmatmul.mubr.msk.f32.gmra.mrb[76].mxu0 %vm82_vm4, %v71_v31  ;;  %3107 = vmatmul.mubr.msk.f32.gmra.mrb[76].mxu1 %vm82_vm4, %v582_v32 }
  0xb0   :  { %2942 = vmatprep.mubr.msk.f32.mxu0 %vm3542_vm0, %v3543_v6  ;;  %3109 = vmatprep.mubr.msk.f32.mxu1 %vm3542_vm0, %v3543_v6 }
  0xb3   :  { %2943 = vmatmul.mubr.msk.f32.gmra.mrb[78].mxu0 %vm82_vm4, %v72_v33  ;;  %3110 = vmatmul.mubr.msk.f32.gmra.mrb[78].mxu1 %vm82_vm4, %v583_v34  ;;  %v1108_v33 = vld [vmem:[%s5512_s2 + $0x48] sm:$0xff] }
  0xb4   :  { %2945 = vmatprep.mubr.msk.f32.mxu0 %vm3542_vm0, %v3543_v6  ;;  %3112 = vmatprep.mubr.msk.f32.mxu1 %vm3542_vm0, %v3543_v6  ;;  %v1663_v34 = vld [vmem:[%s5513_s3 + $0x48] sm:$0xff] }
  0xb7   :  { %2946 = vmatmul.mubr.msk.f32.gmra.mrb[80].mxu0 %vm82_vm4, %v73_v35  ;;  %3113 = vmatmul.mubr.msk.f32.gmra.mrb[80].mxu1 %vm82_vm4, %v584_v36 }
  0xb8   :  { %2948 = vmatprep.mubr.msk.f32.mxu0 %vm3542_vm0, %v3543_v6  ;;  %3115 = vmatprep.mubr.msk.f32.mxu1 %vm3542_vm0, %v3543_v6 }
  0xbb   :  { %2949 = vmatmul.mubr.msk.f32.gmra.mrb[82].mxu0 %vm82_vm4, %v74_v37  ;;  %3116 = vmatmul.mubr.msk.f32.gmra.mrb[82].mxu1 %vm82_vm4, %v585_v38  ;;  %v1129_v38 = vld [vmem:[%s5512_s2 + $0xf0] sm:$0xff] }
  0xbc   :  { %2951 = vmatprep.mubr.msk.f32.mxu0 %vm3542_vm0, %v3543_v6  ;;  %3118 = vmatprep.mubr.msk.f32.mxu1 %vm3542_vm0, %v3543_v6 }
  0xbf   :  { %2952 = vmatmul.mubr.msk.f32.gmra.mrb[84].mxu0 %vm82_vm4, %v75_v39  ;;  %3119 = vmatmul.mubr.msk.f32.gmra.mrb[84].mxu1 %vm82_vm4, %v586_v40  ;;  %v1109_v40 = vld [vmem:[%s5512_s2 + $0x50] sm:$0xff] }
  0xc0   :  { %2954 = vmatprep.mubr.msk.f32.mxu0 %vm3542_vm0, %v3543_v6  ;;  %3121 = vmatprep.mubr.msk.f32.mxu1 %vm3542_vm0, %v3543_v6 }
  0xc3   :  { %2955 = vmatmul.mubr.msk.f32.gmra.mrb[86].mxu0 %vm82_vm4, %v76_v41  ;;  %3122 = vmatmul.mubr.msk.f32.gmra.mrb[86].mxu1 %vm82_vm4, %v587_v42  ;;  %v1664_v41 = vld [vmem:[%s5513_s3 + $0x50] sm:$0xff] }
  0xc4   :  { %2957 = vmatprep.mubr.msk.f32.mxu0 %vm3542_vm0, %v3543_v6  ;;  %3124 = vmatprep.mubr.msk.f32.mxu1 %vm3542_vm0, %v3543_v6 }
  0xc7   :  { %2958 = vmatmul.mubr.msk.f32.gmra.mrb[88].mxu0 %vm82_vm4, %v77_v43  ;;  %3125 = vmatmul.mubr.msk.f32.gmra.mrb[88].mxu1 %vm82_vm4, %v588_v44 }
  0xc8   :  { %2960 = vmatprep.mubr.msk.f32.mxu0 %vm3542_vm0, %v3543_v6  ;;  %3127 = vmatprep.mubr.msk.f32.mxu1 %vm3542_vm0, %v3543_v6 }
  0xcb   :  { %2961 = vmatmul.mubr.msk.f32.gmra.mrb[90].mxu0 %vm82_vm4, %v78_v45  ;;  %3128 = vmatmul.mubr.msk.f32.gmra.mrb[90].mxu1 %vm82_vm4, %v589_v46 }
  0xcc   :  { %2963 = vmatprep.mubr.msk.f32.mxu0 %vm3542_vm0, %v3543_v6  ;;  %3130 = vmatprep.mubr.msk.f32.mxu1 %vm3542_vm0, %v3543_v6 }
  0xcf   :  { %2964 = vmatmul.mubr.msk.f32.gmra.mrb[92].mxu0 %vm82_vm4, %v79_v47  ;;  %3131 = vmatmul.mubr.msk.f32.gmra.mrb[92].mxu1 %vm82_vm4, %v590_v48  ;;  %v1110_v47 = vld [vmem:[%s5512_s2 + $0x58] sm:$0xff] }
  0xd0   :  { %2966 = vmatprep.mubr.msk.f32.mxu0 %vm3542_vm0, %v3543_v6  ;;  %3133 = vmatprep.mubr.msk.f32.mxu1 %vm3542_vm0, %v3543_v6  ;;  %v1665_v48 = vld [vmem:[%s5513_s3 + $0x58] sm:$0xff] }
  0xd3   :  { %2967 = vmatmul.mubr.msk.f32.gmra.mrb[94].mxu0 %vm82_vm4, %v80_v49  ;;  %3134 = vmatmul.mubr.msk.f32.gmra.mrb[94].mxu1 %vm82_vm4, %v591_v50 }
  0xd4   :  { %2969 = vmatprep.mubr.msk.f32.mxu0 %vm3542_vm0, %v3543_v6  ;;  %3136 = vmatprep.mubr.msk.f32.mxu1 %vm3542_vm0, %v3543_v6 }
  0xd7   :  { %2970 = vmatmul.mubr.msk.f32.gmra.mrb[96].mxu0 %vm82_vm4, %v81_v51  ;;  %3137 = vmatmul.mubr.msk.f32.gmra.mrb[96].mxu1 %vm82_vm4, %v592_v52  ;;  %v1128_v52 = vld [vmem:[%s5512_s2 + $0xe8] sm:$0xff] }
  0xd8   :  { %3159 = vmatprep.mubr.msk.f32.mxu0 %vm3542_vm0, %v3543_v6  ;;  %3326 = vmatprep.mubr.msk.f32.mxu1 %vm3542_vm0, %v3543_v6 }
  0xdb   :  { %3160 = vmatmul.mubr.msk.f32.vlgmr.msra.gmra.mrb[98].mxu0 %vm82_vm4, %v1099_v53  ;;  %3327 = vmatmul.mubr.msk.f32.vlgmr.msra.gmra.mrb[98].mxu1 %vm82_vm4, %v1654_v54  ;;  %v1111_v54 = vld [vmem:[%s5512_s2 + $0x60] sm:$0xff] }
  0xdc   :  { %3162 = vmatprep.mubr.msk.f32.mxu0 %vm3542_vm0, %v3543_v6  ;;  %3329 = vmatprep.mubr.msk.f32.mxu1 %vm3542_vm0, %v3543_v6 }
  0xdf   :  { %3163 = vmatmul.mubr.msk.f32.gmra.mrb[100].mxu0 %vm82_vm4, %v1100_v55  ;;  %3330 = vmatmul.mubr.msk.f32.gmra.mrb[100].mxu1 %vm82_vm4, %v1655_v56  ;;  %v1666_v55 = vld [vmem:[%s5513_s3 + $0x60] sm:$0xff] }
  0xe0   :  { %3165 = vmatprep.mubr.msk.f32.mxu0 %vm3542_vm0, %v3543_v6  ;;  %3332 = vmatprep.mubr.msk.f32.mxu1 %vm3542_vm0, %v3543_v6 }
  0xe3   :  { %3166 = vmatmul.mubr.msk.f32.gmra.mrb[102].mxu0 %vm82_vm4, %v1101_v57  ;;  %3333 = vmatmul.mubr.msk.f32.gmra.mrb[102].mxu1 %vm82_vm4, %v1656_v58 }
  0xe4   :  { %3168 = vmatprep.mubr.msk.f32.mxu0 %vm3542_vm0, %v3543_v6  ;;  %3335 = vmatprep.mubr.msk.f32.mxu1 %vm3542_vm0, %v3543_v6 }
  0xe7   :  { %3169 = vmatmul.mubr.msk.f32.gmra.mrb[104].mxu0 %vm82_vm4, %v1102_v59  ;;  %3336 = vmatmul.mubr.msk.f32.gmra.mrb[104].mxu1 %vm82_vm4, %v1657_v60 }
  0xe8   :  { %3171 = vmatprep.mubr.msk.f32.mxu0 %vm3542_vm0, %v3543_v6  ;;  %3338 = vmatprep.mubr.msk.f32.mxu1 %vm3542_vm0, %v3543_v6 }
  0xea   :  { %v4288_v63 = vpop.f32.mrb[0].mxu0  ;;  %v4290_v0 = vpop.f32.mrb[0].mxu1 }
  0xeb   :  { %v2827_v1 = vpop.f32.mrb[1].mxu0  ;;  %3172 = vmatmul.mubr.msk.f32.gmra.mrb[106].mxu0 %vm82_vm4, %v1103_v61  ;;  %v2994_v3 = vpop.f32.mrb[1].mxu1  ;;  %3339 = vmatmul.mubr.msk.f32.gmra.mrb[106].mxu1 %vm82_vm4, %v1658_v62  ;;  %v1112_v61 = vld [vmem:[%s5512_s2 + $0x68] sm:$0xff] }
  0xec   :  { %3174 = vmatprep.mubr.msk.f32.mxu0 %vm3542_vm0, %v3543_v6  ;;  %3341 = vmatprep.mubr.msk.f32.mxu1 %vm3542_vm0, %v3543_v6  ;;  %v1667_v62 = vld [vmem:[%s5513_s3 + $0x68] sm:$0xff] }
  0xee   :  { %v4306_v7 = vpop.f32.mrb[2].mxu0  ;;  %v4308_v8 = vpop.f32.mrb[2].mxu1 }
  0xef   :  { %v2830_v9 = vpop.f32.mrb[3].mxu0  ;;  %3175 = vmatmul.mubr.msk.f32.gmra.mrb[108].mxu0 %vm82_vm4, %v1104_v4  ;;  %v2997_v11 = vpop.f32.mrb[3].mxu1  ;;  %3342 = vmatmul.mubr.msk.f32.gmra.mrb[108].mxu1 %vm82_vm4, %v1659_v5  ;;  %v1127_v5 = vld [vmem:[%s5512_s2 + $0xe0] sm:$0xff] }
  0xf0   :  { %3177 = vmatprep.mubr.msk.f32.mxu0 %vm3542_vm0, %v3543_v6  ;;  %3344 = vmatprep.mubr.msk.f32.mxu1 %vm3542_vm0, %v3543_v6  ;;  %v1113_v11 = vld [vmem:[%s5512_s2 + $0x70] sm:$0xff] }
  0xf2   :  { %v4324_v14 = vpop.f32.mrb[4].mxu0  ;;  %v4326_v15 = vpop.f32.mrb[4].mxu1 }
  0xf3   :  { %v2833_v16 = vpop.f32.mrb[5].mxu0  ;;  %3178 = vmatmul.mubr.msk.f32.gmra.mrb[110].mxu0 %vm82_vm4, %v1105_v12  ;;  %v3000_v18 = vpop.f32.mrb[5].mxu1  ;;  %3345 = vmatmul.mubr.msk.f32.gmra.mrb[110].mxu1 %vm82_vm4, %v1660_v13  ;;  %v1668_v12 = vld [vmem:[%s5513_s3 + $0x70] sm:$0xff] }
  0xf4   :  { %3180 = vmatprep.mubr.msk.f32.mxu0 %vm3542_vm0, %v3543_v6  ;;  %3347 = vmatprep.mubr.msk.f32.mxu1 %vm3542_vm0, %v3543_v6 }
  0xf6   :  { %v4342_v21 = vpop.f32.mrb[6].mxu0  ;;  %v4344_v22 = vpop.f32.mrb[6].mxu1 }
  0xf7   :  { %v2836_v23 = vpop.f32.mrb[7].mxu0  ;;  %3181 = vmatmul.mubr.msk.f32.gmra.mrb[112].mxu0 %vm82_vm4, %v1106_v19  ;;  %v3003_v25 = vpop.f32.mrb[7].mxu1  ;;  %3348 = vmatmul.mubr.msk.f32.gmra.mrb[112].mxu1 %vm82_vm4, %v1661_v20 }
  0xf8   :  { %3183 = vmatprep.mubr.msk.f32.mxu0 %vm3542_vm0, %v3543_v6  ;;  %3350 = vmatprep.mubr.msk.f32.mxu1 %vm3542_vm0, %v3543_v6  ;;  %v1114_v23 = vld [vmem:[%s5512_s2 + $0x78] sm:$0xff] }
  0xf9   :  { %v1669_v25 = vld [vmem:[%s5513_s3 + $0x78] sm:$0xff] }
  0xfa   :  { %v4360_v28 = vpop.f32.mrb[8].mxu0  ;;  %v4362_v29 = vpop.f32.mrb[8].mxu1 }
  0xfb   :  { %v2839_v30 = vpop.f32.mrb[9].mxu0  ;;  %3184 = vmatmul.mubr.msk.f32.gmra.mrb[114].mxu0 %vm82_vm4, %v1107_v26  ;;  %v3006_v32 = vpop.f32.mrb[9].mxu1  ;;  %3351 = vmatmul.mubr.msk.f32.gmra.mrb[114].mxu1 %vm82_vm4, %v1662_v27 }
  0xfc   :  { %3186 = vmatprep.mubr.msk.f32.mxu0 %vm3542_vm0, %v3543_v6  ;;  %3353 = vmatprep.mubr.msk.f32.mxu1 %vm3542_vm0, %v3543_v6  ;;  %v1126_v32 = vld [vmem:[%s5512_s2 + $0xd8] sm:$0xff] }
  0xfe   :  { %v4378_v35 = vpop.f32.mrb[10].mxu0  ;;  %v4380_v36 = vpop.f32.mrb[10].mxu1 }
  0xff   :  { %v2842_v37 = vpop.f32.mrb[11].mxu0  ;;  %3187 = vmatmul.mubr.msk.f32.gmra.mrb[116].mxu0 %vm82_vm4, %v1108_v33  ;;  %v3009_v39 = vpop.f32.mrb[11].mxu1  ;;  %3354 = vmatmul.mubr.msk.f32.gmra.mrb[116].mxu1 %vm82_vm4, %v1663_v34  ;;  %v1115_v34 = vld [vmem:[%s5512_s2 + $0x80] sm:$0xff] }
 0x100   :  { %3189 = vmatprep.mubr.msk.f32.mxu0 %vm3542_vm0, %v3543_v6  ;;  %3356 = vmatprep.mubr.msk.f32.mxu1 %vm3542_vm0, %v3543_v6  ;;  %v1670_v37 = vld [vmem:[%s5513_s3 + $0x80] sm:$0xff] }
 0x102   :  { %v4396_v42 = vpop.f32.mrb[12].mxu0  ;;  %v4398_v43 = vpop.f32.mrb[12].mxu1 }
 0x103   :  { %v2845_v44 = vpop.f32.mrb[13].mxu0  ;;  %3190 = vmatmul.mubr.msk.f32.gmra.mrb[118].mxu0 %vm82_vm4, %v1109_v40  ;;  %v3012_v46 = vpop.f32.mrb[13].mxu1  ;;  %3357 = vmatmul.mubr.msk.f32.gmra.mrb[118].mxu1 %vm82_vm4, %v1664_v41 }
 0x104   :  { %3192 = vmatprep.mubr.msk.f32.mxu0 %vm3542_vm0, %v3543_v6  ;;  %3359 = vmatprep.mubr.msk.f32.mxu1 %vm3542_vm0, %v3543_v6 }
 0x106   :  { %v4414_v49 = vpop.f32.mrb[14].mxu0  ;;  %v4416_v50 = vpop.f32.mrb[14].mxu1 }
 0x107   :  { %v2848_v51 = vpop.f32.mrb[15].mxu0  ;;  %3193 = vmatmul.mubr.msk.f32.gmra.mrb[120].mxu0 %vm82_vm4, %v1110_v47  ;;  %v3015_v53 = vpop.f32.mrb[15].mxu1  ;;  %3360 = vmatmul.mubr.msk.f32.gmra.mrb[120].mxu1 %vm82_vm4, %v1665_v48  ;;  %v1116_v47 = vld [vmem:[%s5512_s2 + $0x88] sm:$0xff] }
 0x108   :  { %3195 = vmatprep.mubr.msk.f32.mxu0 %vm3542_vm0, %v3543_v6  ;;  %3362 = vmatprep.mubr.msk.f32.mxu1 %vm3542_vm0, %v3543_v6  ;;  %v1671_v48 = vld [vmem:[%s5513_s3 + $0x88] sm:$0xff] }
 0x10a   :  { %v4432_v56 = vpop.f32.mrb[16].mxu0  ;;  %v4434_v57 = vpop.f32.mrb[16].mxu1 }
 0x10b   :  { %v2851_v58 = vpop.f32.mrb[17].mxu0  ;;  %3196 = vmatmul.mubr.msk.f32.gmra.mrb[122].mxu0 %vm82_vm4, %v1111_v54  ;;  %v3018_v60 = vpop.f32.mrb[17].mxu1  ;;  %3363 = vmatmul.mubr.msk.f32.gmra.mrb[122].mxu1 %vm82_vm4, %v1666_v55  ;;  %v1125_v55 = vld [vmem:[%s5512_s2 + $0xd0] sm:$0xff] }
 0x10c   :  { %3198 = vmatprep.mubr.msk.f32.mxu0 %vm3542_vm0, %v3543_v6  ;;  %3365 = vmatprep.mubr.msk.f32.mxu1 %vm3542_vm0, %v3543_v6  ;;  %v1117_v60 = vld [vmem:[%s5512_s2 + $0x90] sm:$0xff] }
 0x10e   :  { %v4450_v1 = vpop.f32.mrb[18].mxu0  ;;  %v4452_v3 = vpop.f32.mrb[18].mxu1 }
 0x10f   :  { %v2854_v4 = vpop.f32.mrb[19].mxu0  ;;  %3199 = vmatmul.mubr.msk.f32.gmra.mrb[124].mxu0 %vm82_vm4, %v1112_v61  ;;  %v3021_v9 = vpop.f32.mrb[19].mxu1  ;;  %3366 = vmatmul.mubr.msk.f32.gmra.mrb[124].mxu1 %vm82_vm4, %v1667_v62  ;;  %v1672_v61 = vld [vmem:[%s5513_s3 + $0x90] sm:$0xff] }
 0x110   :  { %3201 = vmatprep.mubr.msk.f32.mxu0 %vm3542_vm0, %v3543_v6  ;;  %3368 = vmatprep.mubr.msk.f32.mxu1 %vm3542_vm0, %v3543_v6 }
 0x112   :  { %v4468_v13 = vpop.f32.mrb[20].mxu0  ;;  %v4470_v16 = vpop.f32.mrb[20].mxu1 }
 0x113   :  { %v2857_v18 = vpop.f32.mrb[21].mxu0  ;;  %3202 = vmatmul.mubr.msk.f32.gmra.mrb[126].mxu0 %vm82_vm4, %v1113_v11  ;;  %v3024_v20 = vpop.f32.mrb[21].mxu1  ;;  %3369 = vmatmul.mubr.msk.f32.gmra.mrb[126].mxu1 %vm82_vm4, %v1668_v12 }
 0x114   :  { %3204 = vmatprep.mubr.msk.f32.mxu0 %vm3542_vm0, %v3543_v6  ;;  %3371 = vmatprep.mubr.msk.f32.mxu1 %vm3542_vm0, %v3543_v6  ;;  %v1118_v18 = vld [vmem:[%s5512_s2 + $0x98] sm:$0xff] }
 0x115   :  { %v1673_v20 = vld [vmem:[%s5513_s3 + $0x98] sm:$0xff] }
 0x116   :  { %v4486_v26 = vpop.f32.mrb[22].mxu0  ;;  %v4488_v27 = vpop.f32.mrb[22].mxu1 }
 0x117   :  { %v2860_v30 = vpop.f32.mrb[23].mxu0  ;;  %3205 = vmatmul.mubr.msk.f32.gmra.mrb[128].mxu0 %vm82_vm4, %v1114_v23  ;;  %v3027_v33 = vpop.f32.mrb[23].mxu1  ;;  %3372 = vmatmul.mubr.msk.f32.gmra.mrb[128].mxu1 %vm82_vm4, %v1669_v25 }
 0x118   :  { %3207 = vmatprep.mubr.msk.f32.mxu0 %vm3542_vm0, %v3543_v6  ;;  %3374 = vmatprep.mubr.msk.f32.mxu1 %vm3542_vm0, %v3543_v6  ;;  %v1124_v33 = vld [vmem:[%s5512_s2 + $0xc8] sm:$0xff] }
 0x11a   :  { %v4504_v39 = vpop.f32.mrb[24].mxu0  ;;  %v4506_v40 = vpop.f32.mrb[24].mxu1 }
 0x11b   :  { %v2863_v41 = vpop.f32.mrb[25].mxu0  ;;  %3208 = vmatmul.mubr.msk.f32.gmra.mrb[130].mxu0 %vm82_vm4, %v1115_v34  ;;  %v3030_v46 = vpop.f32.mrb[25].mxu1  ;;  %3375 = vmatmul.mubr.msk.f32.gmra.mrb[130].mxu1 %vm82_vm4, %v1670_v37  ;;  %v1119_v37 = vld [vmem:[%s5512_s2 + $0xa0] sm:$0xff] }
 0x11c   :  { %3210 = vmatprep.mubr.msk.f32.mxu0 %vm3542_vm0, %v3543_v6  ;;  %3377 = vmatprep.mubr.msk.f32.mxu1 %vm3542_vm0, %v3543_v6  ;;  %v1674_v41 = vld [vmem:[%s5513_s3 + $0xa0] sm:$0xff] }
 0x11e   :  { %v4522_v51 = vpop.f32.mrb[26].mxu0  ;;  %v4524_v53 = vpop.f32.mrb[26].mxu1 }
 0x11f   :  { %v2866_v54 = vpop.f32.mrb[27].mxu0  ;;  %3211 = vmatmul.mubr.msk.f32.gmra.mrb[132].mxu0 %vm82_vm4, %v1116_v47  ;;  %v3033_v58 = vpop.f32.mrb[27].mxu1  ;;  %3378 = vmatmul.mubr.msk.f32.gmra.mrb[132].mxu1 %vm82_vm4, %v1671_v48 }
 0x120   :  { %3213 = vmatprep.mubr.msk.f32.mxu0 %vm3542_vm0, %v3543_v6  ;;  %3380 = vmatprep.mubr.msk.f32.mxu1 %vm3542_vm0, %v3543_v6 }
 0x122   :  { %v4540_v62 = vpop.f32.mrb[28].mxu0  ;;  %v4542_v4 = vpop.f32.mrb[28].mxu1 }
 0x123   :  { %v2869_v9 = vpop.f32.mrb[29].mxu0  ;;  %3214 = vmatmul.mubr.msk.f32.gmra.mrb[134].mxu0 %vm82_vm4, %v1117_v60  ;;  %v3036_v12 = vpop.f32.mrb[29].mxu1  ;;  %3381 = vmatmul.mubr.msk.f32.gmra.mrb[134].mxu1 %vm82_vm4, %v1672_v61  ;;  %v1120_v60 = vld [vmem:[%s5512_s2 + $0xa8] sm:$0xff] }
 0x124   :  { %3216 = vmatprep.mubr.msk.f32.mxu0 %vm3542_vm0, %v3543_v6  ;;  %3383 = vmatprep.mubr.msk.f32.mxu1 %vm3542_vm0, %v3543_v6  ;;  %v1675_v61 = vld [vmem:[%s5513_s3 + $0xa8] sm:$0xff] }
 0x126   :  { %v4558_v23 = vpop.f32.mrb[30].mxu0  ;;  %v4560_v25 = vpop.f32.mrb[30].mxu1 }
 0x127   :  { %v2872_v30 = vpop.f32.mrb[31].mxu0  ;;  %3217 = vmatmul.mubr.msk.f32.gmra.mrb[136].mxu0 %vm82_vm4, %v1118_v18  ;;  %v3039_v34 = vpop.f32.mrb[31].mxu1  ;;  %3384 = vmatmul.mubr.msk.f32.gmra.mrb[136].mxu1 %vm82_vm4, %v1673_v20  ;;  %v1123_v20 = vld [vmem:[%s5512_s2 + $0xc0] sm:$0xff] }
 0x128   :  { %3219 = vmatprep.mubr.msk.f32.mxu0 %vm3542_vm0, %v3543_v6  ;;  %3386 = vmatprep.mubr.msk.f32.mxu1 %vm3542_vm0, %v3543_v6  ;;  %v1121_v34 = vld [vmem:[%s5512_s2 + $0xb0] sm:$0xff] }
 0x12a   :  { %v4576_v46 = vpop.f32.mrb[32].mxu0  ;;  %v4578_v47 = vpop.f32.mrb[32].mxu1 }
 0x12b   :  { %v2875_v48 = vpop.f32.mrb[33].mxu0  ;;  %3220 = vmatmul.mubr.msk.f32.gmra.mrb[138].mxu0 %vm82_vm4, %v1119_v37  ;;  %v3042_v58 = vpop.f32.mrb[33].mxu1  ;;  %3387 = vmatmul.mubr.msk.f32.gmra.mrb[138].mxu1 %vm82_vm4, %v1674_v41  ;;  %v1676_v37 = vld [vmem:[%s5513_s3 + $0xb0] sm:$0xff] }
 0x12c   :  { %3222 = vmatprep.mubr.msk.f32.mxu0 %vm3542_vm0, %v3543_v6  ;;  %3389 = vmatprep.mubr.msk.f32.mxu1 %vm3542_vm0, %v3543_v6 }
 0x12e   :  { %v4594_v9 = vpop.f32.mrb[34].mxu0  ;;  %v4596_v12 = vpop.f32.mrb[34].mxu1 }
 0x12f   :  { %v2878_v18 = vpop.f32.mrb[35].mxu0  ;;  %3223 = vmatmul.mubr.msk.f32.gmra.mrb[140].mxu0 %vm82_vm4, %v1120_v60  ;;  %v3045_v30 = vpop.f32.mrb[35].mxu1  ;;  %3390 = vmatmul.mubr.msk.f32.gmra.mrb[140].mxu1 %vm82_vm4, %v1675_v61 }
 0x130   :  { %3225 = vmatprep.mubr.msk.f32.mxu0 %vm3542_vm0, %v3543_v6  ;;  %3392 = vmatprep.mubr.msk.f32.mxu1 %vm3542_vm0, %v3543_v6  ;;  %v1122_v18 = vld [vmem:[%s5512_s2 + $0xb8] sm:$0xff] }
 0x131   :  { %v1677_v30 = vld [vmem:[%s5513_s3 + $0xb8] sm:$0xff] }
 0x132   :  { %v4612_v41 = vpop.f32.mrb[36].mxu0  ;;  %v4614_v48 = vpop.f32.mrb[36].mxu1 }
 0x133   :  { %v2881_v58 = vpop.f32.mrb[37].mxu0  ;;  %3226 = vmatmul.mubr.msk.f32.gmra.mrb[142].mxu0 %vm82_vm4, %v1121_v34  ;;  %v3048_v61 = vpop.f32.mrb[37].mxu1  ;;  %3393 = vmatmul.mubr.msk.f32.gmra.mrb[142].mxu1 %vm82_vm4, %v1676_v37 }
 0x134   :  { %3228 = vmatprep.mubr.msk.f32.mxu0 %vm3542_vm0, %v3543_v6  ;;  %3395 = vmatprep.mubr.msk.f32.mxu1 %vm3542_vm0, %v3543_v6 }
 0x136   :  { %v4630_v58 = vpop.f32.mrb[38].mxu0  ;;  %v4632_v34 = vpop.f32.mrb[38].mxu1 }
 0x137   :  { %v2884_v61 = vpop.f32.mrb[39].mxu0  ;;  %3229 = vmatmul.mubr.msk.f32.gmra.mrb[144].mxu0 %vm82_vm4, %v1122_v18  ;;  %v3051_v60 = vpop.f32.mrb[39].mxu1  ;;  %3396 = vmatmul.mubr.msk.f32.gmra.mrb[144].mxu1 %vm82_vm4, %v1677_v30 }
 0x138   :  { %3231 = vmatprep.mubr.msk.f32.mxu0 %vm3542_vm0, %v3543_v6  ;;  %3398 = vmatprep.mubr.msk.f32.mxu1 %vm3542_vm0, %v3543_v6  ;;  %v1678_v61 = vld [vmem:[%s5513_s3 + $0xc0] sm:$0xff] }
 0x13a   :  { %v4648_v37 = vpop.f32.mrb[40].mxu0  ;;  %v4650_v18 = vpop.f32.mrb[40].mxu1 }
 0x13b   :  { %v2887_v60 = vpop.f32.mrb[41].mxu0  ;;  %3232 = vmatmul.mubr.msk.f32.gmra.mrb[146].mxu0 %vm82_vm4, %v1123_v20  ;;  %v3054_v54 = vpop.f32.mrb[41].mxu1  ;;  %3399 = vmatmul.mubr.msk.f32.gmra.mrb[146].mxu1 %vm82_vm4, %v1678_v61 }
 0x13c   :  { %3234 = vmatprep.mubr.msk.f32.mxu0 %vm3542_vm0, %v3543_v6  ;;  %3401 = vmatprep.mubr.msk.f32.mxu1 %vm3542_vm0, %v3543_v6  ;;  %v1679_v60 = vld [vmem:[%s5513_s3 + $0xc8] sm:$0xff] }
 0x13e   :  { %v4666_v30 = vpop.f32.mrb[42].mxu0  ;;  %v4668_v20 = vpop.f32.mrb[42].mxu1 }
 0x13f   :  { %v2890_v54 = vpop.f32.mrb[43].mxu0  ;;  %3235 = vmatmul.mubr.msk.f32.gmra.mrb[148].mxu0 %vm82_vm4, %v1124_v33  ;;  %v3057_v11 = vpop.f32.mrb[43].mxu1  ;;  %3402 = vmatmul.mubr.msk.f32.gmra.mrb[148].mxu1 %vm82_vm4, %v1679_v60 }
 0x140   :  { %3237 = vmatprep.mubr.msk.f32.mxu0 %vm3542_vm0, %v3543_v6  ;;  %3404 = vmatprep.mubr.msk.f32.mxu1 %vm3542_vm0, %v3543_v6  ;;  %v1680_v54 = vld [vmem:[%s5513_s3 + $0xd0] sm:$0xff] }
 0x142   :  { %v4684_v61 = vpop.f32.mrb[44].mxu0  ;;  %v4686_v33 = vpop.f32.mrb[44].mxu1 }
 0x143   :  { %v2893_v11 = vpop.f32.mrb[45].mxu0  ;;  %3238 = vmatmul.mubr.msk.f32.gmra.mrb[150].mxu0 %vm82_vm4, %v1125_v55  ;;  %v3060_v44 = vpop.f32.mrb[45].mxu1  ;;  %3405 = vmatmul.mubr.msk.f32.gmra.mrb[150].mxu1 %vm82_vm4, %v1680_v54 }
 0x144   :  { %3240 = vmatprep.mubr.msk.f32.mxu0 %vm3542_vm0, %v3543_v6  ;;  %3407 = vmatprep.mubr.msk.f32.mxu1 %vm3542_vm0, %v3543_v6  ;;  %v1681_v11 = vld [vmem:[%s5513_s3 + $0xd8] sm:$0xff] }
 0x146   :  { %v4702_v60 = vpop.f32.mrb[46].mxu0  ;;  %v4704_v55 = vpop.f32.mrb[46].mxu1 }
 0x147   :  { %v2896_v44 = vpop.f32.mrb[47].mxu0  ;;  %3241 = vmatmul.mubr.msk.f32.gmra.mrb[152].mxu0 %vm82_vm4, %v1126_v32  ;;  %v3063_v19 = vpop.f32.mrb[47].mxu1  ;;  %3408 = vmatmul.mubr.msk.f32.gmra.mrb[152].mxu1 %vm82_vm4, %v1681_v11 }
 0x148   :  { %3243 = vmatprep.mubr.msk.f32.mxu0 %vm3542_vm0, %v3543_v6  ;;  %3410 = vmatprep.mubr.msk.f32.mxu1 %vm3542_vm0, %v3543_v6  ;;  %v1682_v44 = vld [vmem:[%s5513_s3 + $0xe0] sm:$0xff] }
 0x14a   :  { %v4720_v54 = vpop.f32.mrb[48].mxu0  ;;  %v4722_v32 = vpop.f32.mrb[48].mxu1 }
 0x14b   :  { %5567 = vst [vmem:[#allocation2_spill] sm:$0xff] %v4722_v32  ;;  %v2899_v19 = vpop.f32.mrb[49].mxu0  ;;  %3244 = vmatmul.mubr.msk.f32.gmra.mrb[154].mxu0 %vm82_vm4, %v1127_v5  ;;  %v3066_v59 = vpop.f32.mrb[49].mxu1  ;;  %3411 = vmatmul.mubr.msk.f32.gmra.mrb[154].mxu1 %vm82_vm4, %v1682_v44 }
 0x14c   :  { %3246 = vmatprep.mubr.msk.f32.mxu0 %vm3542_vm0, %v3543_v6  ;;  %3413 = vmatprep.mubr.msk.f32.mxu1 %vm3542_vm0, %v3543_v6  ;;  %v1683_v19 = vld [vmem:[%s5513_s3 + $0xe8] sm:$0xff] }
 0x14e   :  { %v4738_v11 = vpop.f32.mrb[50].mxu0  ;;  %v4740_v5 = vpop.f32.mrb[50].mxu1 }
 0x14f   :  { %5568 = vst [vmem:[#allocation3_spill] sm:$0xff] %v4738_v11  ;;  %5569 = vst [vmem:[#allocation4_spill] sm:$0xff] %v4740_v5  ;;  %v2902_v59 = vpop.f32.mrb[51].mxu0  ;;  %3247 = vmatmul.mubr.msk.f32.gmra.mrb[156].mxu0 %vm82_vm4, %v1128_v52  ;;  %v3069_v45 = vpop.f32.mrb[51].mxu1  ;;  %3414 = vmatmul.mubr.msk.f32.gmra.mrb[156].mxu1 %vm82_vm4, %v1683_v19 }
 0x150   :  { %3249 = vmatprep.mubr.msk.f32.mxu0 %vm3542_vm0, %v3543_v6  ;;  %3416 = vmatprep.mubr.msk.f32.mxu1 %vm3542_vm0, %v3543_v6  ;;  %v1684_v59 = vld [vmem:[%s5513_s3 + $0xf0] sm:$0xff] }
 0x152   :  { %v4756_v44 = vpop.f32.mrb[52].mxu0  ;;  %v4758_v52 = vpop.f32.mrb[52].mxu1 }
 0x153   :  { %5570 = vst [vmem:[#allocation5_spill] sm:$0xff] %v4756_v44  ;;  %5571 = vst [vmem:[#allocation6_spill] sm:$0xff] %v4758_v52  ;;  %v2905_v45 = vpop.f32.mrb[53].mxu0  ;;  %3250 = vmatmul.mubr.msk.f32.gmra.mrb[158].mxu0 %vm82_vm4, %v1129_v38  ;;  %v3072_v31 = vpop.f32.mrb[53].mxu1  ;;  %3417 = vmatmul.mubr.msk.f32.gmra.mrb[158].mxu1 %vm82_vm4, %v1684_v59 }
 0x154   :  { %3252 = vmatprep.mubr.msk.f32.mxu0 %vm3542_vm0, %v3543_v6  ;;  %3419 = vmatprep.mubr.msk.f32.mxu1 %vm3542_vm0, %v3543_v6  ;;  %v1685_v45 = vld [vmem:[%s5513_s3 + $0xf8] sm:$0xff] }
 0x156   :  { %v4774_v19 = vpop.f32.mrb[54].mxu0  ;;  %v4776_v38 = vpop.f32.mrb[54].mxu1 }
 0x157   :  { %5572 = vst [vmem:[#allocation7_spill] sm:$0xff] %v4774_v19  ;;  %5573 = vst [vmem:[#allocation8_spill] sm:$0xff] %v4776_v38  ;;  %v2908_v31 = vpop.f32.mrb[55].mxu0  ;;  %3253 = vmatmul.mubr.msk.f32.gmra.mrb[160].mxu0 %vm82_vm4, %v1130_v24  ;;  %v3075_v17 = vpop.f32.mrb[55].mxu1  ;;  %3420 = vmatmul.mubr.msk.f32.gmra.mrb[160].mxu1 %vm82_vm4, %v1685_v45  ;;  %v1132_v38 = vld [vmem:[%s5512_s2 + $0x108] sm:$0xff] }
 0x158   :  { %3255 = vmatprep.mubr.msk.f32.mxu0 %vm3542_vm0, %v3543_v6  ;;  %3422 = vmatprep.mubr.msk.f32.mxu1 %vm3542_vm0, %v3543_v6  ;;  %v1686_v31 = vld [vmem:[%s5513_s3 + $0x100] sm:$0xff] }
 0x15a   :  { %v4792_v59 = vpop.f32.mrb[56].mxu0  ;;  %v4794_v24 = vpop.f32.mrb[56].mxu1 }
 0x15b   :  { %5574 = vst [vmem:[#allocation9_spill] sm:$0xff] %v4792_v59  ;;  %5575 = vst [vmem:[#allocation10_spill] sm:$0xff] %v4794_v24  ;;  %v2911_v17 = vpop.f32.mrb[57].mxu0  ;;  %3256 = vmatmul.mubr.msk.f32.gmra.mrb[162].mxu0 %vm82_vm4, %v1131_v10  ;;  %v3078_v2 = vpop.f32.mrb[57].mxu1  ;;  %3423 = vmatmul.mubr.msk.f32.gmra.mrb[162].mxu1 %vm82_vm4, %v1686_v31  ;;  %v1133_v59 = vld [vmem:[%s5512_s2 + $0x110] sm:$0xff] }
 0x15c   :  { %3258 = vmatprep.mubr.msk.f32.mxu0 %vm3542_vm0, %v3543_v6  ;;  %3425 = vmatprep.mubr.msk.f32.mxu1 %vm3542_vm0, %v3543_v6  ;;  %v1687_v17 = vld [vmem:[%s5513_s3 + $0x108] sm:$0xff] }
 0x15e   :  { %v4810_v45 = vpop.f32.mrb[58].mxu0  ;;  %v4812_v10 = vpop.f32.mrb[58].mxu1 }
 0x15f   :  { %5576 = vst [vmem:[#allocation11_spill] sm:$0xff] %v4810_v45  ;;  %5577 = vst [vmem:[#allocation12_spill] sm:$0xff] %v4812_v10  ;;  %v2914_v2 = vpop.f32.mrb[59].mxu0  ;;  %3259 = vmatmul.mubr.msk.f32.gmra.mrb[164].mxu0 %vm82_vm4, %v1132_v38  ;;  %v3081_v24 = vpop.f32.mrb[59].mxu1  ;;  %3426 = vmatmul.mubr.msk.f32.gmra.mrb[164].mxu1 %vm82_vm4, %v1687_v17  ;;  %v1134_v45 = vld [vmem:[%s5512_s2 + $0x118] sm:$0xff] }
 0x160   :  { %3261 = vmatprep.mubr.msk.f32.mxu0 %vm3542_vm0, %v3543_v6  ;;  %3428 = vmatprep.mubr.msk.f32.mxu1 %vm3542_vm0, %v3543_v6  ;;  %v1688_v2 = vld [vmem:[%s5513_s3 + $0x110] sm:$0xff] }
 0x162   :  { %v4828_v31 = vpop.f32.mrb[60].mxu0  ;;  %v4830_v38 = vpop.f32.mrb[60].mxu1 }
 0x163   :  { %5578 = vst [vmem:[#allocation13_spill] sm:$0xff] %v4828_v31  ;;  %5579 = vst [vmem:[#allocation14_spill] sm:$0xff] %v4830_v38  ;;  %v2917_v24 = vpop.f32.mrb[61].mxu0  ;;  %3262 = vmatmul.mubr.msk.f32.gmra.mrb[166].mxu0 %vm82_vm4, %v1133_v59  ;;  %v3084_v10 = vpop.f32.mrb[61].mxu1  ;;  %3429 = vmatmul.mubr.msk.f32.gmra.mrb[166].mxu1 %vm82_vm4, %v1688_v2  ;;  %v1135_v31 = vld [vmem:[%s5512_s2 + $0x120] sm:$0xff] }
 0x164   :  { %3264 = vmatprep.mubr.msk.f32.mxu0 %vm3542_vm0, %v3543_v6  ;;  %3431 = vmatprep.mubr.msk.f32.mxu1 %vm3542_vm0, %v3543_v6  ;;  %v1689_v24 = vld [vmem:[%s5513_s3 + $0x118] sm:$0xff] }
 0x166   :  { %v4846_v17 = vpop.f32.mrb[62].mxu0  ;;  %v4848_v59 = vpop.f32.mrb[62].mxu1 }
 0x167   :  { %5580 = vst [vmem:[#allocation15_spill] sm:$0xff] %v4846_v17  ;;  %5581 = vst [vmem:[#allocation16_spill] sm:$0xff] %v4848_v59  ;;  %v2920_v10 = vpop.f32.mrb[63].mxu0  ;;  %3265 = vmatmul.mubr.msk.f32.gmra.mrb[168].mxu0 %vm82_vm4, %v1134_v45  ;;  %v3087_v38 = vpop.f32.mrb[63].mxu1  ;;  %3432 = vmatmul.mubr.msk.f32.gmra.mrb[168].mxu1 %vm82_vm4, %v1689_v24  ;;  %v1136_v17 = vld [vmem:[%s5512_s2 + $0x128] sm:$0xff] }
 0x168   :  { %3267 = vmatprep.mubr.msk.f32.mxu0 %vm3542_vm0, %v3543_v6  ;;  %3434 = vmatprep.mubr.msk.f32.mxu1 %vm3542_vm0, %v3543_v6  ;;  %v1690_v10 = vld [vmem:[%s5513_s3 + $0x120] sm:$0xff] }
 0x16a   :  { %v4864_v2 = vpop.f32.mrb[64].mxu0  ;;  %v4866_v45 = vpop.f32.mrb[64].mxu1 }
 0x16b   :  { %5582 = vst [vmem:[#allocation17_spill] sm:$0xff] %v4864_v2  ;;  %5583 = vst [vmem:[#allocation18_spill] sm:$0xff] %v4866_v45  ;;  %v2923_v38 = vpop.f32.mrb[65].mxu0  ;;  %3268 = vmatmul.mubr.msk.f32.gmra.mrb[170].mxu0 %vm82_vm4, %v1135_v31  ;;  %v3090_v59 = vpop.f32.mrb[65].mxu1  ;;  %3435 = vmatmul.mubr.msk.f32.gmra.mrb[170].mxu1 %vm82_vm4, %v1690_v10  ;;  %v1137_v2 = vld [vmem:[%s5512_s2 + $0x130] sm:$0xff] }
 0x16c   :  { %3270 = vmatprep.mubr.msk.f32.mxu0 %vm3542_vm0, %v3543_v6  ;;  %3437 = vmatprep.mubr.msk.f32.mxu1 %vm3542_vm0, %v3543_v6  ;;  %v1691_v38 = vld [vmem:[%s5513_s3 + $0x128] sm:$0xff] }
 0x16e   :  { %v4882_v24 = vpop.f32.mrb[66].mxu0  ;;  %v4884_v31 = vpop.f32.mrb[66].mxu1 }
 0x16f   :  { %5584 = vst [vmem:[#allocation19_spill] sm:$0xff] %v4882_v24  ;;  %5585 = vst [vmem:[#allocation20_spill] sm:$0xff] %v4884_v31  ;;  %v2926_v59 = vpop.f32.mrb[67].mxu0  ;;  %3271 = vmatmul.mubr.msk.f32.gmra.mrb[172].mxu0 %vm82_vm4, %v1136_v17  ;;  %v3093_v45 = vpop.f32.mrb[67].mxu1  ;;  %3438 = vmatmul.mubr.msk.f32.gmra.mrb[172].mxu1 %vm82_vm4, %v1691_v38  ;;  %v1138_v24 = vld [vmem:[%s5512_s2 + $0x138] sm:$0xff] }
 0x170   :  { %3273 = vmatprep.mubr.msk.f32.mxu0 %vm3542_vm0, %v3543_v6  ;;  %3440 = vmatprep.mubr.msk.f32.mxu1 %vm3542_vm0, %v3543_v6  ;;  %v1692_v59 = vld [vmem:[%s5513_s3 + $0x130] sm:$0xff] }
 0x172   :  { %v4900_v10 = vpop.f32.mrb[68].mxu0  ;;  %v4902_v17 = vpop.f32.mrb[68].mxu1 }
 0x173   :  { %5586 = vst [vmem:[#allocation21_spill] sm:$0xff] %v4900_v10  ;;  %5587 = vst [vmem:[#allocation22_spill] sm:$0xff] %v4902_v17  ;;  %v2929_v45 = vpop.f32.mrb[69].mxu0  ;;  %3274 = vmatmul.mubr.msk.f32.gmra.mrb[174].mxu0 %vm82_vm4, %v1137_v2  ;;  %v3096_v31 = vpop.f32.mrb[69].mxu1  ;;  %3441 = vmatmul.mubr.msk.f32.gmra.mrb[174].mxu1 %vm82_vm4, %v1692_v59  ;;  %v1139_v10 = vld [vmem:[%s5512_s2 + $0x140] sm:$0xff] }
 0x174   :  { %3276 = vmatprep.mubr.msk.f32.mxu0 %vm3542_vm0, %v3543_v6  ;;  %3443 = vmatprep.mubr.msk.f32.mxu1 %vm3542_vm0, %v3543_v6  ;;  %v1693_v45 = vld [vmem:[%s5513_s3 + $0x138] sm:$0xff] }
 0x176   :  { %v4918_v38 = vpop.f32.mrb[70].mxu0  ;;  %v4920_v2 = vpop.f32.mrb[70].mxu1 }
 0x177   :  { %5588 = vst [vmem:[#allocation23_spill] sm:$0xff] %v4918_v38  ;;  %5589 = vst [vmem:[#allocation24_spill] sm:$0xff] %v4920_v2  ;;  %v2932_v31 = vpop.f32.mrb[71].mxu0  ;;  %3277 = vmatmul.mubr.msk.f32.gmra.mrb[176].mxu0 %vm82_vm4, %v1138_v24  ;;  %v3099_v17 = vpop.f32.mrb[71].mxu1  ;;  %3444 = vmatmul.mubr.msk.f32.gmra.mrb[176].mxu1 %vm82_vm4, %v1693_v45  ;;  %v1140_v38 = vld [vmem:[%s5512_s2 + $0x148] sm:$0xff] }
 0x178   :  { %3279 = vmatprep.mubr.msk.f32.mxu0 %vm3542_vm0, %v3543_v6  ;;  %3446 = vmatprep.mubr.msk.f32.mxu1 %vm3542_vm0, %v3543_v6  ;;  %v1694_v31 = vld [vmem:[%s5513_s3 + $0x140] sm:$0xff] }
 0x17a   :  { %v4936_v59 = vpop.f32.mrb[72].mxu0  ;;  %v4938_v24 = vpop.f32.mrb[72].mxu1 }
 0x17b   :  { %5590 = vst [vmem:[#allocation25_spill] sm:$0xff] %v4936_v59  ;;  %5591 = vst [vmem:[#allocation26_spill] sm:$0xff] %v4938_v24  ;;  %v2935_v17 = vpop.f32.mrb[73].mxu0  ;;  %3280 = vmatmul.mubr.msk.f32.gmra.mrb[178].mxu0 %vm82_vm4, %v1139_v10  ;;  %v3102_v2 = vpop.f32.mrb[73].mxu1  ;;  %3447 = vmatmul.mubr.msk.f32.gmra.mrb[178].mxu1 %vm82_vm4, %v1694_v31  ;;  %v1141_v59 = vld [vmem:[%s5512_s2 + $0x150] sm:$0xff] }
 0x17c   :  { %3282 = vmatprep.mubr.msk.f32.mxu0 %vm3542_vm0, %v3543_v6  ;;  %3449 = vmatprep.mubr.msk.f32.mxu1 %vm3542_vm0, %v3543_v6  ;;  %v1695_v17 = vld [vmem:[%s5513_s3 + $0x148] sm:$0xff] }
 0x17e   :  { %v4954_v45 = vpop.f32.mrb[74].mxu0  ;;  %v4956_v10 = vpop.f32.mrb[74].mxu1 }
 0x17f   :  { %5592 = vst [vmem:[#allocation27_spill] sm:$0xff] %v4954_v45  ;;  %5593 = vst [vmem:[#allocation28_spill] sm:$0xff] %v4956_v10  ;;  %v2938_v2 = vpop.f32.mrb[75].mxu0  ;;  %3283 = vmatmul.mubr.msk.f32.gmra.mrb[180].mxu0 %vm82_vm4, %v1140_v38  ;;  %v3105_v24 = vpop.f32.mrb[75].mxu1  ;;  %3450 = vmatmul.mubr.msk.f32.gmra.mrb[180].mxu1 %vm82_vm4, %v1695_v17  ;;  %v1142_v45 = vld [vmem:[%s5512_s2 + $0x158] sm:$0xff] }
 0x180   :  { %3285 = vmatprep.mubr.msk.f32.mxu0 %vm3542_vm0, %v3543_v6  ;;  %3452 = vmatprep.mubr.msk.f32.mxu1 %vm3542_vm0, %v3543_v6  ;;  %v1696_v2 = vld [vmem:[%s5513_s3 + $0x150] sm:$0xff] }
 0x182   :  { %v4972_v31 = vpop.f32.mrb[76].mxu0  ;;  %v4974_v38 = vpop.f32.mrb[76].mxu1 }
 0x183   :  { %5594 = vst [vmem:[#allocation29_spill] sm:$0xff] %v4972_v31  ;;  %5595 = vst [vmem:[#allocation30_spill] sm:$0xff] %v4974_v38  ;;  %v2941_v24 = vpop.f32.mrb[77].mxu0  ;;  %3286 = vmatmul.mubr.msk.f32.gmra.mrb[182].mxu0 %vm82_vm4, %v1141_v59  ;;  %v3108_v10 = vpop.f32.mrb[77].mxu1  ;;  %3453 = vmatmul.mubr.msk.f32.gmra.mrb[182].mxu1 %vm82_vm4, %v1696_v2  ;;  %v1143_v31 = vld [vmem:[%s5512_s2 + $0x160] sm:$0xff] }
 0x184   :  { %3288 = vmatprep.mubr.msk.f32.mxu0 %vm3542_vm0, %v3543_v6  ;;  %3455 = vmatprep.mubr.msk.f32.mxu1 %vm3542_vm0, %v3543_v6  ;;  %v1697_v24 = vld [vmem:[%s5513_s3 + $0x158] sm:$0xff] }
 0x186   :  { %v4990_v17 = vpop.f32.mrb[78].mxu0  ;;  %v4992_v59 = vpop.f32.mrb[78].mxu1 }
 0x187   :  { %5596 = vst [vmem:[#allocation31_spill] sm:$0xff] %v4990_v17  ;;  %5597 = vst [vmem:[#allocation32_spill] sm:$0xff] %v4992_v59  ;;  %v2944_v10 = vpop.f32.mrb[79].mxu0  ;;  %3289 = vmatmul.mubr.msk.f32.gmra.mrb[184].mxu0 %vm82_vm4, %v1142_v45  ;;  %v3111_v38 = vpop.f32.mrb[79].mxu1  ;;  %3456 = vmatmul.mubr.msk.f32.gmra.mrb[184].mxu1 %vm82_vm4, %v1697_v24  ;;  %v1144_v17 = vld [vmem:[%s5512_s2 + $0x168] sm:$0xff] }
 0x188   :  { %3291 = vmatprep.mubr.msk.f32.mxu0 %vm3542_vm0, %v3543_v6  ;;  %3458 = vmatprep.mubr.msk.f32.mxu1 %vm3542_vm0, %v3543_v6  ;;  %v1698_v10 = vld [vmem:[%s5513_s3 + $0x160] sm:$0xff] }
 0x18a   :  { %v5008_v2 = vpop.f32.mrb[80].mxu0  ;;  %v5010_v45 = vpop.f32.mrb[80].mxu1 }
 0x18b   :  { %5598 = vst [vmem:[#allocation33_spill] sm:$0xff] %v5008_v2  ;;  %5599 = vst [vmem:[#allocation34_spill] sm:$0xff] %v5010_v45  ;;  %v2947_v38 = vpop.f32.mrb[81].mxu0  ;;  %3292 = vmatmul.mubr.msk.f32.gmra.mrb[186].mxu0 %vm82_vm4, %v1143_v31  ;;  %v3114_v59 = vpop.f32.mrb[81].mxu1  ;;  %3459 = vmatmul.mubr.msk.f32.gmra.mrb[186].mxu1 %vm82_vm4, %v1698_v10  ;;  %v1145_v2 = vld [vmem:[%s5512_s2 + $0x170] sm:$0xff] }
 0x18c   :  { %3294 = vmatprep.mubr.msk.f32.mxu0 %vm3542_vm0, %v3543_v6  ;;  %3461 = vmatprep.mubr.msk.f32.mxu1 %vm3542_vm0, %v3543_v6  ;;  %v1699_v38 = vld [vmem:[%s5513_s3 + $0x168] sm:$0xff] }
 0x18e   :  { %v5026_v24 = vpop.f32.mrb[82].mxu0  ;;  %v5028_v31 = vpop.f32.mrb[82].mxu1 }
 0x18f   :  { %5600 = vst [vmem:[#allocation35_spill] sm:$0xff] %v5026_v24  ;;  %5601 = vst [vmem:[#allocation36_spill] sm:$0xff] %v5028_v31  ;;  %v2950_v59 = vpop.f32.mrb[83].mxu0  ;;  %3295 = vmatmul.mubr.msk.f32.gmra.mrb[188].mxu0 %vm82_vm4, %v1144_v17  ;;  %v3117_v45 = vpop.f32.mrb[83].mxu1  ;;  %3462 = vmatmul.mubr.msk.f32.gmra.mrb[188].mxu1 %vm82_vm4, %v1699_v38  ;;  %v1146_v24 = vld [vmem:[%s5512_s2 + $0x178] sm:$0xff] }
 0x190   :  { %3297 = vmatprep.mubr.msk.f32.mxu0 %vm3542_vm0, %v3543_v6  ;;  %3464 = vmatprep.mubr.msk.f32.mxu1 %vm3542_vm0, %v3543_v6  ;;  %v1700_v59 = vld [vmem:[%s5513_s3 + $0x170] sm:$0xff] }
 0x192   :  { %v5044_v10 = vpop.f32.mrb[84].mxu0  ;;  %v5046_v17 = vpop.f32.mrb[84].mxu1 }
 0x193   :  { %5602 = vst [vmem:[#allocation37_spill] sm:$0xff] %v5044_v10  ;;  %5603 = vst [vmem:[#allocation38_spill] sm:$0xff] %v5046_v17  ;;  %v2953_v45 = vpop.f32.mrb[85].mxu0  ;;  %3298 = vmatmul.mubr.msk.f32.gmra.mrb[190].mxu0 %vm82_vm4, %v1145_v2  ;;  %v3120_v31 = vpop.f32.mrb[85].mxu1  ;;  %3465 = vmatmul.mubr.msk.f32.gmra.mrb[190].mxu1 %vm82_vm4, %v1700_v59  ;;  %v1147_v10 = vld [vmem:[%s5512_s2 + $0x180] sm:$0xff] }
 0x194   :  { %3300 = vmatprep.mubr.msk.f32.mxu0 %vm3542_vm0, %v3543_v6  ;;  %3467 = vmatprep.mubr.msk.f32.mxu1 %vm3542_vm0, %v3543_v6  ;;  %v1701_v45 = vld [vmem:[%s5513_s3 + $0x178] sm:$0xff] }
 0x196   :  { %v5062_v38 = vpop.f32.mrb[86].mxu0  ;;  %v5064_v2 = vpop.f32.mrb[86].mxu1 }
 0x197   :  { %5604 = vst [vmem:[#allocation39_spill] sm:$0xff] %v5062_v38  ;;  %5605 = vst [vmem:[#allocation40_spill] sm:$0xff] %v5064_v2  ;;  %v2956_v31 = vpop.f32.mrb[87].mxu0  ;;  %3301 = vmatmul.mubr.msk.f32.gmra.mrb[192].mxu0 %vm82_vm4, %v1146_v24  ;;  %v3123_v17 = vpop.f32.mrb[87].mxu1  ;;  %3468 = vmatmul.mubr.msk.f32.gmra.mrb[192].mxu1 %vm82_vm4, %v1701_v45 }
 0x198   :  { %3303 = vmatprep.mubr.msk.f32.mxu0 %vm3542_vm0, %v3543_v6  ;;  %3470 = vmatprep.mubr.msk.f32.mxu1 %vm3542_vm0, %v3543_v6  ;;  %v1702_v31 = vld [vmem:[%s5513_s3 + $0x180] sm:$0xff] }
 0x19a   :  { %v5080_v59 = vpop.f32.mrb[88].mxu0  ;;  %v5082_v24 = vpop.f32.mrb[88].mxu1 }
 0x19b   :  { %5606 = vst [vmem:[#allocation41_spill] sm:$0xff] %v5080_v59  ;;  %5607 = vst [vmem:[#allocation42_spill] sm:$0xff] %v5082_v24  ;;  %v2959_v17 = vpop.f32.mrb[89].mxu0  ;;  %3304 = vmatmul.mubr.msk.f32.gmra.mrb[194].mxu0 %vm82_vm4, %v1147_v10  ;;  %v3126_v2 = vpop.f32.mrb[89].mxu1  ;;  %3471 = vmatmul.mubr.msk.f32.gmra.mrb[194].mxu1 %vm82_vm4, %v1702_v31 }
 0x19e   :  { %v5088_v38 = vpop.f32.mrb[90].mxu0  ;;  %v5090_v6 = vpop.f32.mrb[90].mxu1 }
 0x19f   :  { %5608 = vst [vmem:[#allocation43_spill] sm:$0xff] %v5088_v38  ;;  %5609 = vst [vmem:[#allocation44_spill] sm:$0xff] %v5090_v6  ;;  %v2962_v19 = vpop.f32.mrb[91].mxu0  ;;  %v3129_v44 = vpop.f32.mrb[91].mxu1 }
 0x1a2   :  { %v5094_v5 = vpop.f32.mrb[92].mxu0  ;;  %v5096_v17 = vpop.f32.mrb[92].mxu1 }
 0x1a3   :  { %5610 = vst [vmem:[#allocation45_spill] sm:$0xff] %v5094_v5  ;;  %5611 = vst [vmem:[#allocation46_spill] sm:$0xff] %v5096_v17  ;;  %v2965_v11 = vpop.f32.mrb[93].mxu0  ;;  %v3132_v2 = vpop.f32.mrb[93].mxu1  ;;  %v5616_v17 = vmax.f32 %v4288_v63, %v4290_v0 }
 0x1a6   :  { %v5100_v45 = vpop.f32.mrb[94].mxu0  ;;  %v5102_v31 = vpop.f32.mrb[94].mxu1 }
 0x1a7   :  { %5612 = vst [vmem:[#allocation47_spill] sm:$0xff] %v5100_v45  ;;  %5613 = vst [vmem:[#allocation48_spill] sm:$0xff] %v5102_v31  ;;  %v2968_v24 = vpop.f32.mrb[95].mxu0  ;;  %v3135_v59 = vpop.f32.mrb[95].mxu1 }
 0x1a8   :  { %v5118_v59 = vld [vmem:[%s5514_s5] ss:$0 sm:$0xff] }
 0x1aa   :  { %v5106_v52 = vpop.f32.mrb[96].mxu0  ;;  %v5108_v44 = vpop.f32.mrb[96].mxu1 }
 0x1ab   :  { %5614 = vst [vmem:[#allocation49_spill] sm:$0xff] %v5106_v52  ;;  %5615 = vst [vmem:[#allocation50_spill] sm:$0xff] %v5108_v44  ;;  %v2971_v6 = vpop.f32.mrb[97].mxu0  ;;  %v3138_v38 = vpop.f32.mrb[97].mxu1 }
 0x1ac   :  { %v5617_v38 = vmax.f32 %v4306_v7, %v4308_v8 }
 0x1ae   :  { %v1361_v10 = vpop.f32.mrb[98].mxu0  ;;  %v1916_v2 = vpop.f32.mrb[98].mxu1 }
 0x1af   :  { %v1605_v5 = vmax.f32 %v5616_v17, %v1361_v10  ;;  %v3161_v24 = vpop.f32.mrb[99].mxu0  ;;  %v3328_v32 = vpop.f32.mrb[99].mxu1  ;;  %v5618_v10 = vmax.f32 %v4324_v14, %v4326_v15 }
 0x1b1   :  { %v2160_v19 = vmax.f32 %v1605_v5, %v1916_v2  ;;  %v5619_v2 = vmax.f32 %v4342_v21, %v4344_v22 }
 0x1b2   :  { %v1366_v31 = vpop.f32.mrb[100].mxu0  ;;  %v1921_v6 = vpop.f32.mrb[100].mxu1 }
 0x1b3   :  { %v2216_v45 = vadd.f32 %v5118_v59, %v2160_v19  ;;  %v1606_v11 = vmax.f32 %v5617_v38, %v1366_v31  ;;  %v3164_v44 = vpop.f32.mrb[101].mxu0  ;;  %v3331_v52 = vpop.f32.mrb[101].mxu1 }
 0x1b5   :  { %v2265_v63 = vmax.f32 %v2216_v45, 0.0  ;;  %v2161_v0 = vmax.f32 %v1606_v11, %v1921_v6 }
 0x1b6   :  { %v1371_v32 = vpop.f32.mrb[102].mxu0  ;;  %v1926_v17 = vpop.f32.mrb[102].mxu1 }
 0x1b7   :  { %2315 = vst.msk [vmem:[%s5515_s6] sm:$0xff] %vm2314_vm5, %v2265_v63  ;;  %v2217_v5 = vadd.f32 %v5118_v59, %v2161_v0  ;;  %v1607_v19 = vmax.f32 %v5618_v10, %v1371_v32  ;;  %v3167_v7 = vpop.f32.mrb[103].mxu0  ;;  %v3334_v8 = vpop.f32.mrb[103].mxu1 }
 0x1b9   :  { %v2266_v31 = vmax.f32 %v2217_v5, 0.0  ;;  %v2162_v52 = vmax.f32 %v1607_v19, %v1926_v17  ;;  %v5620_v17 = vmax.f32 %v4360_v28, %v4362_v29 }
 0x1ba   :  { %v1376_v44 = vpop.f32.mrb[104].mxu0  ;;  %v1931_v45 = vpop.f32.mrb[104].mxu1 }
 0x1bb   :  { %2316 = vst.msk [vmem:[%s5515_s6 + $0x8] sm:$0xff] %vm2314_vm5, %v2266_v31  ;;  %v2218_v11 = vadd.f32 %v5118_v59, %v2162_v52  ;;  %v1608_v24 = vmax.f32 %v5619_v2, %v1376_v44  ;;  %v3170_v6 = vpop.f32.mrb[105].mxu0  ;;  %v3337_v14 = vpop.f32.mrb[105].mxu1  ;;  %v5621_v52 = vmax.f32 %v4378_v35, %v4380_v36 }
 0x1bc   :  { %v5622_v14 = vmax.f32 %v4396_v42, %v4398_v43 }
 0x1bd   :  { %v2267_v15 = vmax.f32 %v2218_v11, 0.0  ;;  %v2163_v38 = vmax.f32 %v1608_v24, %v1931_v45 }
 0x1be   :  { %v1381_v63 = vpop.f32.mrb[106].mxu0  ;;  %v1936_v0 = vpop.f32.mrb[106].mxu1 }
 0x1bf   :  { %2317 = vst.msk [vmem:[%s5515_s6 + $0x10] sm:$0xff] %vm2314_vm5, %v2267_v15  ;;  %v2219_v32 = vadd.f32 %v5118_v59, %v2163_v38  ;;  %v1609_v5 = vmax.f32 %v5620_v17, %v1381_v63  ;;  %v3173_v10 = vpop.f32.mrb[107].mxu0  ;;  %v3340_v21 = vpop.f32.mrb[107].mxu1 }
 0x1c1   :  { %v2268_v22 = vmax.f32 %v2219_v32, 0.0  ;;  %v2164_v19 = vmax.f32 %v1609_v5, %v1936_v0  ;;  %v5623_v5 = vmax.f32 %v4414_v49, %v4416_v50 }
 0x1c2   :  { %v1386_v7 = vpop.f32.mrb[108].mxu0  ;;  %v1941_v8 = vpop.f32.mrb[108].mxu1 }
 0x1c3   :  { %2318 = vst.msk [vmem:[%s5515_s6 + $0x18] sm:$0xff] %vm2314_vm5, %v2268_v22  ;;  %v2220_v31 = vadd.f32 %v5118_v59, %v2164_v19  ;;  %v1610_v44 = vmax.f32 %v5621_v52, %v1386_v7  ;;  %v3176_v45 = vpop.f32.mrb[109].mxu0  ;;  %v3343_v28 = vpop.f32.mrb[109].mxu1 }
 0x1c5   :  { %v2269_v29 = vmax.f32 %v2220_v31, 0.0  ;;  %v2165_v11 = vmax.f32 %v1610_v44, %v1941_v8  ;;  %v5624_v31 = vmax.f32 %v4432_v56, %v4434_v57 }
 0x1c6   :  { %v1391_v2 = vpop.f32.mrb[110].mxu0  ;;  %v1946_v24 = vpop.f32.mrb[110].mxu1 }
 0x1c7   :  { %2319 = vst.msk [vmem:[%s5515_s6 + $0x20] sm:$0xff] %vm2314_vm5, %v2269_v29  ;;  %v2221_v6 = vadd.f32 %v5118_v59, %v2165_v11  ;;  %v1611_v15 = vmax.f32 %v5622_v14, %v1391_v2  ;;  %v3179_v38 = vpop.f32.mrb[111].mxu0  ;;  %v3346_v35 = vpop.f32.mrb[111].mxu1  ;;  %v5625_v2 = vmax.f32 %v4450_v1, %v4452_v3 }
 0x1c9   :  { %v2270_v36 = vmax.f32 %v2221_v6, 0.0  ;;  %v2166_v63 = vmax.f32 %v1611_v15, %v1946_v24 }
 0x1ca   :  { %v1396_v0 = vpop.f32.mrb[112].mxu0  ;;  %v1951_v32 = vpop.f32.mrb[112].mxu1 }
 0x1cb   :  { %2320 = vst.msk [vmem:[%s5515_s6 + $0x28] sm:$0xff] %vm2314_vm5, %v2270_v36  ;;  %v2222_v17 = vadd.f32 %v5118_v59, %v2166_v63  ;;  %v1612_v10 = vmax.f32 %v5623_v5, %v1396_v0  ;;  %v3182_v21 = vpop.f32.mrb[113].mxu0  ;;  %v3349_v42 = vpop.f32.mrb[113].mxu1  ;;  %v5626_v36 = vmax.f32 %v4468_v13, %v4470_v16 }
 0x1cc   :  { %v5627_v21 = vmax.f32 %v4486_v26, %v4488_v27 }
 0x1cd   :  { %v2271_v43 = vmax.f32 %v2222_v17, 0.0  ;;  %v2167_v22 = vmax.f32 %v1612_v10, %v1951_v32 }
 0x1ce   :  { %v1401_v19 = vpop.f32.mrb[114].mxu0  ;;  %v1956_v7 = vpop.f32.mrb[114].mxu1 }
 0x1cf   :  { %2321 = vst.msk [vmem:[%s5515_s6 + $0x30] sm:$0xff] %vm2314_vm5, %v2271_v43  ;;  %v2223_v8 = vadd.f32 %v5118_v59, %v2167_v22  ;;  %v1613_v52 = vmax.f32 %v5624_v31, %v1401_v19  ;;  %v3185_v44 = vpop.f32.mrb[115].mxu0  ;;  %v3352_v49 = vpop.f32.mrb[115].mxu1  ;;  %v5628_v31 = vmax.f32 %v4504_v39, %v4506_v40 }
 0x1d1   :  { %v2272_v50 = vmax.f32 %v2223_v8, 0.0  ;;  %v2168_v45 = vmax.f32 %v1613_v52, %v1956_v7 }
 0x1d2   :  { %v1406_v28 = vpop.f32.mrb[116].mxu0  ;;  %v1961_v29 = vpop.f32.mrb[116].mxu1 }
 0x1d3   :  { %2322 = vst.msk [vmem:[%s5515_s6 + $0x38] sm:$0xff] %vm2314_vm5, %v2272_v50  ;;  %v2224_v11 = vadd.f32 %v5118_v59, %v2168_v45  ;;  %v1614_v24 = vmax.f32 %v5625_v2, %v1406_v28  ;;  %v3188_v6 = vpop.f32.mrb[117].mxu0  ;;  %v3355_v56 = vpop.f32.mrb[117].mxu1 }
 0x1d5   :  { %v2273_v57 = vmax.f32 %v2224_v11, 0.0  ;;  %v2169_v14 = vmax.f32 %v1614_v24, %v1961_v29  ;;  %v5629_v29 = vmax.f32 %v4522_v51, %v4524_v53 }
 0x1d6   :  { %v1411_v15 = vpop.f32.mrb[118].mxu0  ;;  %v1966_v38 = vpop.f32.mrb[118].mxu1 }
 0x1d7   :  { %2323 = vst.msk [vmem:[%s5515_s6 + $0x40] sm:$0xff] %vm2314_vm5, %v2273_v57  ;;  %v2225_v35 = vadd.f32 %v5118_v59, %v2169_v14  ;;  %v1615_v63 = vmax.f32 %v5626_v36, %v1411_v15  ;;  %v3191_v0 = vpop.f32.mrb[119].mxu0  ;;  %v3358_v1 = vpop.f32.mrb[119].mxu1  ;;  %v5630_v14 = vmax.f32 %v4540_v62, %v4542_v4 }
 0x1d8   :  { %v5631_v1 = vmax.f32 %v4558_v23, %v4560_v25 }
 0x1d9   :  { %v2274_v3 = vmax.f32 %v2225_v35, 0.0  ;;  %v2170_v32 = vmax.f32 %v1615_v63, %v1966_v38 }
 0x1da   :  { %v1416_v17 = vpop.f32.mrb[120].mxu0  ;;  %v1971_v5 = vpop.f32.mrb[120].mxu1 }
 0x1db   :  { %2324 = vst.msk [vmem:[%s5515_s6 + $0x48] sm:$0xff] %vm2314_vm5, %v2274_v3  ;;  %v2226_v10 = vadd.f32 %v5118_v59, %v2170_v32  ;;  %v1616_v42 = vmax.f32 %v5627_v21, %v1416_v17  ;;  %v3194_v43 = vpop.f32.mrb[121].mxu0  ;;  %v3361_v13 = vpop.f32.mrb[121].mxu1 }
 0x1dd   :  { %v2275_v16 = vmax.f32 %v2226_v10, 0.0  ;;  %v2171_v22 = vmax.f32 %v1616_v42, %v1971_v5  ;;  %v5632_v42 = vmax.f32 %v4576_v46, %v4578_v47 }
 0x1de   :  { %v1421_v19 = vpop.f32.mrb[122].mxu0  ;;  %v1976_v7 = vpop.f32.mrb[122].mxu1 }
 0x1df   :  { %2325 = vst.msk [vmem:[%s5515_s6 + $0x50] sm:$0xff] %vm2314_vm5, %v2275_v16  ;;  %v2227_v8 = vadd.f32 %v5118_v59, %v2171_v22  ;;  %v1617_v52 = vmax.f32 %v5628_v31, %v1421_v19  ;;  %v3197_v44 = vpop.f32.mrb[123].mxu0  ;;  %v3364_v26 = vpop.f32.mrb[123].mxu1 }
 0x1e1   :  { %v2276_v27 = vmax.f32 %v2227_v8, 0.0  ;;  %v2172_v49 = vmax.f32 %v1617_v52, %v1976_v7  ;;  %v5633_v8 = vmax.f32 %v4594_v9, %v4596_v12 }
 0x1e2   :  { %v1426_v50 = vpop.f32.mrb[124].mxu0  ;;  %v1981_v45 = vpop.f32.mrb[124].mxu1 }
 0x1e3   :  { %2326 = vst.msk [vmem:[%s5515_s6 + $0x58] sm:$0xff] %vm2314_vm5, %v2276_v27  ;;  %v2228_v28 = vadd.f32 %v5118_v59, %v2172_v49  ;;  %v1618_v11 = vmax.f32 %v5629_v29, %v1426_v50  ;;  %v3200_v2 = vpop.f32.mrb[125].mxu0  ;;  %v3367_v39 = vpop.f32.mrb[125].mxu1  ;;  %v5634_v50 = vmax.f32 %v4612_v41, %v4614_v48 }
 0x1e5   :  { %v2277_v40 = vmax.f32 %v2228_v28, 0.0  ;;  %v2173_v24 = vmax.f32 %v1618_v11, %v1981_v45 }
 0x1e6   :  { %v1431_v6 = vpop.f32.mrb[126].mxu0  ;;  %v1986_v56 = vpop.f32.mrb[126].mxu1 }
 0x1e7   :  { %2327 = vst.msk [vmem:[%s5515_s6 + $0x60] sm:$0xff] %vm2314_vm5, %v2277_v40  ;;  %v2229_v57 = vadd.f32 %v5118_v59, %v2173_v24  ;;  %v1619_v15 = vmax.f32 %v5630_v14, %v1431_v6  ;;  %v3203_v38 = vpop.f32.mrb[127].mxu0  ;;  %v3370_v51 = vpop.f32.mrb[127].mxu1  ;;  %v5635_v40 = vmax.f32 %v4630_v58, %v4632_v34 }
 0x1e8   :  { %v5636_v38 = vmax.f32 %v4648_v37, %v4650_v18 }
 0x1e9   :  { %v2278_v53 = vmax.f32 %v2229_v57, 0.0  ;;  %v2174_v35 = vmax.f32 %v1619_v15, %v1986_v56 }
 0x1ea   :  { %v1436_v36 = vpop.f32.mrb[128].mxu0  ;;  %v1991_v63 = vpop.f32.mrb[128].mxu1 }
 0x1eb   :  { %2328 = vst.msk [vmem:[%s5515_s6 + $0x68] sm:$0xff] %vm2314_vm5, %v2278_v53  ;;  %v2230_v0 = vadd.f32 %v5118_v59, %v2174_v35  ;;  %v1620_v3 = vmax.f32 %v5631_v1, %v1436_v36  ;;  %v3206_v32 = vpop.f32.mrb[129].mxu0  ;;  %v3373_v62 = vpop.f32.mrb[129].mxu1  ;;  %v5637_v1 = vmax.f32 %v4666_v30, %v4668_v20 }
 0x1ed   :  { %v2279_v4 = vmax.f32 %v2230_v0, 0.0  ;;  %v2175_v17 = vmax.f32 %v1620_v3, %v1991_v63 }
 0x1ee   :  { %v1441_v5 = vpop.f32.mrb[130].mxu0  ;;  %v1996_v10 = vpop.f32.mrb[130].mxu1 }
 0x1ef   :  { %2329 = vst.msk [vmem:[%s5515_s6 + $0x70] sm:$0xff] %vm2314_vm5, %v2279_v4  ;;  %v2231_v21 = vadd.f32 %v5118_v59, %v2175_v17  ;;  %v1621_v43 = vmax.f32 %v5632_v42, %v1441_v5  ;;  %v3209_v13 = vpop.f32.mrb[131].mxu0  ;;  %v3376_v23 = vpop.f32.mrb[131].mxu1 }
 0x1f1   :  { %v2280_v25 = vmax.f32 %v2231_v21, 0.0  ;;  %v2176_v16 = vmax.f32 %v1621_v43, %v1996_v10  ;;  %v5638_v10 = vmax.f32 %v4684_v61, %v4686_v33 }
 0x1f2   :  { %v1446_v22 = vpop.f32.mrb[132].mxu0  ;;  %v2001_v19 = vpop.f32.mrb[132].mxu1 }
 0x1f3   :  { %2330 = vst.msk [vmem:[%s5515_s6 + $0x78] sm:$0xff] %vm2314_vm5, %v2280_v25  ;;  %v2232_v7 = vadd.f32 %v5118_v59, %v2176_v16  ;;  %v1622_v31 = vmax.f32 %v5633_v8, %v1446_v22  ;;  %v3212_v52 = vpop.f32.mrb[133].mxu0  ;;  %v3379_v46 = vpop.f32.mrb[133].mxu1  ;;  %v5639_v16 = vmax.f32 %v4702_v60, %v4704_v55 }
 0x1f4   :  { %v5640_v46 = vld [vmem:[#allocation2_spill] sm:$0xff] }
 0x1f5   :  { %v2281_v47 = vmax.f32 %v2232_v7, 0.0  ;;  %v2177_v44 = vmax.f32 %v1622_v31, %v2001_v19 }
 0x1f6   :  { %v1451_v26 = vpop.f32.mrb[134].mxu0  ;;  %v2006_v27 = vpop.f32.mrb[134].mxu1 }
 0x1f7   :  { %2331 = vst.msk [vmem:[%s5515_s6 + $0x80] sm:$0xff] %vm2314_vm5, %v2281_v47  ;;  %v2233_v49 = vadd.f32 %v5118_v59, %v2177_v44  ;;  %v1623_v45 = vmax.f32 %v5634_v50, %v1451_v26  ;;  %v3215_v28 = vpop.f32.mrb[135].mxu0  ;;  %v3382_v9 = vpop.f32.mrb[135].mxu1  ;;  %v5641_v47 = vmax.f32 %v4720_v54, %v5640_v46 }
 0x1f8   :  { %v5642_v28 = vld [vmem:[#allocation3_spill] sm:$0xff]  ;;  %v5643_v9 = vld [vmem:[#allocation4_spill] sm:$0xff] }
 0x1f9   :  { %v2282_v12 = vmax.f32 %v2233_v49, 0.0  ;;  %v2178_v29 = vmax.f32 %v1623_v45, %v2006_v27 }
 0x1fa   :  { %v1456_v11 = vpop.f32.mrb[136].mxu0  ;;  %v2011_v2 = vpop.f32.mrb[136].mxu1 }
 0x1fb   :  { %2332 = vst.msk [vmem:[%s5515_s6 + $0x88] sm:$0xff] %vm2314_vm5, %v2282_v12  ;;  %v2234_v39 = vadd.f32 %v5118_v59, %v2178_v29  ;;  %v1624_v24 = vmax.f32 %v5635_v40, %v1456_v11  ;;  %v3218_v6 = vpop.f32.mrb[137].mxu0  ;;  %v3385_v41 = vpop.f32.mrb[137].mxu1  ;;  %v5644_v12 = vmax.f32 %v5642_v28, %v5643_v9 }
 0x1fc   :  { %v5645_v41 = vld [vmem:[#allocation5_spill] sm:$0xff] }
 0x1fd   :  { %v2283_v48 = vmax.f32 %v2234_v39, 0.0  ;;  %v2179_v56 = vmax.f32 %v1624_v24, %v2011_v2 }
 0x1fe   :  { %v1461_v57 = vpop.f32.mrb[138].mxu0  ;;  %v2016_v14 = vpop.f32.mrb[138].mxu1 }
 0x1ff   :  { %2333 = vst.msk [vmem:[%s5515_s6 + $0x90] sm:$0xff] %vm2314_vm5, %v2283_v48  ;;  %v2235_v15 = vadd.f32 %v5118_v59, %v2179_v56  ;;  %v1625_v51 = vmax.f32 %v5636_v38, %v1461_v57  ;;  %v3221_v53 = vpop.f32.mrb[139].mxu0  ;;  %v3388_v58 = vpop.f32.mrb[139].mxu1  ;;  %v5646_v48 = vld [vmem:[#allocation6_spill] sm:$0xff] }
 0x200   :  { %v5647_v56 = vmax.f32 %v5645_v41, %v5646_v48 }
 0x201   :  { %v2284_v34 = vmax.f32 %v2235_v15, 0.0  ;;  %v2180_v35 = vmax.f32 %v1625_v51, %v2016_v14 }
 0x202   :  { %v1466_v36 = vpop.f32.mrb[140].mxu0  ;;  %v2021_v63 = vpop.f32.mrb[140].mxu1 }
 0x203   :  { %2334 = vst.msk [vmem:[%s5515_s6 + $0x98] sm:$0xff] %vm2314_vm5, %v2284_v34  ;;  %v2236_v0 = vadd.f32 %v5118_v59, %v2180_v35  ;;  %v1626_v3 = vmax.f32 %v5637_v1, %v1466_v36  ;;  %v3224_v32 = vpop.f32.mrb[141].mxu0  ;;  %v3391_v37 = vpop.f32.mrb[141].mxu1  ;;  %v5648_v35 = vld [vmem:[#allocation7_spill] sm:$0xff]  ;;  %v5649_v36 = vld [vmem:[#allocation8_spill] sm:$0xff] }
 0x205   :  { %v2285_v18 = vmax.f32 %v2236_v0, 0.0  ;;  %v2181_v62 = vmax.f32 %v1626_v3, %v2021_v63  ;;  %v5650_v63 = vmax.f32 %v5648_v35, %v5649_v36 }
 0x206   :  { %v1471_v4 = vpop.f32.mrb[142].mxu0  ;;  %v2026_v17 = vpop.f32.mrb[142].mxu1 }
 0x207   :  { %2335 = vst.msk [vmem:[%s5515_s6 + $0xa0] sm:$0xff] %vm2314_vm5, %v2285_v18  ;;  %v2237_v5 = vadd.f32 %v5118_v59, %v2181_v62  ;;  %v1627_v21 = vmax.f32 %v5638_v10, %v1471_v4  ;;  %v3227_v42 = vpop.f32.mrb[143].mxu0  ;;  %v3394_v30 = vpop.f32.mrb[143].mxu1 }
 0x209   :  { %v2286_v20 = vmax.f32 %v2237_v5, 0.0  ;;  %v2182_v43 = vmax.f32 %v1627_v21, %v2026_v17  ;;  %v5651_v17 = vld [vmem:[#allocation9_spill] sm:$0xff]  ;;  %v5652_v5 = vld [vmem:[#allocation10_spill] sm:$0xff] }
 0x20a   :  { %v1476_v13 = vpop.f32.mrb[144].mxu0  ;;  %v2031_v23 = vpop.f32.mrb[144].mxu1  ;;  %v5653_v10 = vmax.f32 %v5651_v17, %v5652_v5 }
 0x20b   :  { %2336 = vst.msk [vmem:[%s5515_s6 + $0xa8] sm:$0xff] %vm2314_vm5, %v2286_v20  ;;  %v2238_v25 = vadd.f32 %v5118_v59, %v2182_v43  ;;  %v1628_v22 = vmax.f32 %v5639_v16, %v1476_v13  ;;  %v3230_v19 = vpop.f32.mrb[145].mxu0  ;;  %v3397_v61 = vpop.f32.mrb[145].mxu1  ;;  %v5654_v16 = vld [vmem:[#allocation11_spill] sm:$0xff] }
 0x20d   :  { %v2287_v33 = vmax.f32 %v2238_v25, 0.0  ;;  %v2183_v7 = vmax.f32 %v1628_v22, %v2031_v23  ;;  %v5655_v22 = vld [vmem:[#allocation12_spill] sm:$0xff] }
 0x20e   :  { %v1481_v8 = vpop.f32.mrb[146].mxu0  ;;  %v2036_v31 = vpop.f32.mrb[146].mxu1  ;;  %v5656_v19 = vmax.f32 %v5654_v16, %v5655_v22 }
 0x20f   :  { %2337 = vst.msk [vmem:[%s5515_s6 + $0xb0] sm:$0xff] %vm2314_vm5, %v2287_v33  ;;  %v2239_v52 = vadd.f32 %v5118_v59, %v2183_v7  ;;  %v1629_v44 = vmax.f32 %v5641_v47, %v1481_v8  ;;  %v3233_v26 = vpop.f32.mrb[147].mxu0  ;;  %v3400_v60 = vpop.f32.mrb[147].mxu1 }
 0x210   :  { %v5658_v26 = vld [vmem:[#allocation14_spill] sm:$0xff] }
 0x211   :  { %v2288_v55 = vmax.f32 %v2239_v52, 0.0  ;;  %v2184_v27 = vmax.f32 %v1629_v44, %v2036_v31  ;;  %v5657_v44 = vld [vmem:[#allocation13_spill] sm:$0xff] }
 0x212   :  { %v1486_v49 = vpop.f32.mrb[148].mxu0  ;;  %v2041_v50 = vpop.f32.mrb[148].mxu1  ;;  %v5659_v60 = vmax.f32 %v5657_v44, %v5658_v26 }
 0x213   :  { %2338 = vst.msk [vmem:[%s5515_s6 + $0xb8] sm:$0xff] %vm2314_vm5, %v2288_v55  ;;  %v2240_v45 = vadd.f32 %v5118_v59, %v2184_v27  ;;  %v1630_v29 = vmax.f32 %v5644_v12, %v1486_v49  ;;  %v3236_v11 = vpop.f32.mrb[149].mxu0  ;;  %v3403_v54 = vpop.f32.mrb[149].mxu1 }
 0x214   :  { %v5661_v11 = vld [vmem:[#allocation16_spill] sm:$0xff] }
 0x215   :  { %v2289_v2 = vmax.f32 %v2240_v45, 0.0  ;;  %v2185_v39 = vmax.f32 %v1630_v29, %v2041_v50  ;;  %v5660_v29 = vld [vmem:[#allocation15_spill] sm:$0xff] }
 0x216   :  { %v1491_v40 = vpop.f32.mrb[150].mxu0  ;;  %v2046_v24 = vpop.f32.mrb[150].mxu1  ;;  %v5662_v54 = vmax.f32 %v5660_v29, %v5661_v11 }
 0x217   :  { %2339 = vst.msk [vmem:[%s5515_s6 + $0xc0] sm:$0xff] %vm2314_vm5, %v2289_v2  ;;  %v2241_v6 = vadd.f32 %v5118_v59, %v2185_v39  ;;  %v1631_v57 = vmax.f32 %v5647_v56, %v1491_v40  ;;  %v3239_v14 = vpop.f32.mrb[151].mxu0  ;;  %v3406_v15 = vpop.f32.mrb[151].mxu1 }
 0x218   :  { %v5664_v14 = vld [vmem:[#allocation18_spill] sm:$0xff] }
 0x219   :  { %v2290_v38 = vmax.f32 %v2241_v6, 0.0  ;;  %v2186_v51 = vmax.f32 %v1631_v57, %v2046_v24  ;;  %v5663_v57 = vld [vmem:[#allocation17_spill] sm:$0xff] }
 0x21a   :  { %v1496_v53 = vpop.f32.mrb[152].mxu0  ;;  %v2051_v58 = vpop.f32.mrb[152].mxu1  ;;  %v5665_v15 = vmax.f32 %v5663_v57, %v5664_v14 }
 0x21b   :  { %2340 = vst.msk [vmem:[%s5515_s6 + $0xc8] sm:$0xff] %vm2314_vm5, %v2290_v38  ;;  %v2242_v34 = vadd.f32 %v5118_v59, %v2186_v51  ;;  %v1632_v0 = vmax.f32 %v5650_v63, %v1496_v53  ;;  %v3242_v1 = vpop.f32.mrb[153].mxu0  ;;  %v3409_v3 = vpop.f32.mrb[153].mxu1 }
 0x21c   :  { %v5667_v1 = vld [vmem:[#allocation20_spill] sm:$0xff] }
 0x21d   :  { %v2291_v32 = vmax.f32 %v2242_v34, 0.0  ;;  %v2187_v37 = vmax.f32 %v1632_v0, %v2051_v58  ;;  %v5666_v0 = vld [vmem:[#allocation19_spill] sm:$0xff] }
 0x21e   :  { %v1501_v18 = vpop.f32.mrb[154].mxu0  ;;  %v2056_v62 = vpop.f32.mrb[154].mxu1  ;;  %v5668_v3 = vmax.f32 %v5666_v0, %v5667_v1 }
 0x21f   :  { %2341 = vst.msk [vmem:[%s5515_s6 + $0xd0] sm:$0xff] %vm2314_vm5, %v2291_v32  ;;  %v2243_v4 = vadd.f32 %v5118_v59, %v2187_v37  ;;  %v1633_v21 = vmax.f32 %v5653_v10, %v1501_v18  ;;  %v3245_v42 = vpop.f32.mrb[155].mxu0  ;;  %v3412_v30 = vpop.f32.mrb[155].mxu1 }
 0x220   :  { %v5670_v42 = vld [vmem:[#allocation22_spill] sm:$0xff] }
 0x221   :  { %v2292_v20 = vmax.f32 %v2243_v4, 0.0  ;;  %v2188_v43 = vmax.f32 %v1633_v21, %v2056_v62  ;;  %v5669_v21 = vld [vmem:[#allocation21_spill] sm:$0xff] }
 0x222   :  { %v1506_v13 = vpop.f32.mrb[156].mxu0  ;;  %v2061_v23 = vpop.f32.mrb[156].mxu1  ;;  %v5671_v30 = vmax.f32 %v5669_v21, %v5670_v42 }
 0x223   :  { %2342 = vst.msk [vmem:[%s5515_s6 + $0xd8] sm:$0xff] %vm2314_vm5, %v2292_v20  ;;  %v2244_v25 = vadd.f32 %v5118_v59, %v2188_v43  ;;  %v1634_v61 = vmax.f32 %v5656_v19, %v1506_v13  ;;  %v3248_v33 = vpop.f32.mrb[157].mxu0  ;;  %v3415_v7 = vpop.f32.mrb[157].mxu1 }
 0x224   :  { %v5673_v33 = vld [vmem:[#allocation24_spill] sm:$0xff] }
 0x225   :  { %v2293_v8 = vmax.f32 %v2244_v25, 0.0  ;;  %v2189_v31 = vmax.f32 %v1634_v61, %v2061_v23  ;;  %v5672_v61 = vld [vmem:[#allocation23_spill] sm:$0xff] }
 0x226   :  { %v1511_v52 = vpop.f32.mrb[158].mxu0  ;;  %v2066_v46 = vpop.f32.mrb[158].mxu1  ;;  %v5674_v7 = vmax.f32 %v5672_v61, %v5673_v33 }
 0x227   :  { %2343 = vst.msk [vmem:[%s5515_s6 + $0xe0] sm:$0xff] %vm2314_vm5, %v2293_v8  ;;  %v2245_v47 = vadd.f32 %v5118_v59, %v2189_v31  ;;  %v1635_v55 = vmax.f32 %v5659_v60, %v1511_v52  ;;  %v3251_v27 = vpop.f32.mrb[159].mxu0  ;;  %v3418_v49 = vpop.f32.mrb[159].mxu1 }
 0x228   :  { %v5676_v27 = vld [vmem:[#allocation26_spill] sm:$0xff] }
 0x229   :  { %v2294_v50 = vmax.f32 %v2245_v47, 0.0  ;;  %v2190_v45 = vmax.f32 %v1635_v55, %v2066_v46  ;;  %v5675_v55 = vld [vmem:[#allocation25_spill] sm:$0xff] }
 0x22a   :  { %v1516_v28 = vpop.f32.mrb[160].mxu0  ;;  %v2071_v9 = vpop.f32.mrb[160].mxu1  ;;  %v5677_v49 = vmax.f32 %v5675_v55, %v5676_v27 }
 0x22b   :  { %2344 = vst.msk [vmem:[%s5515_s6 + $0xe8] sm:$0xff] %vm2314_vm5, %v2294_v50  ;;  %v2246_v12 = vadd.f32 %v5118_v59, %v2190_v45  ;;  %v1636_v2 = vmax.f32 %v5662_v54, %v1516_v28  ;;  %v3254_v39 = vpop.f32.mrb[161].mxu0  ;;  %v3421_v40 = vpop.f32.mrb[161].mxu1 }
 0x22c   :  { %v5679_v39 = vld [vmem:[#allocation28_spill] sm:$0xff] }
 0x22d   :  { %v2295_v24 = vmax.f32 %v2246_v12, 0.0  ;;  %v2191_v6 = vmax.f32 %v1636_v2, %v2071_v9  ;;  %v5678_v2 = vld [vmem:[#allocation27_spill] sm:$0xff] }
 0x22e   :  { %v1521_v41 = vpop.f32.mrb[162].mxu0  ;;  %v2076_v48 = vpop.f32.mrb[162].mxu1  ;;  %v5680_v40 = vmax.f32 %v5678_v2, %v5679_v39 }
 0x22f   :  { %2345 = vst.msk [vmem:[%s5515_s6 + $0xf0] sm:$0xff] %vm2314_vm5, %v2295_v24  ;;  %v2247_v56 = vadd.f32 %v5118_v59, %v2191_v6  ;;  %v1637_v38 = vmax.f32 %v5665_v15, %v1521_v41  ;;  %v3257_v51 = vpop.f32.mrb[163].mxu0  ;;  %v3424_v53 = vpop.f32.mrb[163].mxu1 }
 0x230   :  { %v5682_v51 = vld [vmem:[#allocation30_spill] sm:$0xff] }
 0x231   :  { %v2296_v58 = vmax.f32 %v2247_v56, 0.0  ;;  %v2192_v34 = vmax.f32 %v1637_v38, %v2076_v48  ;;  %v5681_v38 = vld [vmem:[#allocation29_spill] sm:$0xff] }
 0x232   :  { %v1526_v35 = vpop.f32.mrb[164].mxu0  ;;  %v2081_v36 = vpop.f32.mrb[164].mxu1  ;;  %v5683_v53 = vmax.f32 %v5681_v38, %v5682_v51 }
 0x233   :  { %2346 = vst.msk [vmem:[%s5515_s6 + $0xf8] sm:$0xff] %vm2314_vm5, %v2296_v58  ;;  %v2248_v63 = vadd.f32 %v5118_v59, %v2192_v34  ;;  %v1638_v32 = vmax.f32 %v5668_v3, %v1526_v35  ;;  %v3260_v37 = vpop.f32.mrb[165].mxu0  ;;  %v3427_v18 = vpop.f32.mrb[165].mxu1 }
 0x234   :  { %v5685_v37 = vld [vmem:[#allocation32_spill] sm:$0xff] }
 0x235   :  { %v2297_v62 = vmax.f32 %v2248_v63, 0.0  ;;  %v2193_v4 = vmax.f32 %v1638_v32, %v2081_v36  ;;  %v5684_v32 = vld [vmem:[#allocation31_spill] sm:$0xff] }
 0x236   :  { %v1531_v17 = vpop.f32.mrb[166].mxu0  ;;  %v2086_v5 = vpop.f32.mrb[166].mxu1  ;;  %v5686_v18 = vmax.f32 %v5684_v32, %v5685_v37 }
 0x237   :  { %2347 = vst.msk [vmem:[%s5515_s6 + $0x100] sm:$0xff] %vm2314_vm5, %v2297_v62  ;;  %v2249_v10 = vadd.f32 %v5118_v59, %v2193_v4  ;;  %v1639_v20 = vmax.f32 %v5671_v30, %v1531_v17  ;;  %v3263_v43 = vpop.f32.mrb[167].mxu0  ;;  %v3430_v13 = vpop.f32.mrb[167].mxu1 }
 0x238   :  { %v5688_v43 = vld [vmem:[#allocation34_spill] sm:$0xff] }
 0x239   :  { %v2298_v23 = vmax.f32 %v2249_v10, 0.0  ;;  %v2194_v25 = vmax.f32 %v1639_v20, %v2086_v5  ;;  %v5687_v20 = vld [vmem:[#allocation33_spill] sm:$0xff] }
 0x23a   :  { %v1536_v16 = vpop.f32.mrb[168].mxu0  ;;  %v2091_v22 = vpop.f32.mrb[168].mxu1  ;;  %v5689_v13 = vmax.f32 %v5687_v20, %v5688_v43 }
 0x23b   :  { %2348 = vst.msk [vmem:[%s5515_s6 + $0x108] sm:$0xff] %vm2314_vm5, %v2298_v23  ;;  %v2250_v19 = vadd.f32 %v5118_v59, %v2194_v25  ;;  %v1640_v8 = vmax.f32 %v5674_v7, %v1536_v16  ;;  %v3266_v31 = vpop.f32.mrb[169].mxu0  ;;  %v3433_v52 = vpop.f32.mrb[169].mxu1 }
 0x23c   :  { %v5691_v31 = vld [vmem:[#allocation36_spill] sm:$0xff] }
 0x23d   :  { %v2299_v46 = vmax.f32 %v2250_v19, 0.0  ;;  %v2195_v47 = vmax.f32 %v1640_v8, %v2091_v22  ;;  %v5690_v8 = vld [vmem:[#allocation35_spill] sm:$0xff] }
 0x23e   :  { %v1541_v44 = vpop.f32.mrb[170].mxu0  ;;  %v2096_v26 = vpop.f32.mrb[170].mxu1  ;;  %v5692_v52 = vmax.f32 %v5690_v8, %v5691_v31 }
 0x23f   :  { %2349 = vst.msk [vmem:[%s5515_s6 + $0x110] sm:$0xff] %vm2314_vm5, %v2299_v46  ;;  %v2251_v60 = vadd.f32 %v5118_v59, %v2195_v47  ;;  %v1641_v50 = vmax.f32 %v5677_v49, %v1541_v44  ;;  %v3269_v45 = vpop.f32.mrb[171].mxu0  ;;  %v3436_v28 = vpop.f32.mrb[171].mxu1 }
 0x240   :  { %v5694_v45 = vld [vmem:[#allocation38_spill] sm:$0xff] }
 0x241   :  { %v2300_v9 = vmax.f32 %v2251_v60, 0.0  ;;  %v2196_v12 = vmax.f32 %v1641_v50, %v2096_v26  ;;  %v5693_v50 = vld [vmem:[#allocation37_spill] sm:$0xff] }
 0x242   :  { %v1546_v29 = vpop.f32.mrb[172].mxu0  ;;  %v2101_v11 = vpop.f32.mrb[172].mxu1  ;;  %v5695_v28 = vmax.f32 %v5693_v50, %v5694_v45 }
 0x243   :  { %2350 = vst.msk [vmem:[%s5515_s6 + $0x118] sm:$0xff] %vm2314_vm5, %v2300_v9  ;;  %v2252_v54 = vadd.f32 %v5118_v59, %v2196_v12  ;;  %v1642_v24 = vmax.f32 %v5680_v40, %v1546_v29  ;;  %v3272_v6 = vpop.f32.mrb[173].mxu0  ;;  %v3439_v41 = vpop.f32.mrb[173].mxu1 }
 0x244   :  { %v5697_v6 = vld [vmem:[#allocation40_spill] sm:$0xff] }
 0x245   :  { %v2301_v48 = vmax.f32 %v2252_v54, 0.0  ;;  %v2197_v56 = vmax.f32 %v1642_v24, %v2101_v11  ;;  %v5696_v24 = vld [vmem:[#allocation39_spill] sm:$0xff] }
 0x246   :  { %v1551_v57 = vpop.f32.mrb[174].mxu0  ;;  %v2106_v14 = vpop.f32.mrb[174].mxu1  ;;  %v5698_v41 = vmax.f32 %v5696_v24, %v5697_v6 }
 0x247   :  { %2351 = vst.msk [vmem:[%s5515_s6 + $0x120] sm:$0xff] %vm2314_vm5, %v2301_v48  ;;  %v2253_v15 = vadd.f32 %v5118_v59, %v2197_v56  ;;  %v1643_v58 = vmax.f32 %v5683_v53, %v1551_v57  ;;  %v3275_v34 = vpop.f32.mrb[175].mxu0  ;;  %v3442_v35 = vpop.f32.mrb[175].mxu1 }
 0x248   :  { %v5700_v34 = vld [vmem:[#allocation42_spill] sm:$0xff] }
 0x249   :  { %v2302_v36 = vmax.f32 %v2253_v15, 0.0  ;;  %v2198_v63 = vmax.f32 %v1643_v58, %v2106_v14  ;;  %v5699_v58 = vld [vmem:[#allocation41_spill] sm:$0xff] }
 0x24a   :  { %v1556_v0 = vpop.f32.mrb[176].mxu0  ;;  %v2111_v1 = vpop.f32.mrb[176].mxu1  ;;  %v5701_v35 = vmax.f32 %v5699_v58, %v5700_v34 }
 0x24b   :  { %2352 = vst.msk [vmem:[%s5515_s6 + $0x128] sm:$0xff] %vm2314_vm5, %v2302_v36  ;;  %v2254_v3 = vadd.f32 %v5118_v59, %v2198_v63  ;;  %v1644_v62 = vmax.f32 %v5686_v18, %v1556_v0  ;;  %v3278_v4 = vpop.f32.mrb[177].mxu0  ;;  %v3445_v17 = vpop.f32.mrb[177].mxu1 }
 0x24c   :  { %v5703_v4 = vld [vmem:[#allocation44_spill] sm:$0xff] }
 0x24d   :  { %v2303_v5 = vmax.f32 %v2254_v3, 0.0  ;;  %v2199_v10 = vmax.f32 %v1644_v62, %v2111_v1  ;;  %v5702_v62 = vld [vmem:[#allocation43_spill] sm:$0xff] }
 0x24e   :  { %v1561_v21 = vpop.f32.mrb[178].mxu0  ;;  %v2116_v42 = vpop.f32.mrb[178].mxu1  ;;  %v5704_v17 = vmax.f32 %v5702_v62, %v5703_v4 }
 0x24f   :  { %2353 = vst.msk [vmem:[%s5515_s6 + $0x130] sm:$0xff] %vm2314_vm5, %v2303_v5  ;;  %v2255_v30 = vadd.f32 %v5118_v59, %v2199_v10  ;;  %v1645_v23 = vmax.f32 %v5689_v13, %v1561_v21  ;;  %v3281_v25 = vpop.f32.mrb[179].mxu0  ;;  %v3448_v16 = vpop.f32.mrb[179].mxu1 }
 0x250   :  { %v5706_v25 = vld [vmem:[#allocation46_spill] sm:$0xff] }
 0x251   :  { %v2304_v22 = vmax.f32 %v2255_v30, 0.0  ;;  %v2200_v19 = vmax.f32 %v1645_v23, %v2116_v42  ;;  %v5705_v23 = vld [vmem:[#allocation45_spill] sm:$0xff] }
 0x252   :  { %v1566_v61 = vpop.f32.mrb[180].mxu0  ;;  %v2121_v33 = vpop.f32.mrb[180].mxu1  ;;  %v5707_v16 = vmax.f32 %v5705_v23, %v5706_v25 }
 0x253   :  { %2354 = vst.msk [vmem:[%s5515_s6 + $0x138] sm:$0xff] %vm2314_vm5, %v2304_v22  ;;  %v2256_v7 = vadd.f32 %v5118_v59, %v2200_v19  ;;  %v1646_v46 = vmax.f32 %v5692_v52, %v1566_v61  ;;  %v3284_v47 = vpop.f32.mrb[181].mxu0  ;;  %v3451_v44 = vpop.f32.mrb[181].mxu1 }
 0x254   :  { %v5709_v47 = vld [vmem:[#allocation48_spill] sm:$0xff] }
 0x255   :  { %v2305_v26 = vmax.f32 %v2256_v7, 0.0  ;;  %v2201_v60 = vmax.f32 %v1646_v46, %v2121_v33  ;;  %v5708_v46 = vld [vmem:[#allocation47_spill] sm:$0xff] }
 0x256   :  { %v1571_v55 = vpop.f32.mrb[182].mxu0  ;;  %v2126_v27 = vpop.f32.mrb[182].mxu1  ;;  %v5710_v44 = vmax.f32 %v5708_v46, %v5709_v47 }
 0x257   :  { %2355 = vst.msk [vmem:[%s5515_s6 + $0x140] sm:$0xff] %vm2314_vm5, %v2305_v26  ;;  %v2257_v49 = vadd.f32 %v5118_v59, %v2201_v60  ;;  %v1647_v9 = vmax.f32 %v5695_v28, %v1571_v55  ;;  %v3287_v12 = vpop.f32.mrb[183].mxu0  ;;  %v3454_v29 = vpop.f32.mrb[183].mxu1 }
 0x258   :  { %v5712_v12 = vld [vmem:[#allocation50_spill] sm:$0xff] }
 0x259   :  { %v2306_v11 = vmax.f32 %v2257_v49, 0.0  ;;  %v2202_v54 = vmax.f32 %v1647_v9, %v2126_v27  ;;  %v5711_v9 = vld [vmem:[#allocation49_spill] sm:$0xff] }
 0x25a   :  { %v1576_v2 = vpop.f32.mrb[184].mxu0  ;;  %v2131_v39 = vpop.f32.mrb[184].mxu1  ;;  %v5713_v29 = vmax.f32 %v5711_v9, %v5712_v12 }
 0x25b   :  { %2356 = vst.msk [vmem:[%s5515_s6 + $0x148] sm:$0xff] %vm2314_vm5, %v2306_v11  ;;  %v2258_v40 = vadd.f32 %v5118_v59, %v2202_v54  ;;  %v1648_v48 = vmax.f32 %v5698_v41, %v1576_v2  ;;  %v3290_v56 = vpop.f32.mrb[185].mxu0  ;;  %v3457_v57 = vpop.f32.mrb[185].mxu1 }
 0x25d   :  { %v2307_v14 = vmax.f32 %v2258_v40, 0.0  ;;  %v2203_v15 = vmax.f32 %v1648_v48, %v2131_v39 }
 0x25e   :  { %v1581_v38 = vpop.f32.mrb[186].mxu0  ;;  %v2136_v51 = vpop.f32.mrb[186].mxu1 }
 0x25f   :  { %2357 = vst.msk [vmem:[%s5515_s6 + $0x150] sm:$0xff] %vm2314_vm5, %v2307_v14  ;;  %v2259_v53 = vadd.f32 %v5118_v59, %v2203_v15  ;;  %v1649_v36 = vmax.f32 %v5701_v35, %v1581_v38  ;;  %v3293_v63 = vpop.f32.mrb[187].mxu0  ;;  %v3460_v0 = vpop.f32.mrb[187].mxu1 }
 0x261   :  { %v2308_v1 = vmax.f32 %v2259_v53, 0.0  ;;  %v2204_v3 = vmax.f32 %v1649_v36, %v2136_v51 }
 0x262   :  { %v1586_v32 = vpop.f32.mrb[188].mxu0  ;;  %v2141_v37 = vpop.f32.mrb[188].mxu1 }
 0x263   :  { %2358 = vst.msk [vmem:[%s5515_s6 + $0x158] sm:$0xff] %vm2314_vm5, %v2308_v1  ;;  %v2260_v18 = vadd.f32 %v5118_v59, %v2204_v3  ;;  %v1650_v5 = vmax.f32 %v5704_v17, %v1586_v32  ;;  %v3296_v10 = vpop.f32.mrb[189].mxu0  ;;  %v3463_v21 = vpop.f32.mrb[189].mxu1 }
 0x265   :  { %v2309_v42 = vmax.f32 %v2260_v18, 0.0  ;;  %v2205_v30 = vmax.f32 %v1650_v5, %v2141_v37 }
 0x266   :  { %v1591_v20 = vpop.f32.mrb[190].mxu0  ;;  %v2146_v43 = vpop.f32.mrb[190].mxu1 }
 0x267   :  { %2359 = vst.msk [vmem:[%s5515_s6 + $0x160] sm:$0xff] %vm2314_vm5, %v2309_v42  ;;  %v2261_v13 = vadd.f32 %v5118_v59, %v2205_v30  ;;  %v1651_v22 = vmax.f32 %v5707_v16, %v1591_v20  ;;  %v3299_v19 = vpop.f32.mrb[191].mxu0  ;;  %v3466_v61 = vpop.f32.mrb[191].mxu1 }
 0x269   :  { %v2310_v33 = vmax.f32 %v2261_v13, 0.0  ;;  %v2206_v7 = vmax.f32 %v1651_v22, %v2146_v43 }
 0x26a   :  { %v1596_v8 = vpop.f32.mrb[192].mxu0  ;;  %v2151_v31 = vpop.f32.mrb[192].mxu1 }
 0x26b   :  { %2360 = vst.msk [vmem:[%s5515_s6 + $0x168] sm:$0xff] %vm2314_vm5, %v2310_v33  ;;  %v2262_v52 = vadd.f32 %v5118_v59, %v2206_v7  ;;  %v1652_v26 = vmax.f32 %v5710_v44, %v1596_v8  ;;  %v3302_v60 = vpop.f32.mrb[193].mxu0  ;;  %v3469_v55 = vpop.f32.mrb[193].mxu1 }
 0x26d   :  { %v2311_v27 = vmax.f32 %v2262_v52, 0.0  ;;  %v2207_v49 = vmax.f32 %v1652_v26, %v2151_v31 }
 0x26e   :  { %v1601_v50 = vpop.f32.mrb[194].mxu0  ;;  %v2156_v45 = vpop.f32.mrb[194].mxu1 }
 0x26f   :  { %2361 = vst.msk [vmem:[%s5515_s6 + $0x170] sm:$0xff] %vm2314_vm5, %v2311_v27  ;;  %v2263_v28 = vadd.f32 %v5118_v59, %v2207_v49  ;;  %v1653_v11 = vmax.f32 %v5713_v29, %v1601_v50  ;;  %v3305_v54 = vpop.f32.mrb[195].mxu0  ;;  %v3472_v2 = vpop.f32.mrb[195].mxu1 }
 0x271   :  { %v2312_v39 = vmax.f32 %v2263_v28, 0.0  ;;  %v2208_v40 = vmax.f32 %v1653_v11, %v2156_v45 }
 0x273   :  { %2362 = vst.msk [vmem:[%s5515_s6 + $0x178] sm:$0xff] %vm2314_vm5, %v2312_v39  ;;  %v2264_v24 = vadd.f32 %v5118_v59, %v2208_v40 }
 0x275   :  { %v2313_v6 = vmax.f32 %v2264_v24, 0.0 }
 0x277   :  { %2363 = vst.msk [vmem:[%s5515_s6 + $0x180] sm:$0xff] %vm2314_vm5, %v2313_v6 }

// kernel: forward.4
= control target key start
LH: loop header
LB: loop body
LE: loop exit
PB: predicated region body
PF: predicated region fallthrough
CT: control target
= control target key end

     0   :  { %v785_v0 = vmov 0.0|0.0   ;;  %vm56_vm0 = vcmask 179200   ;;  %v786_v30 = vmov 0.0   ;;  %vm78_vm1 = vcmask 1045504   ;;  %s1212_s4 = inlined_call_operand.vmem [shape: f32[150,16], index: 4, kind: input, shape index: {}]   ;;  %s1213_s0 = inlined_call_operand.vmem [shape: f32[50,150], index: 0, kind: input, shape index: {}]   ;;  %s1214_s1 = inlined_call_operand.vmem [shape: f32[50,150], index: 1, kind: input, shape index: {}]   ;;  %s1215_s2 = inlined_call_operand.vmem [shape: f32[50,150], index: 2, kind: input, shape index: {}]   ;;  %s1216_s3 = inlined_call_operand.vmem [shape: f32[50,150], index: 3, kind: input, shape index: {}]   ;;  %s1217_s5 = inlined_call_operand.vmem [shape: f32[1,16], index: 5, kind: input, shape index: {}]   ;;  %s1218_s6 = inlined_call_operand.vmem [shape: f32[50,16], index: 6, kind: output, shape index: {}]  }
   0x1   :  { %675 = vmatprep.subr.bf16.mxu0 %v785_v0  ;;  %v23_v1 = vld [vmem:[%s1212_s4] sm:$0xff]  ;;  %v24_v2 = vld [vmem:[%s1212_s4 + $0x8] sm:$0xff]  ;;  %702 = vmatprep.subr.bf16.mxu1 %v785_v0  ;;  %v25_v3 = vld [vmem:[%s1212_s4 + $0x10] sm:$0xff]  ;;  %vm629_vm2 = vcmask 130048   ;;  %vm636_vm3 = vcmask 123904  }
   0x2   :  { %v833_v4 = vpack.c.bf16 %v24_v2, %v23_v1  ;;  %v26_v5 = vld [vmem:[%s1212_s4 + $0x18] sm:$0xff]  ;;  %v27_v7 = vld [vmem:[%s1212_s4 + $0x20] sm:$0xff]  ;;  %v28_v8 = vld [vmem:[%s1212_s4 + $0x28] sm:$0xff] }
   0x3   :  { %v840_v6 = vpack.c.bf16 %v26_v5, %v25_v3  ;;  %v43_v9 = vld [vmem:[%s1213_s0 + $0x8] sm:$0xff]  ;;  %v855_v10 = vpack.c.bf16 %v28_v8, %v27_v7  ;;  %v29_v12 = vld [vmem:[%s1212_s4 + $0x30] sm:$0xff]  ;;  %v30_v13 = vld [vmem:[%s1212_s4 + $0x38] sm:$0xff] }
   0x4   :  { %677 = vmatpush1.bf16.msra.mxu0 %v833_v4  ;;  %704 = vmatpush1.bf16.msra.mxu1 %v833_v4  ;;  %v183_v11 = vld [vmem:[%s1214_s1 + $0x8] sm:$0xff]  ;;  %v872_v14 = vpack.c.bf16 %v30_v13, %v29_v12  ;;  %v31_v15 = vld [vmem:[%s1212_s4 + $0x40] sm:$0xff]  ;;  %v33_v18 = vld [vmem:[%s1212_s4 + $0x50] sm:$0xff] }
   0x5   :  { %678 = vmatprep.subr.bf16.mxu0 %v785_v0  ;;  %705 = vmatprep.subr.bf16.mxu1 %v785_v0  ;;  %v32_v16 = vld [vmem:[%s1212_s4 + $0x48] sm:$0xff]  ;;  %v34_v19 = vld [vmem:[%s1212_s4 + $0x58] sm:$0xff]  ;;  %v35_v21 = vld [vmem:[%s1212_s4 + $0x60] sm:$0xff] }
   0x6   :  { %643 = vmatprep.mubr.msk.f32.mxu0 %vm56_vm0, %v43_v9  ;;  %651 = vmatprep.mubr.msk.f32.mxu1 %vm56_vm0, %v183_v11  ;;  %v884_v17 = vpack.c.bf16 %v32_v16, %v31_v15  ;;  %v896_v20 = vpack.c.bf16 %v34_v19, %v33_v18  ;;  %v36_v22 = vld [vmem:[%s1212_s4 + $0x68] sm:$0xff]  ;;  %v37_v24 = vld [vmem:[%s1212_s4 + $0x70] sm:$0xff]  ;;  %v38_v25 = vld [vmem:[%s1212_s4 + $0x78] sm:$0xff] }
   0x7   :  { %v908_v23 = vpack.c.bf16 %v36_v22, %v35_v21  ;;  %v920_v26 = vpack.c.bf16 %v38_v25, %v37_v24  ;;  %v39_v27 = vld [vmem:[%s1212_s4 + $0x80] sm:$0xff]  ;;  %v40_v28 = vld [vmem:[%s1212_s4 + $0x88] sm:$0xff]  ;;  %v942_v31 = vld [vmem:[%s1212_s4 + $0x90] sm:$0x3f] }
   0x8   :  { %680 = vmatpush1.bf16.msra.mxu0 %v840_v6  ;;  %707 = vmatpush1.bf16.msra.mxu1 %v840_v6  ;;  %v932_v29 = vpack.c.bf16 %v40_v28, %v39_v27  ;;  %v42_v32 = vld [vmem:[%s1213_s0] sm:$0xff]  ;;  %v45_v34 = vld [vmem:[%s1213_s0 + $0x18] sm:$0xff]  ;;  %v44_v35 = vld [vmem:[%s1213_s0 + $0x10] sm:$0xff] }
   0x9   :  { %681 = vmatprep.subr.bf16.mxu0 %v785_v0  ;;  %708 = vmatprep.subr.bf16.mxu1 %v785_v0  ;;  %v182_v33 = vld [vmem:[%s1214_s1] sm:$0xff]  ;;  %v185_v36 = vld [vmem:[%s1214_s1 + $0x18] sm:$0xff]  ;;  %v184_v37 = vld [vmem:[%s1214_s1 + $0x10] sm:$0xff] }
   0xa   :  { %v47_v38 = vld [vmem:[%s1213_s0 + $0x28] sm:$0xff]  ;;  %v46_v39 = vld [vmem:[%s1213_s0 + $0x20] sm:$0xff]  ;;  %v49_v42 = vld [vmem:[%s1213_s0 + $0x38] sm:$0xff] }
   0xb   :  { %v187_v40 = vld [vmem:[%s1214_s1 + $0x28] sm:$0xff]  ;;  %v186_v41 = vld [vmem:[%s1214_s1 + $0x20] sm:$0xff]  ;;  %v48_v43 = vld [vmem:[%s1213_s0 + $0x30] sm:$0xff] }
   0xc   :  { %683 = vmatpush1.bf16.msra.mxu0 %v855_v10  ;;  %710 = vmatpush1.bf16.msra.mxu1 %v855_v10  ;;  %v189_v44 = vld [vmem:[%s1214_s1 + $0x38] sm:$0xff]  ;;  %v188_v45 = vld [vmem:[%s1214_s1 + $0x30] sm:$0xff]  ;;  %v51_v46 = vld [vmem:[%s1213_s0 + $0x48] sm:$0xff] }
   0xd   :  { %684 = vmatprep.subr.bf16.mxu0 %v785_v0  ;;  %711 = vmatprep.subr.bf16.mxu1 %v785_v0  ;;  %v50_v47 = vld [vmem:[%s1213_s0 + $0x40] sm:$0xff]  ;;  %v191_v48 = vld [vmem:[%s1214_s1 + $0x48] sm:$0xff]  ;;  %v53_v50 = vld [vmem:[%s1213_s0 + $0x58] sm:$0xff] }
   0xe   :  { %v190_v49 = vld [vmem:[%s1214_s1 + $0x40] sm:$0xff]  ;;  %v52_v51 = vld [vmem:[%s1213_s0 + $0x50] sm:$0xff]  ;;  %v193_v52 = vld [vmem:[%s1214_s1 + $0x58] sm:$0xff] }
   0xf   :  { %v192_v53 = vld [vmem:[%s1214_s1 + $0x50] sm:$0xff]  ;;  %v55_v54 = vld [vmem:[%s1213_s0 + $0x68] sm:$0x3]  ;;  %v54_v55 = vld [vmem:[%s1213_s0 + $0x60] sm:$0x3] }
  0x10   :  { %686 = vmatpush1.bf16.msra.mxu0 %v872_v14  ;;  %713 = vmatpush1.bf16.msra.mxu1 %v872_v14  ;;  %v195_v56 = vld [vmem:[%s1214_s1 + $0x68] sm:$0x3]  ;;  %v194_v57 = vld [vmem:[%s1214_s1 + $0x60] sm:$0x3]  ;;  %v327_v61 = vld [vmem:[%s1215_s2 + $0x18] sm:$0xff] }
  0x11   :  { %687 = vmatprep.subr.bf16.mxu0 %v785_v0  ;;  %714 = vmatprep.subr.bf16.mxu1 %v785_v0  ;;  %v325_v58 = vld [vmem:[%s1215_s2 + $0x8] sm:$0xff]  ;;  %v324_v60 = vld [vmem:[%s1215_s2] sm:$0xff]  ;;  %v469_v63 = vld [vmem:[%s1216_s3 + $0x18] sm:$0xff] }
  0x12   :  { %v467_v59 = vld [vmem:[%s1216_s3 + $0x8] sm:$0xff]  ;;  %v466_v62 = vld [vmem:[%s1216_s3] sm:$0xff]  ;;  %v468_v2 = vld [vmem:[%s1216_s3 + $0x10] sm:$0xff] }
  0x13   :  { %v329_v1 = vld [vmem:[%s1215_s2 + $0x28] sm:$0xff]  ;;  %v331_v5 = vld [vmem:[%s1215_s2 + $0x38] sm:$0xff]  ;;  %v330_v8 = vld [vmem:[%s1215_s2 + $0x30] sm:$0xff] }
  0x14   :  { %689 = vmatpush1.bf16.msra.mxu0 %v884_v17  ;;  %716 = vmatpush1.bf16.msra.mxu1 %v884_v17  ;;  %v471_v3 = vld [vmem:[%s1216_s3 + $0x28] sm:$0xff]  ;;  %v473_v7 = vld [vmem:[%s1216_s3 + $0x38] sm:$0xff]  ;;  %v332_v12 = vld [vmem:[%s1215_s2 + $0x40] sm:$0xff] }
  0x15   :  { %690 = vmatprep.subr.bf16.mxu0 %v785_v0  ;;  %717 = vmatprep.subr.bf16.mxu1 %v785_v0  ;;  %v333_v9 = vld [vmem:[%s1215_s2 + $0x48] sm:$0xff]  ;;  %v335_v13 = vld [vmem:[%s1215_s2 + $0x58] sm:$0xff]  ;;  %v334_v16 = vld [vmem:[%s1215_s2 + $0x50] sm:$0xff] }
  0x16   :  { %v475_v11 = vld [vmem:[%s1216_s3 + $0x48] sm:$0xff]  ;;  %v477_v15 = vld [vmem:[%s1216_s3 + $0x58] sm:$0xff]  ;;  %v476_v18 = vld [vmem:[%s1216_s3 + $0x50] sm:$0xff] }
  0x17   :  { %v479_v19 = vld [vmem:[%s1216_s3 + $0x68] sm:$0x3]  ;;  %v478_v21 = vld [vmem:[%s1216_s3 + $0x60] sm:$0x3] }
  0x18   :  { %692 = vmatpush1.bf16.msra.mxu0 %v896_v20  ;;  %719 = vmatpush1.bf16.msra.mxu1 %v896_v20 }
  0x19   :  { %693 = vmatprep.subr.bf16.mxu0 %v785_v0  ;;  %720 = vmatprep.subr.bf16.mxu1 %v785_v0 }
  0x1c   :  { %695 = vmatpush1.bf16.msra.mxu0 %v908_v23  ;;  %722 = vmatpush1.bf16.msra.mxu1 %v908_v23 }
  0x1d   :  { %696 = vmatprep.subr.bf16.mxu0 %v785_v0  ;;  %723 = vmatprep.subr.bf16.mxu1 %v785_v0 }
  0x20   :  { %698 = vmatpush1.bf16.msra.mxu0 %v920_v26  ;;  %725 = vmatpush1.bf16.msra.mxu1 %v920_v26 }
  0x21   :  { %699 = vmatprep.subr.bf16.mxu0 %v785_v0  ;;  %726 = vmatprep.subr.bf16.mxu1 %v785_v0 }
  0x24   :  { %701 = vmatpush1.bf16.msra.mxu0 %v932_v29  ;;  %728 = vmatpush1.bf16.msra.mxu1 %v932_v29 }
  0x25   :  { %118 = vmatprep.subr.mxu0 %v786_v30  ;;  %253 = vmatprep.subr.mxu1 %v786_v30 }
  0x28   :  { %642 = vmatpush1.msk.msra.mxu0 %vm78_vm1, %v942_v31  ;;  %650 = vmatpush1.msk.msra.mxu1 %vm78_vm1, %v942_v31 }
  0x29   :  { %147 = vmatmul.mubr.f32.vlgmr.msra.gmra.mrb[0].mxu0 %v42_v32  ;;  %729 = vmatprep.subr.bf16.mxu0 %v785_v0 }
  0x2a   :  { %282 = vmatmul.mubr.f32.vlgmr.msra.gmra.mrb[0].mxu1 %v182_v33  ;;  %731 = vmatpush1.bf16.msra.mxu0 %v833_v4 }
  0x2b   :  { %756 = vmatprep.subr.bf16.mxu1 %v785_v0  ;;  %732 = vmatprep.subr.bf16.mxu0 %v785_v0 }
  0x2c   :  { %758 = vmatpush1.bf16.msra.mxu1 %v833_v4  ;;  %644 = vmatprep.mubr.msk.f32.mxu0 %vm56_vm0, %v45_v34  ;;  %v328_v4 = vld [vmem:[%s1215_s2 + $0x20] sm:$0xff] }
  0x2d   :  { %759 = vmatprep.subr.bf16.mxu1 %v785_v0  ;;  %152 = vmatmul.mubr.f32.gmra.mrb[2].mxu0 %v44_v35 }
  0x2e   :  { %734 = vmatpush1.bf16.msra.mxu0 %v840_v6  ;;  %652 = vmatprep.mubr.msk.f32.mxu1 %vm56_vm0, %v185_v36 }
  0x2f   :  { %735 = vmatprep.subr.bf16.mxu0 %v785_v0  ;;  %287 = vmatmul.mubr.f32.gmra.mrb[2].mxu1 %v184_v37 }
  0x30   :  { %761 = vmatpush1.bf16.msra.mxu1 %v840_v6  ;;  %645 = vmatprep.mubr.msk.f32.mxu0 %vm56_vm0, %v47_v38  ;;  %v470_v6 = vld [vmem:[%s1216_s3 + $0x20] sm:$0xff] }
  0x31   :  { %762 = vmatprep.subr.bf16.mxu1 %v785_v0  ;;  %157 = vmatmul.mubr.f32.gmra.mrb[4].mxu0 %v46_v39 }
  0x32   :  { %737 = vmatpush1.bf16.msra.mxu0 %v855_v10  ;;  %653 = vmatprep.mubr.msk.f32.mxu1 %vm56_vm0, %v187_v40 }
  0x33   :  { %738 = vmatprep.subr.bf16.mxu0 %v785_v0  ;;  %292 = vmatmul.mubr.f32.gmra.mrb[4].mxu1 %v186_v41 }
  0x34   :  { %764 = vmatpush1.bf16.msra.mxu1 %v855_v10  ;;  %646 = vmatprep.mubr.msk.f32.mxu0 %vm56_vm0, %v49_v42  ;;  %v472_v10 = vld [vmem:[%s1216_s3 + $0x30] sm:$0xff] }
  0x35   :  { %765 = vmatprep.subr.bf16.mxu1 %v785_v0  ;;  %162 = vmatmul.mubr.f32.gmra.mrb[6].mxu0 %v48_v43 }
  0x36   :  { %740 = vmatpush1.bf16.msra.mxu0 %v872_v14  ;;  %654 = vmatprep.mubr.msk.f32.mxu1 %vm56_vm0, %v189_v44 }
  0x37   :  { %741 = vmatprep.subr.bf16.mxu0 %v785_v0  ;;  %297 = vmatmul.mubr.f32.gmra.mrb[6].mxu1 %v188_v45 }
  0x38   :  { %767 = vmatpush1.bf16.msra.mxu1 %v872_v14  ;;  %647 = vmatprep.mubr.msk.f32.mxu0 %vm56_vm0, %v51_v46  ;;  %v474_v14 = vld [vmem:[%s1216_s3 + $0x40] sm:$0xff] }
  0x39   :  { %768 = vmatprep.subr.bf16.mxu1 %v785_v0  ;;  %167 = vmatmul.mubr.f32.gmra.mrb[8].mxu0 %v50_v47 }
  0x3a   :  { %743 = vmatpush1.bf16.msra.mxu0 %v884_v17  ;;  %655 = vmatprep.mubr.msk.f32.mxu1 %vm56_vm0, %v191_v48 }
  0x3b   :  { %744 = vmatprep.subr.bf16.mxu0 %v785_v0  ;;  %302 = vmatmul.mubr.f32.gmra.mrb[8].mxu1 %v190_v49 }
  0x3c   :  { %770 = vmatpush1.bf16.msra.mxu1 %v884_v17  ;;  %648 = vmatprep.mubr.msk.f32.mxu0 %vm56_vm0, %v53_v50  ;;  %v337_v17 = vld [vmem:[%s1215_s2 + $0x68] sm:$0x3] }
  0x3d   :  { %771 = vmatprep.subr.bf16.mxu1 %v785_v0  ;;  %172 = vmatmul.mubr.f32.gmra.mrb[10].mxu0 %v52_v51 }
  0x3e   :  { %746 = vmatpush1.bf16.msra.mxu0 %v896_v20  ;;  %656 = vmatprep.mubr.msk.f32.mxu1 %vm56_vm0, %v193_v52 }
  0x3f   :  { %747 = vmatprep.subr.bf16.mxu0 %v785_v0  ;;  %307 = vmatmul.mubr.f32.gmra.mrb[10].mxu1 %v192_v53 }
  0x40   :  { %773 = vmatpush1.bf16.msra.mxu1 %v896_v20  ;;  %649 = vmatprep.mubr.msk.f32.mxu0 %vm56_vm0, %v55_v54  ;;  %v336_v20 = vld [vmem:[%s1215_s2 + $0x60] sm:$0x3] }
  0x41   :  { %774 = vmatprep.subr.bf16.mxu1 %v785_v0  ;;  %177 = vmatmul.mubr.f32.gmra.mrb[12].mxu0 %v54_v55 }
  0x42   :  { %749 = vmatpush1.bf16.msra.mxu0 %v908_v23  ;;  %657 = vmatprep.mubr.msk.f32.mxu1 %vm56_vm0, %v195_v56 }
  0x43   :  { %750 = vmatprep.subr.bf16.mxu0 %v785_v0  ;;  %312 = vmatmul.mubr.f32.gmra.mrb[12].mxu1 %v194_v57 }
  0x44   :  { %776 = vmatpush1.bf16.msra.mxu1 %v908_v23  ;;  %659 = vmatprep.mubr.msk.f32.mxu0 %vm56_vm0, %v325_v58 }
  0x45   :  { %777 = vmatprep.subr.bf16.mxu1 %v785_v0  ;;  %667 = vmatprep.mubr.msk.f32.mxu1 %vm56_vm0, %v467_v59 }
  0x46   :  { %752 = vmatpush1.bf16.msra.mxu0 %v920_v26 }
  0x47   :  { %753 = vmatprep.subr.bf16.mxu0 %v785_v0 }
  0x48   :  { %779 = vmatpush1.bf16.msra.mxu1 %v920_v26 }
  0x49   :  { %780 = vmatprep.subr.bf16.mxu1 %v785_v0  ;;  %v326_v0 = vld [vmem:[%s1215_s2 + $0x10] sm:$0xff] }
  0x4a   :  { %755 = vmatpush1.bf16.msra.mxu0 %v932_v29 }
  0x4b   :  { %395 = vmatprep.subr.mxu0 %v786_v30 }
  0x4c   :  { %782 = vmatpush1.bf16.msra.mxu1 %v932_v29 }
  0x4d   :  { %537 = vmatprep.subr.mxu1 %v786_v30 }
  0x4e   :  { %658 = vmatpush1.msk.msra.mxu0 %vm78_vm1, %v942_v31 }
  0x4f   :  { %424 = vmatmul.mubr.f32.vlgmr.msra.gmra.mrb[14].mxu0 %v324_v60 }
  0x50   :  { %666 = vmatpush1.msk.msra.mxu1 %vm78_vm1, %v942_v31  ;;  %660 = vmatprep.mubr.msk.f32.mxu0 %vm56_vm0, %v327_v61  ;;  %v674_v61 = vld [vmem:[%s1217_s5] ss:$0 sm:$0xff] }
  0x51   :  { %566 = vmatmul.mubr.f32.vlgmr.msra.gmra.mrb[14].mxu1 %v466_v62 }
  0x52   :  { %668 = vmatprep.mubr.msk.f32.mxu1 %vm56_vm0, %v469_v63 }
  0x53   :  { %429 = vmatmul.mubr.f32.gmra.mrb[16].mxu0 %v326_v0 }
  0x54   :  { %661 = vmatprep.mubr.msk.f32.mxu0 %vm56_vm0, %v329_v1 }
  0x55   :  { %571 = vmatmul.mubr.f32.gmra.mrb[16].mxu1 %v468_v2 }
  0x56   :  { %669 = vmatprep.mubr.msk.f32.mxu1 %vm56_vm0, %v471_v3 }
  0x57   :  { %434 = vmatmul.mubr.f32.gmra.mrb[18].mxu0 %v328_v4 }
  0x58   :  { %662 = vmatprep.mubr.msk.f32.mxu0 %vm56_vm0, %v331_v5 }
  0x59   :  { %576 = vmatmul.mubr.f32.gmra.mrb[18].mxu1 %v470_v6 }
  0x5a   :  { %670 = vmatprep.mubr.msk.f32.mxu1 %vm56_vm0, %v473_v7 }
  0x5b   :  { %439 = vmatmul.mubr.f32.gmra.mrb[20].mxu0 %v330_v8 }
  0x5c   :  { %663 = vmatprep.mubr.msk.f32.mxu0 %vm56_vm0, %v333_v9 }
  0x5d   :  { %581 = vmatmul.mubr.f32.gmra.mrb[20].mxu1 %v472_v10 }
  0x5e   :  { %671 = vmatprep.mubr.msk.f32.mxu1 %vm56_vm0, %v475_v11 }
  0x5f   :  { %444 = vmatmul.mubr.f32.gmra.mrb[22].mxu0 %v332_v12 }
  0x60   :  { %664 = vmatprep.mubr.msk.f32.mxu0 %vm56_vm0, %v335_v13 }
  0x61   :  { %586 = vmatmul.mubr.f32.gmra.mrb[22].mxu1 %v474_v14 }
  0x62   :  { %672 = vmatprep.mubr.msk.f32.mxu1 %vm56_vm0, %v477_v15 }
  0x63   :  { %449 = vmatmul.mubr.f32.gmra.mrb[24].mxu0 %v334_v16 }
  0x64   :  { %665 = vmatprep.mubr.msk.f32.mxu0 %vm56_vm0, %v337_v17 }
  0x65   :  { %591 = vmatmul.mubr.f32.gmra.mrb[24].mxu1 %v476_v18 }
  0x66   :  { %673 = vmatprep.mubr.msk.f32.mxu1 %vm56_vm0, %v479_v19 }
  0x67   :  { %454 = vmatmul.mubr.f32.gmra.mrb[26].mxu0 %v336_v20 }
  0x69   :  { %596 = vmatmul.mubr.f32.gmra.mrb[26].mxu1 %v478_v21 }
  0xfc   :  { %v148_v22 = vpop.f32.mrb[0].mxu0 }
  0xfd   :  { %v150_v23 = vpop.f32.mrb[1].mxu0  ;;  %v283_v24 = vpop.f32.mrb[0].mxu1 }
  0xfe   :  { %v317_v25 = vmax.f32 %v148_v22, %v283_v24  ;;  %v285_v26 = vpop.f32.mrb[1].mxu1 }
 0x100   :  { %v153_v27 = vpop.f32.mrb[2].mxu0 }
 0x101   :  { %v155_v28 = vpop.f32.mrb[3].mxu0 }
 0x102   :  { %v288_v29 = vpop.f32.mrb[2].mxu1 }
 0x103   :  { %v318_v30 = vmax.f32 %v153_v27, %v288_v29  ;;  %v290_v31 = vpop.f32.mrb[3].mxu1 }
 0x104   :  { %v158_v32 = vpop.f32.mrb[4].mxu0 }
 0x105   :  { %v160_v33 = vpop.f32.mrb[5].mxu0 }
 0x106   :  { %v293_v34 = vpop.f32.mrb[4].mxu1 }
 0x107   :  { %v319_v35 = vmax.f32 %v158_v32, %v293_v34  ;;  %v295_v36 = vpop.f32.mrb[5].mxu1 }
 0x108   :  { %v163_v37 = vpop.f32.mrb[6].mxu0 }
 0x109   :  { %v165_v38 = vpop.f32.mrb[7].mxu0 }
 0x10a   :  { %v298_v39 = vpop.f32.mrb[6].mxu1 }
 0x10b   :  { %v320_v40 = vmax.f32 %v163_v37, %v298_v39  ;;  %v300_v41 = vpop.f32.mrb[7].mxu1 }
 0x10c   :  { %v168_v42 = vpop.f32.mrb[8].mxu0 }
 0x10d   :  { %v170_v43 = vpop.f32.mrb[9].mxu0 }
 0x10e   :  { %v303_v44 = vpop.f32.mrb[8].mxu1 }
 0x10f   :  { %v321_v45 = vmax.f32 %v168_v42, %v303_v44  ;;  %v305_v46 = vpop.f32.mrb[9].mxu1 }
 0x110   :  { %v173_v47 = vpop.f32.mrb[10].mxu0 }
 0x111   :  { %v175_v48 = vpop.f32.mrb[11].mxu0 }
 0x112   :  { %v308_v49 = vpop.f32.mrb[10].mxu1 }
 0x113   :  { %v322_v50 = vmax.f32 %v173_v47, %v308_v49  ;;  %v310_v51 = vpop.f32.mrb[11].mxu1 }
 0x114   :  { %v1179_v52 = vpop.f32.mrb[12].mxu0 }
 0x115   :  { %v180_v53 = vpop.f32.mrb[13].mxu0 }
 0x116   :  { %v313_v54 = vpop.f32.mrb[12].mxu1 }
 0x117   :  { %v323_v55 = vmax.f32 %v1179_v52, %v313_v54  ;;  %v315_v56 = vpop.f32.mrb[13].mxu1 }
 0x122   :  { %v425_v57 = vpop.f32.mrb[14].mxu0 }
 0x123   :  { %v459_v58 = vmax.f32 %v317_v25, %v425_v57  ;;  %v427_v59 = vpop.f32.mrb[15].mxu0 }
 0x124   :  { %v567_v60 = vpop.f32.mrb[14].mxu1 }
 0x125   :  { %v601_v62 = vmax.f32 %v459_v58, %v567_v60  ;;  %v569_v63 = vpop.f32.mrb[15].mxu1 }
 0x126   :  { %v430_v0 = vpop.f32.mrb[16].mxu0 }
 0x127   :  { %v615_v1 = vadd.f32 %v674_v61, %v601_v62  ;;  %v460_v2 = vmax.f32 %v318_v30, %v430_v0  ;;  %v432_v3 = vpop.f32.mrb[17].mxu0 }
 0x128   :  { %v572_v4 = vpop.f32.mrb[16].mxu1 }
 0x129   :  { %v622_v5 = vmax.f32 %v615_v1, 0.0  ;;  %v602_v6 = vmax.f32 %v460_v2, %v572_v4  ;;  %v574_v7 = vpop.f32.mrb[17].mxu1 }
 0x12a   :  { %v435_v8 = vpop.f32.mrb[18].mxu0 }
 0x12b   :  { %630 = vst.msk [vmem:[%s1218_s6] sm:$0xff] %vm629_vm2, %v622_v5  ;;  %v616_v9 = vadd.f32 %v674_v61, %v602_v6  ;;  %v461_v10 = vmax.f32 %v319_v35, %v435_v8  ;;  %v437_v11 = vpop.f32.mrb[19].mxu0 }
 0x12c   :  { %v577_v12 = vpop.f32.mrb[18].mxu1 }
 0x12d   :  { %v623_v13 = vmax.f32 %v616_v9, 0.0  ;;  %v603_v14 = vmax.f32 %v461_v10, %v577_v12  ;;  %v579_v15 = vpop.f32.mrb[19].mxu1 }
 0x12e   :  { %v440_v16 = vpop.f32.mrb[20].mxu0 }
 0x12f   :  { %631 = vst.msk [vmem:[%s1218_s6 + $0x8] sm:$0xff] %vm629_vm2, %v623_v13  ;;  %v617_v17 = vadd.f32 %v674_v61, %v603_v14  ;;  %v462_v18 = vmax.f32 %v320_v40, %v440_v16  ;;  %v442_v19 = vpop.f32.mrb[21].mxu0 }
 0x130   :  { %v582_v20 = vpop.f32.mrb[20].mxu1 }
 0x131   :  { %v624_v21 = vmax.f32 %v617_v17, 0.0  ;;  %v604_v22 = vmax.f32 %v462_v18, %v582_v20  ;;  %v584_v23 = vpop.f32.mrb[21].mxu1 }
 0x132   :  { %v445_v24 = vpop.f32.mrb[22].mxu0 }
 0x133   :  { %632 = vst.msk [vmem:[%s1218_s6 + $0x10] sm:$0xff] %vm629_vm2, %v624_v21  ;;  %v618_v25 = vadd.f32 %v674_v61, %v604_v22  ;;  %v463_v26 = vmax.f32 %v321_v45, %v445_v24  ;;  %v447_v27 = vpop.f32.mrb[23].mxu0 }
 0x134   :  { %v587_v28 = vpop.f32.mrb[22].mxu1 }
 0x135   :  { %v625_v29 = vmax.f32 %v618_v25, 0.0  ;;  %v605_v30 = vmax.f32 %v463_v26, %v587_v28  ;;  %v589_v31 = vpop.f32.mrb[23].mxu1 }
 0x136   :  { %v450_v32 = vpop.f32.mrb[24].mxu0 }
 0x137   :  { %633 = vst.msk [vmem:[%s1218_s6 + $0x18] sm:$0xff] %vm629_vm2, %v625_v29  ;;  %v619_v33 = vadd.f32 %v674_v61, %v605_v30  ;;  %v464_v34 = vmax.f32 %v322_v50, %v450_v32  ;;  %v452_v35 = vpop.f32.mrb[25].mxu0 }
 0x138   :  { %v592_v36 = vpop.f32.mrb[24].mxu1 }
 0x139   :  { %v626_v37 = vmax.f32 %v619_v33, 0.0  ;;  %v606_v38 = vmax.f32 %v464_v34, %v592_v36  ;;  %v594_v39 = vpop.f32.mrb[25].mxu1 }
 0x13a   :  { %v455_v40 = vpop.f32.mrb[26].mxu0 }
 0x13b   :  { %634 = vst.msk [vmem:[%s1218_s6 + $0x20] sm:$0xff] %vm629_vm2, %v626_v37  ;;  %v620_v41 = vadd.f32 %v674_v61, %v606_v38  ;;  %v465_v42 = vmax.f32 %v323_v55, %v455_v40  ;;  %v457_v43 = vpop.f32.mrb[27].mxu0 }
 0x13c   :  { %v597_v44 = vpop.f32.mrb[26].mxu1 }
 0x13d   :  { %v627_v45 = vmax.f32 %v620_v41, 0.0  ;;  %v607_v46 = vmax.f32 %v465_v42, %v597_v44  ;;  %v599_v47 = vpop.f32.mrb[27].mxu1 }
 0x13f   :  { %635 = vst.msk [vmem:[%s1218_s6 + $0x28] sm:$0xff] %vm629_vm2, %v627_v45  ;;  %v621_v48 = vadd.f32 %v674_v61, %v607_v46 }
 0x141   :  { %v628_v49 = vmax.f32 %v621_v48, 0.0 }
 0x143   :  { %637 = vst.msk [vmem:[%s1218_s6 + $0x30] sm:$0x3] %vm636_vm3, %v628_v49 }

// kernel: forward.5
= control target key start
LH: loop header
LB: loop body
LE: loop exit
PB: predicated region body
PF: predicated region fallthrough
CT: control target
= control target key end

     0   :  { %v712_v4 = vmov 0.0|0.0   ;;  %v713_v26 = vmov 1983009808   ;;  %v90_v28 = vlaneseq  ;;  %vm106_vm0 = vcmask 130048   ;;  %s1030_s0 = inlined_call_operand.vmem [shape: f32[2,400], index: 0, kind: input, shape index: {}]   ;;  %s1031_s1 = inlined_call_operand.vmem [shape: f32[400,120], index: 1, kind: input, shape index: {}]   ;;  %s1032_s2 = inlined_call_operand.vmem [shape: f32[1,120], index: 2, kind: input, shape index: {}]   ;;  %s1033_s3 = inlined_call_operand.vmem [shape: f32[120,84], index: 3, kind: input, shape index: {}]   ;;  %s1034_s4 = inlined_call_operand.vmem [shape: f32[1,84], index: 4, kind: input, shape index: {}]   ;;  %s1035_s5 = inlined_call_operand.vmem [shape: f32[84,10], index: 5, kind: input, shape index: {}]   ;;  %s1036_s6 = inlined_call_operand.vmem [shape: f32[1,10], index: 6, kind: input, shape index: {}]   ;;  %s1037_s7 = inlined_call_operand.hbm [shape: f32[2,10], index: 7, kind: output, shape index: {}]  }
   0x1   :  { %v44_v0 = vld [vmem:[%s1031_s1 + $0x80] sm:$0xff]  ;;  %v45_v1 = vld [vmem:[%s1031_s1 + $0x88] sm:$0xff]  ;;  %619 = vmatprep.subr.bf16.mxu1 %v712_v4  ;;  %v46_v10 = vld [vmem:[%s1031_s1 + $0x90] sm:$0xff]  ;;  %v88_v27 = vunpack.c.l.s4 %v713_v26 }
   0x2   :  { %v28_v2 = vld [vmem:[%s1031_s1] sm:$0xff]  ;;  %v587_v3 = vpack.c.bf16 %v45_v1, %v44_v0  ;;  %v29_v5 = vld [vmem:[%s1031_s1 + $0x8] sm:$0xff]  ;;  %v47_v11 = vld [vmem:[%s1031_s1 + $0x98] sm:$0xff]  ;;  %v91_v39 = vshrl.u32 %v90_v28, 7 }
   0x3   :  { %v60_v6 = vld [vmem:[%s1031_s1 + $0x100] sm:$0xff]  ;;  %v61_v7 = vld [vmem:[%s1031_s1 + $0x108] sm:$0xff]  ;;  %v589_v8 = vpack.c.bf16 %v29_v5, %v28_v2  ;;  %v30_v12 = vld [vmem:[%s1031_s1 + $0x10] sm:$0xff]  ;;  %v591_v13 = vpack.c.bf16 %v47_v11, %v46_v10  ;;  %v89_v38 = vunpack.c.0.s8 %v88_v27 }
   0x4   :  { %v620_v9 = vpack.c.bf16 %v61_v7, %v60_v6  ;;  %588 = vmatprep.subr.bf16.mxu0 %v587_v3  ;;  %v31_v14 = vld [vmem:[%s1031_s1 + $0x18] sm:$0xff]  ;;  %v62_v15 = vld [vmem:[%s1031_s1 + $0x110] sm:$0xff]  ;;  %v48_v19 = vld [vmem:[%s1031_s1 + $0xa0] sm:$0xff] }
   0x5   :  { %v63_v16 = vld [vmem:[%s1031_s1 + $0x118] sm:$0xff]  ;;  %590 = vmatpush3.bf16.msra.mxu0 %v589_v8  ;;  %v593_v17 = vpack.c.bf16 %v31_v14, %v30_v12  ;;  %v49_v20 = vld [vmem:[%s1031_s1 + $0xa8] sm:$0xff]  ;;  %v32_v21 = vld [vmem:[%s1031_s1 + $0x20] sm:$0xff]  ;;  %v92_v49 = vsub.s32 %v89_v38, %v91_v39 }
   0x6   :  { %621 = vmatpush1.bf16.msra.mxu1 %v620_v9  ;;  %v623_v18 = vpack.c.bf16 %v63_v16, %v62_v15  ;;  %592 = vmatprep.subr.bf16.mxu0 %v591_v13  ;;  %v595_v22 = vpack.c.bf16 %v49_v20, %v48_v19  ;;  %v33_v23 = vld [vmem:[%s1031_s1 + $0x28] sm:$0xff]  ;;  %v64_v24 = vld [vmem:[%s1031_s1 + $0x120] sm:$0xff]  ;;  %v50_v29 = vld [vmem:[%s1031_s1 + $0xb0] sm:$0xff] }
   0x7   :  { %622 = vmatprep.subr.bf16.mxu1 %v712_v4  ;;  %v65_v25 = vld [vmem:[%s1031_s1 + $0x128] sm:$0xff]  ;;  %v51_v30 = vld [vmem:[%s1031_s1 + $0xb8] sm:$0xff]  ;;  %v597_v31 = vpack.c.bf16 %v33_v23, %v32_v21  ;;  %v34_v33 = vld [vmem:[%s1031_s1 + $0x30] sm:$0xff] }
   0x8   :  { %v626_v32 = vpack.c.bf16 %v65_v25, %v64_v24  ;;  %v599_v34 = vpack.c.bf16 %v51_v30, %v50_v29  ;;  %v35_v35 = vld [vmem:[%s1031_s1 + $0x38] sm:$0xff]  ;;  %v66_v36 = vld [vmem:[%s1031_s1 + $0x130] sm:$0xff]  ;;  %v52_v40 = vld [vmem:[%s1031_s1 + $0xc0] sm:$0xff] }
   0x9   :  { %594 = vmatpush3.bf16.msra.mxu0 %v593_v17  ;;  %v67_v37 = vld [vmem:[%s1031_s1 + $0x138] sm:$0xff]  ;;  %v53_v41 = vld [vmem:[%s1031_s1 + $0xc8] sm:$0xff]  ;;  %v601_v42 = vpack.c.bf16 %v35_v35, %v34_v33  ;;  %v36_v44 = vld [vmem:[%s1031_s1 + $0x40] sm:$0xff] }
   0xa   :  { %624 = vmatpush1.bf16.msra.mxu1 %v623_v18  ;;  %596 = vmatprep.subr.bf16.mxu0 %v595_v22  ;;  %v629_v43 = vpack.c.bf16 %v67_v37, %v66_v36  ;;  %v603_v45 = vpack.c.bf16 %v53_v41, %v52_v40  ;;  %v37_v46 = vld [vmem:[%s1031_s1 + $0x48] sm:$0xff]  ;;  %v68_v47 = vld [vmem:[%s1031_s1 + $0x140] sm:$0xff]  ;;  %v54_v50 = vld [vmem:[%s1031_s1 + $0xd0] sm:$0xff] }
   0xb   :  { %625 = vmatprep.subr.bf16.mxu1 %v712_v4  ;;  %v69_v48 = vld [vmem:[%s1031_s1 + $0x148] sm:$0xff]  ;;  %v55_v51 = vld [vmem:[%s1031_s1 + $0xd8] sm:$0xff]  ;;  %v605_v52 = vpack.c.bf16 %v37_v46, %v36_v44  ;;  %v38_v54 = vld [vmem:[%s1031_s1 + $0x50] sm:$0xff] }
   0xc   :  { %v632_v53 = vpack.c.bf16 %v69_v48, %v68_v47  ;;  %v27_v55 = vld [vmem:[%s1030_s0] sm:$0xff]  ;;  %v607_v56 = vpack.c.bf16 %v55_v51, %v54_v50  ;;  %v39_v57 = vld [vmem:[%s1031_s1 + $0x58] sm:$0xff]  ;;  %v70_v58 = vld [vmem:[%s1031_s1 + $0x150] sm:$0xff] }
   0xd   :  { %598 = vmatpush3.bf16.msra.mxu0 %v597_v31  ;;  %v71_v59 = vld [vmem:[%s1031_s1 + $0x158] sm:$0xff]  ;;  %v86_v60 = vcombine.high %v27_v55, %v27_v55  ;;  %v93_v61 = vrot.slane %v27_v55, %v92_v49  ;;  %v56_v62 = vld [vmem:[%s1031_s1 + $0xe0] sm:$0xff]  ;;  %v57_v63 = vld [vmem:[%s1031_s1 + $0xe8] sm:$0xff]  ;;  %v609_v2 = vpack.c.bf16 %v39_v57, %v38_v54 }
   0xe   :  { %627 = vmatpush1.bf16.msra.mxu1 %v626_v32  ;;  %600 = vmatprep.subr.bf16.mxu0 %v599_v34  ;;  %v635_v3 = vpack.c.bf16 %v71_v59, %v70_v58  ;;  %v40_v5 = vld [vmem:[%s1031_s1 + $0x60] sm:$0xff] }
   0xf   :  { %628 = vmatprep.subr.bf16.mxu1 %v712_v4  ;;  %v101_v0 = vcombine.high %v93_v61, %v93_v61  ;;  %v100_v1 = vrot.slane %v86_v60, %v92_v49 }
  0x11   :  { %602 = vmatpush3.bf16.msra.mxu0 %v601_v42 }
  0x12   :  { %630 = vmatpush1.bf16.msra.mxu1 %v629_v43  ;;  %604 = vmatprep.subr.bf16.mxu0 %v603_v45 }
  0x13   :  { %631 = vmatprep.subr.bf16.mxu1 %v712_v4 }
  0x15   :  { %606 = vmatpush3.bf16.msra.mxu0 %v605_v52 }
  0x16   :  { %633 = vmatpush1.bf16.msra.mxu1 %v632_v53 }
  0x17   :  { %12 = vsyncpa [#allocation3], 0  ;;  %608 = vmatprep.subr.bf16.mxu0 %v607_v56  ;;  %634 = vmatprep.subr.bf16.mxu1 %v712_v4  ;;  %v611_v6 = vpack.c.bf16 %v57_v63, %v56_v62  ;;  %v41_v7 = vld [vmem:[%s1031_s1 + $0x68] sm:$0xff]  ;;  %v72_v8 = vld [vmem:[%s1031_s1 + $0x160] sm:$0xff]  ;;  %v102_v10 = vcombine.high %v100_v1, %v100_v1  ;;  %v714_v46 = vmov 0.0   ;;  %vm715_vm1 = vmmov 0  }
  0x18   :  { %v73_v9 = vld [vmem:[%s1031_s1 + $0x168] sm:$0xff]  ;;  %v58_v11 = vld [vmem:[%s1031_s1 + $0xf0] sm:$0xff]  ;;  %v59_v12 = vld [vmem:[%s1031_s1 + $0xf8] sm:$0xff]  ;;  %173 = vmatprep.mubr.f32.mxu0 %v101_v0  ;;  %v613_v13 = vpack.c.bf16 %v41_v7, %v40_v5  ;;  %vm272_vm2 = vcmask 982016   ;;  %vm369_vm3 = vcmask 1043456   ;;  %vm365_vm4 = vcmask 687104  }
  0x19   :  { %460 = vmatprep.mubr.msk.f32.mxu1 %vm106_vm0, %v102_v10  ;;  %610 = vmatpush3.bf16.msra.mxu0 %v609_v2  ;;  %v638_v14 = vpack.c.bf16 %v73_v9, %v72_v8  ;;  %v42_v15 = vld [vmem:[%s1031_s1 + $0x70] sm:$0xff]  ;;  %v615_v16 = vpack.c.bf16 %v59_v12, %v58_v11  ;;  %v43_v17 = vld [vmem:[%s1031_s1 + $0x78] sm:$0xff]  ;;  %v76_v22 = vld [vmem:[%s1031_s1 + $0x180] sm:$0xff]  ;;  %vm443_vm5 = vcmask 74752  }
  0x1a   :  { %636 = vmatpush1.bf16.msra.mxu1 %v635_v3  ;;  %612 = vmatprep.subr.bf16.mxu0 %v611_v6  ;;  %v74_v18 = vld [vmem:[%s1031_s1 + $0x170] sm:$0xff]  ;;  %v75_v19 = vld [vmem:[%s1031_s1 + $0x178] sm:$0xff]  ;;  %v617_v20 = vpack.c.bf16 %v43_v17, %v42_v15  ;;  %v77_v23 = vld [vmem:[%s1031_s1 + $0x188] sm:$0xff]  ;;  %s716_s1 = smov [#allocation2]  }
  0x1b   :  { %637 = vmatprep.subr.bf16.mxu1 %v712_v4  ;;  %v641_v21 = vpack.c.bf16 %v75_v19, %v74_v18  ;;  %v250_v24 = vld [vmem:[%s1033_s3] sm:$0xff]  ;;  %v251_v25 = vld [vmem:[%s1033_s3 + $0x8] sm:$0xff]  ;;  %v644_v26 = vpack.c.bf16 %v77_v23, %v76_v22  ;;  %v252_v28 = vld [vmem:[%s1033_s3 + $0x10] sm:$0xff]  ;;  %s451_s15 = sshll.u32 %s716_s1, 4  ;;  %s452_s15 = int_to_ptr.vmem [resolvable:$true] %s451_s15 }
  0x1c   :  { %v647_v27 = vpack.c.bf16 %v251_v25, %v250_v24  ;;  %v253_v29 = vld [vmem:[%s1033_s3 + $0x18] sm:$0xff]  ;;  %v254_v31 = vld [vmem:[%s1033_s3 + $0x20] sm:$0xff]  ;;  %v255_v32 = vld [vmem:[%s1033_s3 + $0x28] sm:$0xff]  ;;  %p693_p1 = scmp.lt.s32.totalorder %s452_s15, %s452_s15 }
  0x1d   :  { %614 = vmatpush3.bf16.msra.mxu0 %v613_v13  ;;  %v650_v30 = vpack.c.bf16 %v253_v29, %v252_v28  ;;  %v653_v33 = vpack.c.bf16 %v255_v32, %v254_v31  ;;  %v256_v34 = vld [vmem:[%s1033_s3 + $0x30] sm:$0xff]  ;;  %v257_v35 = vld [vmem:[%s1033_s3 + $0x38] sm:$0xff]  ;;  %v258_v37 = vld [vmem:[%s1033_s3 + $0x40] sm:$0xff] }
  0x1e   :  { %639 = vmatpush1.bf16.msra.mxu1 %v638_v14  ;;  %616 = vmatprep.subr.bf16.mxu0 %v615_v16  ;;  %v656_v36 = vpack.c.bf16 %v257_v35, %v256_v34  ;;  %v259_v38 = vld [vmem:[%s1033_s3 + $0x48] sm:$0xff]  ;;  %v260_v40 = vld [vmem:[%s1033_s3 + $0x50] sm:$0xff]  ;;  %v261_v41 = vld [vmem:[%s1033_s3 + $0x58] sm:$0xff] }
  0x1f   :  { %640 = vmatprep.subr.bf16.mxu1 %v712_v4  ;;  %v659_v39 = vpack.c.bf16 %v259_v38, %v258_v37  ;;  %v662_v42 = vpack.c.bf16 %v261_v41, %v260_v40  ;;  %v262_v43 = vld [vmem:[%s1033_s3 + $0x60] sm:$0xff]  ;;  %v263_v44 = vld [vmem:[%s1033_s3 + $0x68] sm:$0xff]  ;;  %v264_v47 = vld [vmem:[%s1033_s3 + $0x70] sm:$0xff] }
  0x20   :  { %v665_v45 = vpack.c.bf16 %v263_v44, %v262_v43  ;;  %v347_v48 = vld [vmem:[%s1035_s5] sm:$0xff]  ;;  %v348_v49 = vld [vmem:[%s1035_s5 + $0x8] sm:$0xff]  ;;  %v349_v50 = vld [vmem:[%s1035_s5 + $0x10] sm:$0xff] }
  0x21   :  { %618 = vmatpush3.bf16.msra.mxu0 %v617_v20  ;;  %v668_v51 = vpack.c.bf16 %v348_v49, %v347_v48  ;;  %v350_v52 = vld [vmem:[%s1035_s5 + $0x18] sm:$0xff]  ;;  %v351_v54 = vld [vmem:[%s1035_s5 + $0x20] sm:$0xff]  ;;  %v352_v55 = vld [vmem:[%s1035_s5 + $0x28] sm:$0xff] }
  0x22   :  { %642 = vmatpush1.bf16.msra.mxu1 %v641_v21  ;;  %646 = vmatprep.subr.bf16.mxu0 %v712_v4  ;;  %v671_v53 = vpack.c.bf16 %v350_v52, %v349_v50  ;;  %v674_v56 = vpack.c.bf16 %v352_v55, %v351_v54  ;;  %v353_v57 = vld [vmem:[%s1035_s5 + $0x30] sm:$0xff]  ;;  %v354_v58 = vld [vmem:[%s1035_s5 + $0x38] sm:$0xff]  ;;  %v459_v62 = vld [vmem:[%s1032_s2] ss:$0 sm:$0xff] }
  0x23   :  { %643 = vmatprep.subr.bf16.mxu1 %v712_v4  ;;  %v677_v59 = vpack.c.bf16 %v354_v58, %v353_v57  ;;  %v355_v6 = vld [vmem:[%s1035_s5 + $0x40] sm:$0xff]  ;;  %v357_v8 = vld [vmem:[%s1035_s5 + $0x50] sm:$0xf] }
  0x24   :  { %174 = vmatmul.mubr.f32.vlgmr.msra.gmra.mrb[0].mxu0 %v93_v61  ;;  %v461_v9 = vld [vmem:[%s1034_s4] ss:$0 sm:$0xff] }
  0x25   :  { %648 = vmatpush3.bf16.msra.mxu0 %v647_v27  ;;  %559 = vmatprep.mubr.msk.f32.mxu0 %vm715_vm1, %v714_v46  ;;  %v463_v14 = vld [vmem:[%s1036_s6] ss:$0 sm:$0xff] }
  0x26   :  { %645 = vmatpush1.bf16.msra.mxu1 %v644_v26  ;;  %649 = vmatprep.subr.bf16.mxu0 %v712_v4 }
  0x27   :  { %667 = vmatprep.subr.bf16.mxu1 %v712_v4 }
  0x29   :  { %244 = vmatmul.mubr.f32.vlgmr.msra.gmra.mrb[0].mxu1 %v100_v1  ;;  %651 = vmatpush3.bf16.msra.mxu0 %v650_v30 }
  0x2a   :  { %652 = vmatprep.subr.bf16.mxu0 %v712_v4  ;;  %584 = vmatprep.mubr.msk.f32.mxu1 %vm715_vm1, %v714_v46 }
  0x2b   :  { %669 = vmatpush3.bf16.msra.mxu1 %v668_v51 }
  0x2c   :  { %670 = vmatprep.subr.bf16.mxu1 %v712_v4 }
  0x2d   :  { %654 = vmatpush3.bf16.msra.mxu0 %v653_v33 }
  0x2e   :  { %655 = vmatprep.subr.bf16.mxu0 %v712_v4 }
  0x2f   :  { %672 = vmatpush3.bf16.msra.mxu1 %v671_v53 }
  0x30   :  { %673 = vmatprep.subr.bf16.mxu1 %v712_v4 }
  0x31   :  { %657 = vmatpush3.bf16.msra.mxu0 %v656_v36 }
  0x32   :  { %658 = vmatprep.subr.bf16.mxu0 %v712_v4 }
  0x33   :  { %675 = vmatpush3.bf16.msra.mxu1 %v674_v56 }
  0x34   :  { %676 = vmatprep.subr.bf16.mxu1 %v712_v4 }
  0x35   :  { %660 = vmatpush3.bf16.msra.mxu0 %v659_v39 }
  0x36   :  { %661 = vmatprep.subr.bf16.mxu0 %v712_v4 }
  0x37   :  { %678 = vmatpush3.bf16.msra.mxu1 %v677_v59 }
  0x38   :  { %679 = vmatprep.subr.bf16.mxu1 %v712_v4 }
  0x39   :  { %663 = vmatpush3.bf16.msra.mxu0 %v662_v42 }
  0x3a   :  { %664 = vmatprep.subr.bf16.mxu0 %v712_v4  ;;  %v356_v4 = vld [vmem:[%s1035_s5 + $0x48] sm:$0xff]  ;;  %s688_s5 = scalar_lea.vmem %s452_s15, 32 }
  0x3b   :  { %v680_v7 = vpack.c.bf16 %v356_v4, %v355_v6  ;;  %p689_p0 = scmp.ne.s32.totalorder %s452_s15, %s688_s5  ;;  %p694_p2 = scmp.lt.s32.totalorder %s688_s5, %s688_s5 }
  0x3d   :  { %666 = vmatpush3.bf16.msra.mxu0 %v665_v45  ;;  %681 = vmatpush3.bf16.msra.mxu1 %v680_v7  ;;  %p695_p3 = por %p694_p2, %p693_p1 }
  0x3e   :  { %557 = vmatprep.subr.mxu0 %v714_v46  ;;  %582 = vmatprep.subr.mxu1 %v714_v46 }
  0x3f   :  { %p696_p4 = pnand %p695_p3, %p689_p0 }
  0x41   :  { %558 = vmatpush3.msra.mxu0 %v264_v47  ;;  %583 = vmatpush3.msk.msra.mxu1 %vm369_vm3, %v357_v8 }
  0xf7   :  { %v498_v60 = vpop.f32.mrb[0].mxu0 }
  0xf8   :  { %v499_v61 = vpop.f32.mrb[1].mxu0 }
  0xf9   :  { %v500_v63 = vadd.f32 %v499_v61, %v498_v60 }
  0xfb   :  { %v176_v0 = vadd.f32 %v500_v63, %v459_v62 }
  0xfc   :  { %v245_v1 = vpop.f32.mrb[0].mxu1 }
  0xfd   :  { %v247_v2 = vpop.f32.mrb[1].mxu1  ;;  %v246_v3 = vadd.f32 %v245_v1, %v176_v0 }
  0xff   :  { %v249_v5 = vmax.f32 %v246_v3, 0.0 }
 0x101   :  { %560 = vmatmul.mubr.msk.f32.vlgmr.msra.gmra.mrb[2].mxu0 %vm272_vm2, %v249_v5 }
 0x1d4   :  { %v342_v10 = vpop.f32.mrb[2].mxu0 }
 0x1d5   :  { %v343_v11 = vadd.f32 %v461_v9, %v342_v10  ;;  %v561_v12 = vpop.f32.mrb[3].mxu0 }
 0x1d7   :  { %v346_v13 = vmax.f32 %v343_v11, 0.0 }
 0x1d9   :  { %585 = vmatmul.mubr.msk.f32.vlgmr.msra.gmra.mrb[2].mxu1 %vm365_vm4, %v346_v13 }
 0x2ac   :  { %v439_v15 = vpop.f32.mrb[2].mxu1 }
 0x2ad   :  { %v440_v16 = vadd.f32 %v463_v14, %v439_v15  ;;  %v586_v17 = vpop.f32.mrb[3].mxu1 }
 0x2af   :  { %444 = vst.msk [vmem:[#allocation2] sm:$0x3] %vm443_vm5, %v440_v16 }
 0x2b0   :  { %699 = shalt.err (!%p696_p4)
}
 0x2b1   :  { %s700_s17 = scalar_lea.hbm %s1037_s7, 32 }
 0x2b2   :  { %p701_p5 = scmp.ne.s32.totalorder %s1037_s7, %s700_s17  ;;  %p704_p6 = scmp.lt.u32.totalorder %s700_s17, %s1037_s7 }
 0x2b4   :  { %p706_p7 = pnand %p704_p6, %p701_p5 }
 0x2b6   :  { %709 = shalt.err (!%p706_p7)
}
 0x2b7   :  { %454 = dma.vmem_to_hbm [thread:$0]  %s452_s15, 32, %s1037_s7, [#allocation3]  }
 0x2b8   :  { %710 = dma.done.wait [#allocation3], 32  }
 0x2b9   :  { %711 = vsyncadd [#allocation3], 4294967264 }
 0x2ba   :  { %458 = vsyncpa [#allocation3], 1 }

</bundles_post_ra>
